<compile_context>
chip_gen: v7x
topology: tpu7x:2x2x1
jax: 0.10.0
libtpu: 0.0.40
codegen_flags: <defaults>
</compile_context>

<pallas_src>
import functools

import jax
import jax.numpy as jnp
from jax.experimental import pallas as pl
from jax.experimental.pallas import tpu as pltpu


def _round_up(v, m):
    return ((v + m - 1) // m) * m


def _sublane_multiple(dtype):
    """Sublane alignment quantum for dtype (8 for f32, 16 for bf16, 32 for i8)."""
    return 8 * max(1, 4 // jnp.dtype(dtype).itemsize)


def _pack_weight(w):
    """HWIO (3, 3, Cin, Cout) -> (3_dx, 3_dy*Cin, Cout).

    wpk[dx, dy*Cin + c, o] == w[dy, dx, c, o], so a single matmul of the
    channel-concatenated dy-shifted slabs against wpk[dx] evaluates all three
    dy taps of column dx at once (contraction K = 3*Cin).
    """
    kh, kw, cin, cout = w.shape
    return jnp.transpose(w, (1, 0, 2, 3)).reshape(kw, kh * cin, cout)


def _make_fused_resblock_kernel(H, W, Cin, Cout, Wp, has_downsample):
    """Fused ResBlock forward for one batch element (stride=1), NHWC.

    Flattened padded layout: flat row p = hp * Wp + wp with
      hp in [0, H+2)   (hp==0 / hp==H+1 are zero halo rows)
      wp in [0, Wp)    (wp in [W, Wp) are zero halo columns)
    and pixel (h, w) stored at p = (h+1)*Wp + w.  Since columns W..Wp-1 are
    always zero, "column -1" of a row is supplied by the previous flat row's
    right halo, so tap (dy, dx) is slab_dy[p + (dx-1)]: an aligned row-band
    slice (dy) plus a +-1 pltpu.roll of the matmul result (dx).  The roll
    wraparound rows land on zero columns / cropped outputs only.
    """
    Hp = H + 2
    HWp = H * Wp

    def _zero_halo(ref, c, dt):
        # Halo rows + junk columns.  Re-done every grid step (cheap: O(Wp + H)
        # rows, not the Hp*Wp slab) because a "parallel" grid axis may be
        # sharded across TensorCores and each core has its own scratch, so a
        # program_id(0)==0 guard would leave one core's halos uninitialized.
        ref[0, :, :] = jnp.zeros((Wp, c), dt)
        ref[H + 1, :, :] = jnp.zeros((Wp, c), dt)
        ref[1:H + 1, W:Wp, :] = jnp.zeros((H, Wp - W, c), dt)

    def _slabs(ref, c):
        # dy-shifted row bands of the padded slab, flattened to (HWp, c).
        return [ref[dy:dy + H, :, :].reshape(HWp, c) for dy in range(3)]

    def _conv3x3(lhs, wp_ref, b_f32):
        # lhs: (HWp, K) with the 3 dy taps packed into K; wp_ref[dx]: (K, Cout).
        # The dx (column) shift is applied to the matmul result on the XLU.
        parts = [jnp.dot(lhs, wp_ref[dx], preferred_element_type=jnp.float32)
                 for dx in range(3)]
        return (pltpu.roll(parts[0], 1, 0)
                + parts[1]
                + pltpu.roll(parts[2], HWp - 1, 0)
                + b_f32)

    def kernel(*refs):
        if has_downsample:
            (x_ref, w1p_ref, b1_ref, w2p_ref, b2_ref, wdp_ref, bd_ref,
             o_ref, xraw_ref, xrelu_ref, rpad_ref) = refs
        else:
            (x_ref, w1p_ref, b1_ref, w2p_ref, b2_ref,
             o_ref, xrelu_ref, rpad_ref) = refs
            xraw_ref = None

        in_dt = xrelu_ref.dtype
        r_dt = rpad_ref.dtype
        x_raw = x_ref[0]                                      # (H, W, Cin)

        # ---- padded input slab(s): zero halo, data at [1:H+1, 0:W] ----------
        _zero_halo(xrelu_ref, Cin, in_dt)
        xrelu_ref[1:H + 1, 0:W, :] = jnp.maximum(x_raw, 0)    # input ReLU, once
        if has_downsample:
            _zero_halo(xraw_ref, Cin, in_dt)
            xraw_ref[1:H + 1, 0:W, :] = x_raw                 # raw copy for skip conv

        # ---- conv1(relu(x)) + bias + relu, stored back as a padded slab -----
        lhs1 = jnp.concatenate(_slabs(xrelu_ref, Cin), axis=-1)   # (HWp, 3*Cin)
        r_acc = _conv3x3(lhs1, w1p_ref, b1_ref[...].astype(jnp.float32))
        rpad_ref[1:H + 1, :, :] = (jnp.maximum(r_acc, 0.0)
                                   .reshape(H, Wp, Cout).astype(r_dt))
        _zero_halo(rpad_ref, Cout, r_dt)   # keeps cols W..Wp-1 + halo rows zero

        # ---- conv2(relu(r)) --------------------------------------------------
        lhs2 = jnp.concatenate(_slabs(rpad_ref, Cout), axis=-1)   # (HWp, 3*Cout)
        out_flat = _conv3x3(lhs2, w2p_ref, b2_ref[...].astype(jnp.float32))

        # ---- skip connection + write-back ------------------------------------
        if has_downsample:
            lhsd = jnp.concatenate(_slabs(xraw_ref, Cin), axis=-1)
            out_flat = out_flat + _conv3x3(lhsd, wdp_ref,
                                           bd_ref[...].astype(jnp.float32))
            out = out_flat.reshape(H, Wp, Cout)[:, :W, :]
        else:
            out = (out_flat.reshape(H, Wp, Cout)[:, :W, :]
                   + x_raw.astype(jnp.float32))
        o_ref[0] = out.astype(o_ref.dtype)

    return kernel


def resblock_forward_nhwc(x, params, stride=1):
    """Fused ResBlock forward.  x: (N, H, W, Cin) NHWC.  stride=1 only."""
    if stride != 1:
        # TODO(synk): stride>1 conv1/downsample path not implemented.
        raise NotImplementedError("ResBlock Pallas kernel supports stride=1 only")

    N, H, W, Cin = x.shape
    Cout = params["w1"].shape[-1]
    has_ds = "wd" in params
    Hp = H + 2
    # NOTE: if W is not a multiple of the sublane quantum the data-region
    # stores / output crop become masked sublane accesses (correct, slower).
    Wp = _round_up(W + 1, _sublane_multiple(x.dtype))
    itemsize = jnp.dtype(x.dtype).itemsize

    kernel = _make_fused_resblock_kernel(H, W, Cin, Cout, Wp, has_ds)

    args = [x,
            _pack_weight(params["w1"]), params["b1"].reshape(1, Cout),
            _pack_weight(params["w2"]), params["b2"].reshape(1, Cout)]
    in_specs = [
        pl.BlockSpec((1, H, W, Cin), lambda n: (n, 0, 0, 0)),
        # packed weights / biases: constant index_map -> resident across grid.
        pl.BlockSpec((3, 3 * Cin, Cout), lambda n: (0, 0, 0)),
        pl.BlockSpec((1, Cout), lambda n: (0, 0)),
        pl.BlockSpec((3, 3 * Cout, Cout), lambda n: (0, 0, 0)),
        pl.BlockSpec((1, Cout), lambda n: (0, 0)),
    ]
    scratch = []
    if has_ds:
        args += [_pack_weight(params["wd"]), params["bd"].reshape(1, Cout)]
        in_specs += [
            pl.BlockSpec((3, 3 * Cin, Cout), lambda n: (0, 0, 0)),
            pl.BlockSpec((1, Cout), lambda n: (0, 0)),
        ]
        scratch.append(pltpu.VMEM((Hp, Wp, Cin), x.dtype))    # raw padded x
    scratch += [pltpu.VMEM((Hp, Wp, Cin), x.dtype),           # relu(x), padded
                pltpu.VMEM((Hp, Wp, Cout), x.dtype)]          # relu(conv1), padded

    # Advisory cost estimate so XLA can overlap surrounding ops with the kernel.
    n_cin_convs = 2 if has_ds else 1
    flops = 2 * 9 * N * H * W * (n_cin_convs * Cin * Cout + Cout * Cout)
    param_bytes = sum(int(a.size) * jnp.dtype(a.dtype).itemsize for a in args[1:])
    bytes_accessed = int(N * H * W * (Cin + Cout) * itemsize + param_bytes)
    cost = pl.CostEstimate(flops=int(flops), transcendentals=0,
                           bytes_accessed=bytes_accessed)

    # Raise the scoped-VMEM limit only when the footprint needs it (smallest
    # default is ~16 MiB on v5e); cap below physical VMEM (64 MiB on v7x).
    scratch_bytes = ((2 if has_ds else 1) * Hp * Wp * Cin + Hp * Wp * Cout) * itemsize
    temp_bytes = 8 * H * Wp * 3 * max(Cin, Cout) * 4          # rough live f32 temporaries
    vmem_est = (2 * H * W * (Cin + Cout) * itemsize           # double-buffered I/O blocks
                + 2 * param_bytes                             # resident weights (x2 buffers)
                + scratch_bytes + temp_bytes)
    vmem_limit = None
    if vmem_est > 12 * 1024 * 1024:
        try:
            phys = int(pltpu.get_tpu_info().vmem_capacity_bytes)
        except Exception:
            phys = 64 * 1024 * 1024                           # most restrictive gen (v7x)
        vmem_limit = int(min(max(vmem_est * 5 // 4, 32 * 1024 * 1024),
                             phys * 7 // 8))

    return pl.pallas_call(
        kernel,
        out_shape=jax.ShapeDtypeStruct((N, H, W, Cout), x.dtype),
        grid=(N,),
        in_specs=in_specs,
        out_specs=pl.BlockSpec((1, H, W, Cout), lambda n: (n, 0, 0, 0)),
        scratch_shapes=scratch,
        compiler_params=pltpu.CompilerParams(
            dimension_semantics=("parallel",),
            vmem_limit_bytes=vmem_limit),
        cost_estimate=cost,
    )(*args)


@functools.partial(jax.jit, static_argnames=("stride",))
def resblock_forward(x_nchw, params, stride=1):
    """ResBlock.forward (stride=1).  NCHW boundary for PyTorch parity.

    End-to-end pipelines should call resblock_forward_nhwc directly (keep
    activations NHWC) to avoid the two boundary transpose passes.
    """
    x = jnp.transpose(x_nchw, (0, 2, 3, 1))        # NCHW -> NHWC (glue only)
    out = resblock_forward_nhwc(x, params, stride=stride)
    return jnp.transpose(out, (0, 3, 1, 2))        # NHWC -> NCHW


def init_resblock_params(key, indim, outdim=None, stride=1):
    """Deterministic synthetic parameters.  Weights stored HWIO, bias (Cout,)."""
    if outdim is None:
        outdim = indim
    k1, k2, k3, k4, k5, k6 = jax.random.split(key, 6)
    scale1 = 1.0 / jnp.sqrt(9.0 * indim)
    scale2 = 1.0 / jnp.sqrt(9.0 * outdim)
    params = {
        "w1": jax.random.normal(k1, (3, 3, indim, outdim), jnp.float32) * scale1,
        "b1": jax.random.normal(k2, (outdim,), jnp.float32) * scale1,
        "w2": jax.random.normal(k3, (3, 3, outdim, outdim), jnp.float32) * scale2,
        "b2": jax.random.normal(k4, (outdim,), jnp.float32) * scale2,
    }
    if not (indim == outdim and stride == 1):
        params["wd"] = jax.random.normal(k5, (3, 3, indim, outdim), jnp.float32) * scale1
        params["bd"] = jax.random.normal(k6, (outdim,), jnp.float32) * scale1
    return params


# ------------------------- pure-JAX reference -------------------------------
def _ref_conv3x3(x, w, b, relu_input):
    xi = jnp.maximum(x, 0.0) if relu_input else x
    y = jax.lax.conv_general_dilated(
        xi, w, window_strides=(1, 1), padding="SAME",
        dimension_numbers=("NHWC", "HWIO", "NHWC"))
    return y + b[None, None, None, :]


def _ref_resblock(x_nchw, params):
    x = jnp.transpose(x_nchw, (0, 2, 3, 1))
    r = _ref_conv3x3(x, params["w1"], params["b1"], True)
    r = _ref_conv3x3(r, params["w2"], params["b2"], True)
    if "wd" in params:
        x = _ref_conv3x3(x, params["wd"], params["bd"], False)
    return jnp.transpose(x + r, (0, 3, 1, 2))


if __name__ == "__main__":
    key = jax.random.PRNGKey(0)
    kx, kp1, kp2 = jax.random.split(key, 3)

    N, C, H, W = 2, 4, 16, 16
    x = jax.random.normal(kx, (N, C, H, W), jnp.float32)

    # Case 1: indim == outdim, stride == 1  ->  identity skip (no downsample).
    params = init_resblock_params(kp1, indim=C, outdim=C, stride=1)
    out = resblock_forward(x, params)
    jax.block_until_ready(out)
    ref = _ref_resblock(x, params)
    assert out.shape == (N, C, H, W)
    assert jnp.allclose(out, ref, atol=1e-4, rtol=1e-4), "mismatch (identity skip)"

    # Case 2: indim != outdim (stride == 1)  ->  3x3 conv downsample skip.
    C2 = 8
    params_ds = init_resblock_params(kp2, indim=C, outdim=C2, stride=1)
    out_ds = resblock_forward(x, params_ds)
    jax.block_until_ready(out_ds)
    ref_ds = _ref_resblock(x, params_ds)
    assert out_ds.shape == (N, C2, H, W)
    assert jnp.allclose(out_ds, ref_ds, atol=1e-4, rtol=1e-4), "mismatch (conv skip)"

    print("KERNEL_OK")
</pallas_src>

<mosaic_0001>
module attributes {stable_mosaic.version = 11 : i64} {
  func.func @kernel(%arg0: i32, %arg1: memref<1x16x16x4xf32, #tpu.memory_space<vmem>>, %arg2: memref<3x12x4xf32, #tpu.memory_space<vmem>>, %arg3: memref<1x4xf32, #tpu.memory_space<vmem>>, %arg4: memref<3x12x4xf32, #tpu.memory_space<vmem>>, %arg5: memref<1x4xf32, #tpu.memory_space<vmem>>, %arg6: memref<1x16x16x4xf32, #tpu.memory_space<vmem>>, %arg7: memref<18x24x4xf32, #tpu.memory_space<vmem>>, %arg8: memref<18x24x4xf32, #tpu.memory_space<vmem>>) attributes {dimension_semantics = [#tpu.dimension_semantics<parallel>], iteration_bounds = array<i64: 2>, scalar_prefetch = 0 : i64, scratch_operands = 2 : i64, tpu.core_type = #tpu.core_type<tc>, window_params = [{transform_indices = @transform_0, window_bounds = array<i64: 1, 16, 16, 4>}, {pipeline_mode = #tpu.pipeline_mode<synchronous>, transform_indices = @transform_1, window_bounds = array<i64: 3, 12, 4>}, {pipeline_mode = #tpu.pipeline_mode<synchronous>, transform_indices = @transform_2, window_bounds = array<i64: 1, 4>}, {pipeline_mode = #tpu.pipeline_mode<synchronous>, transform_indices = @transform_3, window_bounds = array<i64: 3, 12, 4>}, {pipeline_mode = #tpu.pipeline_mode<synchronous>, transform_indices = @transform_4, window_bounds = array<i64: 1, 4>}, {transform_indices = @transform_5, window_bounds = array<i64: 1, 16, 16, 4>}]} {
    %c0 = arith.constant 0 : index
    %c0_0 = arith.constant 0 : index
    %c0_1 = arith.constant 0 : index
    %c0_2 = arith.constant 0 : index
    %0 = vector.load %arg1[%c0, %c0_0, %c0_1, %c0_2] : memref<1x16x16x4xf32, #tpu.memory_space<vmem>>, vector<1x16x16x4xf32>
    %1 = vector.shape_cast %0 : vector<1x16x16x4xf32> to vector<16x16x4xf32>
    %cst = arith.constant 0.000000e+00 : f32
    %2 = vector.broadcast %cst : f32 to vector<24x4xf32>
    %c0_3 = arith.constant 0 : index
    %c0_4 = arith.constant 0 : index
    %c0_5 = arith.constant 0 : index
    %3 = vector.load %arg7[%c0_3, %c0_4, %c0_5] : memref<18x24x4xf32, #tpu.memory_space<vmem>>, vector<1x24x4xf32>
    %4 = vector.shape_cast %3 : vector<1x24x4xf32> to vector<24x4xf32>
    %5 = vector.shape_cast %2 : vector<24x4xf32> to vector<1x24x4xf32>
    tpu.vector_store %arg7[%c0_3, %c0_4, %c0_5], %5 {strides = array<i32>} : memref<18x24x4xf32, #tpu.memory_space<vmem>>, vector<1x24x4xf32>,
    %cst_6 = arith.constant 0.000000e+00 : f32
    %6 = vector.broadcast %cst_6 : f32 to vector<24x4xf32>
    %c17 = arith.constant 17 : index
    %c0_7 = arith.constant 0 : index
    %c0_8 = arith.constant 0 : index
    %7 = vector.load %arg7[%c17, %c0_7, %c0_8] : memref<18x24x4xf32, #tpu.memory_space<vmem>>, vector<1x24x4xf32>
    %8 = vector.shape_cast %7 : vector<1x24x4xf32> to vector<24x4xf32>
    %9 = vector.shape_cast %6 : vector<24x4xf32> to vector<1x24x4xf32>
    tpu.vector_store %arg7[%c17, %c0_7, %c0_8], %9 {strides = array<i32>} : memref<18x24x4xf32, #tpu.memory_space<vmem>>, vector<1x24x4xf32>,
    %cst_9 = arith.constant 0.000000e+00 : f32
    %10 = vector.broadcast %cst_9 : f32 to vector<16x8x4xf32>
    %c1 = arith.constant 1 : index
    %c16 = arith.constant 16 : index
    %c0_10 = arith.constant 0 : index
    %11 = vector.load %arg7[%c1, %c16, %c0_10] : memref<18x24x4xf32, #tpu.memory_space<vmem>>, vector<16x8x4xf32>
    tpu.vector_store %arg7[%c1, %c16, %c0_10], %10 {strides = array<i32>} : memref<18x24x4xf32, #tpu.memory_space<vmem>>, vector<16x8x4xf32>,
    %cst_11 = arith.constant 0.000000e+00 : f32
    %12 = vector.broadcast %cst_11 : f32 to vector<16x16x4xf32>
    %13 = arith.maximumf %1, %12 : vector<16x16x4xf32>
    %c1_12 = arith.constant 1 : index
    %c0_13 = arith.constant 0 : index
    %c0_14 = arith.constant 0 : index
    %14 = vector.load %arg7[%c1_12, %c0_13, %c0_14] : memref<18x24x4xf32, #tpu.memory_space<vmem>>, vector<16x16x4xf32>
    tpu.vector_store %arg7[%c1_12, %c0_13, %c0_14], %13 {strides = array<i32>} : memref<18x24x4xf32, #tpu.memory_space<vmem>>, vector<16x16x4xf32>,
    %c0_15 = arith.constant 0 : index
    %c0_16 = arith.constant 0 : index
    %c0_17 = arith.constant 0 : index
    %15 = vector.load %arg7[%c0_15, %c0_16, %c0_17] : memref<18x24x4xf32, #tpu.memory_space<vmem>>, vector<16x24x4xf32>
    %16 = vector.shape_cast %15 : vector<16x24x4xf32> to vector<384x4xf32>
    %c1_18 = arith.constant 1 : index
    %c0_19 = arith.constant 0 : index
    %c0_20 = arith.constant 0 : index
    %17 = vector.load %arg7[%c1_18, %c0_19, %c0_20] : memref<18x24x4xf32, #tpu.memory_space<vmem>>, vector<16x24x4xf32>
    %18 = vector.shape_cast %17 : vector<16x24x4xf32> to vector<384x4xf32>
    %c2 = arith.constant 2 : index
    %c0_21 = arith.constant 0 : index
    %c0_22 = arith.constant 0 : index
    %19 = vector.load %arg7[%c2, %c0_21, %c0_22] : memref<18x24x4xf32, #tpu.memory_space<vmem>>, vector<16x24x4xf32>
    %20 = vector.shape_cast %19 : vector<16x24x4xf32> to vector<384x4xf32>
    %21 = tpu.concatenate %16, %18, %20 in 1 : vector<384x4xf32>, vector<384x4xf32>, vector<384x4xf32> -> vector<384x12xf32>
    %c0_23 = arith.constant 0 : index
    %c0_24 = arith.constant 0 : index
    %22 = vector.load %arg3[%c0_23, %c0_24] : memref<1x4xf32, #tpu.memory_space<vmem>>, vector<1x4xf32>
    %c0_25 = arith.constant 0 : index
    %c0_26 = arith.constant 0 : index
    %c0_27 = arith.constant 0 : index
    %23 = vector.load %arg2[%c0_25, %c0_26, %c0_27] : memref<3x12x4xf32, #tpu.memory_space<vmem>>, vector<1x12x4xf32>
    %24 = vector.shape_cast %23 : vector<1x12x4xf32> to vector<12x4xf32>
    %cst_28 = arith.constant dense<0.000000e+00> : vector<384x4xf32>
    %25 = tpu.matmul %21, %24, %cst_28 {dimension_numbers = #tpu.dot_dimension_numbers<[1], [0], [0], [1], [0, 0, 1, 1], [], []>} : vector<384x12xf32>, vector<12x4xf32>, vector<384x4xf32> -> vector<384x4xf32>
    %c1_29 = arith.constant 1 : index
    %c0_30 = arith.constant 0 : index
    %c0_31 = arith.constant 0 : index
    %26 = vector.load %arg2[%c1_29, %c0_30, %c0_31] : memref<3x12x4xf32, #tpu.memory_space<vmem>>, vector<1x12x4xf32>
    %27 = vector.shape_cast %26 : vector<1x12x4xf32> to vector<12x4xf32>
    %cst_32 = arith.constant dense<0.000000e+00> : vector<384x4xf32>
    %28 = tpu.matmul %21, %27, %cst_32 {dimension_numbers = #tpu.dot_dimension_numbers<[1], [0], [0], [1], [0, 0, 1, 1], [], []>} : vector<384x12xf32>, vector<12x4xf32>, vector<384x4xf32> -> vector<384x4xf32>
    %c2_33 = arith.constant 2 : index
    %c0_34 = arith.constant 0 : index
    %c0_35 = arith.constant 0 : index
    %29 = vector.load %arg2[%c2_33, %c0_34, %c0_35] : memref<3x12x4xf32, #tpu.memory_space<vmem>>, vector<1x12x4xf32>
    %30 = vector.shape_cast %29 : vector<1x12x4xf32> to vector<12x4xf32>
    %cst_36 = arith.constant dense<0.000000e+00> : vector<384x4xf32>
    %31 = tpu.matmul %21, %30, %cst_36 {dimension_numbers = #tpu.dot_dimension_numbers<[1], [0], [0], [1], [0, 0, 1, 1], [], []>} : vector<384x12xf32>, vector<12x4xf32>, vector<384x4xf32> -> vector<384x4xf32>
    %c1_i32 = arith.constant 1 : i32
    %32 = tpu.dynamic_rotate %25 by %c1_i32 dim 0 : vector<384x4xf32>, i32 -> vector<384x4xf32>
    %33 = arith.addf %32, %28 : vector<384x4xf32>
    %c383_i32 = arith.constant 383 : i32
    %34 = tpu.dynamic_rotate %31 by %c383_i32 dim 0 : vector<384x4xf32>, i32 -> vector<384x4xf32>
    %35 = arith.addf %33, %34 : vector<384x4xf32>
    %36 = vector.broadcast %22 : vector<1x4xf32> to vector<384x4xf32>
    %37 = arith.addf %35, %36 : vector<384x4xf32>
    %cst_37 = arith.constant 0.000000e+00 : f32
    %38 = vector.broadcast %cst_37 : f32 to vector<384x4xf32>
    %39 = arith.maximumf %37, %38 : vector<384x4xf32>
    %40 = vector.shape_cast %39 : vector<384x4xf32> to vector<16x24x4xf32>
    %c1_38 = arith.constant 1 : index
    %c0_39 = arith.constant 0 : index
    %c0_40 = arith.constant 0 : index
    %41 = vector.load %arg8[%c1_38, %c0_39, %c0_40] : memref<18x24x4xf32, #tpu.memory_space<vmem>>, vector<16x24x4xf32>
    tpu.vector_store %arg8[%c1_38, %c0_39, %c0_40], %40 {strides = array<i32>} : memref<18x24x4xf32, #tpu.memory_space<vmem>>, vector<16x24x4xf32>,
    %cst_41 = arith.constant 0.000000e+00 : f32
    %42 = vector.broadcast %cst_41 : f32 to vector<24x4xf32>
    %c0_42 = arith.constant 0 : index
    %c0_43 = arith.constant 0 : index
    %c0_44 = arith.constant 0 : index
    %43 = vector.load %arg8[%c0_42, %c0_43, %c0_44] : memref<18x24x4xf32, #tpu.memory_space<vmem>>, vector<1x24x4xf32>
    %44 = vector.shape_cast %43 : vector<1x24x4xf32> to vector<24x4xf32>
    %45 = vector.shape_cast %42 : vector<24x4xf32> to vector<1x24x4xf32>
    tpu.vector_store %arg8[%c0_42, %c0_43, %c0_44], %45 {strides = array<i32>} : memref<18x24x4xf32, #tpu.memory_space<vmem>>, vector<1x24x4xf32>,
    %cst_45 = arith.constant 0.000000e+00 : f32
    %46 = vector.broadcast %cst_45 : f32 to vector<24x4xf32>
    %c17_46 = arith.constant 17 : index
    %c0_47 = arith.constant 0 : index
    %c0_48 = arith.constant 0 : index
    %47 = vector.load %arg8[%c17_46, %c0_47, %c0_48] : memref<18x24x4xf32, #tpu.memory_space<vmem>>, vector<1x24x4xf32>
    %48 = vector.shape_cast %47 : vector<1x24x4xf32> to vector<24x4xf32>
    %49 = vector.shape_cast %46 : vector<24x4xf32> to vector<1x24x4xf32>
    tpu.vector_store %arg8[%c17_46, %c0_47, %c0_48], %49 {strides = array<i32>} : memref<18x24x4xf32, #tpu.memory_space<vmem>>, vector<1x24x4xf32>,
    %cst_49 = arith.constant 0.000000e+00 : f32
    %50 = vector.broadcast %cst_49 : f32 to vector<16x8x4xf32>
    %c1_50 = arith.constant 1 : index
    %c16_51 = arith.constant 16 : index
    %c0_52 = arith.constant 0 : index
    %51 = vector.load %arg8[%c1_50, %c16_51, %c0_52] : memref<18x24x4xf32, #tpu.memory_space<vmem>>, vector<16x8x4xf32>
    tpu.vector_store %arg8[%c1_50, %c16_51, %c0_52], %50 {strides = array<i32>} : memref<18x24x4xf32, #tpu.memory_space<vmem>>, vector<16x8x4xf32>,
    %c0_53 = arith.constant 0 : index
    %c0_54 = arith.constant 0 : index
    %c0_55 = arith.constant 0 : index
    %52 = vector.load %arg8[%c0_53, %c0_54, %c0_55] : memref<18x24x4xf32, #tpu.memory_space<vmem>>, vector<16x24x4xf32>
    %53 = vector.shape_cast %52 : vector<16x24x4xf32> to vector<384x4xf32>
    %c1_56 = arith.constant 1 : index
    %c0_57 = arith.constant 0 : index
    %c0_58 = arith.constant 0 : index
    %54 = vector.load %arg8[%c1_56, %c0_57, %c0_58] : memref<18x24x4xf32, #tpu.memory_space<vmem>>, vector<16x24x4xf32>
    %55 = vector.shape_cast %54 : vector<16x24x4xf32> to vector<384x4xf32>
    %c2_59 = arith.constant 2 : index
    %c0_60 = arith.constant 0 : index
    %c0_61 = arith.constant 0 : index
    %56 = vector.load %arg8[%c2_59, %c0_60, %c0_61] : memref<18x24x4xf32, #tpu.memory_space<vmem>>, vector<16x24x4xf32>
    %57 = vector.shape_cast %56 : vector<16x24x4xf32> to vector<384x4xf32>
    %58 = tpu.concatenate %53, %55, %57 in 1 : vector<384x4xf32>, vector<384x4xf32>, vector<384x4xf32> -> vector<384x12xf32>
    %c0_62 = arith.constant 0 : index
    %c0_63 = arith.constant 0 : index
    %59 = vector.load %arg5[%c0_62, %c0_63] : memref<1x4xf32, #tpu.memory_space<vmem>>, vector<1x4xf32>
    %c0_64 = arith.constant 0 : index
    %c0_65 = arith.constant 0 : index
    %c0_66 = arith.constant 0 : index
    %60 = vector.load %arg4[%c0_64, %c0_65, %c0_66] : memref<3x12x4xf32, #tpu.memory_space<vmem>>, vector<1x12x4xf32>
    %61 = vector.shape_cast %60 : vector<1x12x4xf32> to vector<12x4xf32>
    %cst_67 = arith.constant dense<0.000000e+00> : vector<384x4xf32>
    %62 = tpu.matmul %58, %61, %cst_67 {dimension_numbers = #tpu.dot_dimension_numbers<[1], [0], [0], [1], [0, 0, 1, 1], [], []>} : vector<384x12xf32>, vector<12x4xf32>, vector<384x4xf32> -> vector<384x4xf32>
    %c1_68 = arith.constant 1 : index
    %c0_69 = arith.constant 0 : index
    %c0_70 = arith.constant 0 : index
    %63 = vector.load %arg4[%c1_68, %c0_69, %c0_70] : memref<3x12x4xf32, #tpu.memory_space<vmem>>, vector<1x12x4xf32>
    %64 = vector.shape_cast %63 : vector<1x12x4xf32> to vector<12x4xf32>
    %cst_71 = arith.constant dense<0.000000e+00> : vector<384x4xf32>
    %65 = tpu.matmul %58, %64, %cst_71 {dimension_numbers = #tpu.dot_dimension_numbers<[1], [0], [0], [1], [0, 0, 1, 1], [], []>} : vector<384x12xf32>, vector<12x4xf32>, vector<384x4xf32> -> vector<384x4xf32>
    %c2_72 = arith.constant 2 : index
    %c0_73 = arith.constant 0 : index
    %c0_74 = arith.constant 0 : index
    %66 = vector.load %arg4[%c2_72, %c0_73, %c0_74] : memref<3x12x4xf32, #tpu.memory_space<vmem>>, vector<1x12x4xf32>
    %67 = vector.shape_cast %66 : vector<1x12x4xf32> to vector<12x4xf32>
    %cst_75 = arith.constant dense<0.000000e+00> : vector<384x4xf32>
    %68 = tpu.matmul %58, %67, %cst_75 {dimension_numbers = #tpu.dot_dimension_numbers<[1], [0], [0], [1], [0, 0, 1, 1], [], []>} : vector<384x12xf32>, vector<12x4xf32>, vector<384x4xf32> -> vector<384x4xf32>
    %c1_i32_76 = arith.constant 1 : i32
    %69 = tpu.dynamic_rotate %62 by %c1_i32_76 dim 0 : vector<384x4xf32>, i32 -> vector<384x4xf32>
    %70 = arith.addf %69, %65 : vector<384x4xf32>
    %c383_i32_77 = arith.constant 383 : i32
    %71 = tpu.dynamic_rotate %68 by %c383_i32_77 dim 0 : vector<384x4xf32>, i32 -> vector<384x4xf32>
    %72 = arith.addf %70, %71 : vector<384x4xf32>
    %73 = vector.broadcast %59 : vector<1x4xf32> to vector<384x4xf32>
    %74 = arith.addf %72, %73 : vector<384x4xf32>
    %75 = vector.shape_cast %74 : vector<384x4xf32> to vector<16x24x4xf32>
    %76 = vector.extract_strided_slice %75 {offsets = [0, 0, 0], sizes = [16, 16, 4], strides = [1, 1, 1]} : vector<16x24x4xf32> to vector<16x16x4xf32>
    %77 = arith.addf %76, %1 : vector<16x16x4xf32>
    %c0_78 = arith.constant 0 : index
    %c0_79 = arith.constant 0 : index
    %c0_80 = arith.constant 0 : index
    %c0_81 = arith.constant 0 : index
    %78 = vector.load %arg6[%c0_78, %c0_79, %c0_80, %c0_81] : memref<1x16x16x4xf32, #tpu.memory_space<vmem>>, vector<1x16x16x4xf32>
    %79 = vector.shape_cast %78 : vector<1x16x16x4xf32> to vector<16x16x4xf32>
    %80 = vector.shape_cast %77 : vector<16x16x4xf32> to vector<1x16x16x4xf32>
    tpu.vector_store %arg6[%c0_78, %c0_79, %c0_80, %c0_81], %80 {strides = array<i32>} : memref<1x16x16x4xf32, #tpu.memory_space<vmem>>, vector<1x16x16x4xf32>,
    return
  }
  func.func @transform_0(%arg0: i32) -> (i32, i32, i32, i32) {
    %c0_i32 = arith.constant 0 : i32
    %c0_i32_0 = arith.constant 0 : i32
    %c0_i32_1 = arith.constant 0 : i32
    %c0_i32_2 = arith.constant 0 : i32
    return %arg0, %c0_i32, %c0_i32_0, %c0_i32_1 : i32, i32, i32, i32
  }
  func.func @transform_1(%arg0: i32) -> (i32, i32, i32) {
    %c0_i32 = arith.constant 0 : i32
    %c0_i32_0 = arith.constant 0 : i32
    %c0_i32_1 = arith.constant 0 : i32
    %c0_i32_2 = arith.constant 0 : i32
    return %c0_i32, %c0_i32_0, %c0_i32_1 : i32, i32, i32
  }
  func.func @transform_2(%arg0: i32) -> (i32, i32) {
    %c0_i32 = arith.constant 0 : i32
    %c0_i32_0 = arith.constant 0 : i32
    %c0_i32_1 = arith.constant 0 : i32
    return %c0_i32, %c0_i32_0 : i32, i32
  }
  func.func @transform_3(%arg0: i32) -> (i32, i32, i32) {
    %c0_i32 = arith.constant 0 : i32
    %c0_i32_0 = arith.constant 0 : i32
    %c0_i32_1 = arith.constant 0 : i32
    %c0_i32_2 = arith.constant 0 : i32
    return %c0_i32, %c0_i32_0, %c0_i32_1 : i32, i32, i32
  }
  func.func @transform_4(%arg0: i32) -> (i32, i32) {
    %c0_i32 = arith.constant 0 : i32
    %c0_i32_0 = arith.constant 0 : i32
    %c0_i32_1 = arith.constant 0 : i32
    return %c0_i32, %c0_i32_0 : i32, i32
  }
  func.func @transform_5(%arg0: i32) -> (i32, i32, i32, i32) {
    %c0_i32 = arith.constant 0 : i32
    %c0_i32_0 = arith.constant 0 : i32
    %c0_i32_1 = arith.constant 0 : i32
    %c0_i32_2 = arith.constant 0 : i32
    return %arg0, %c0_i32, %c0_i32_0, %c0_i32_1 : i32, i32, i32, i32
  }
}

</mosaic_0001>

<bundles_post_ra>
// kernel: resblock_forward.1
= control target key start
LH: loop header
LB: loop body
LE: loop exit
PB: predicated region body
PF: predicated region fallthrough
CT: control target
= control target key end

     0   :  { %s5779_s18 = smov 0   ;;  %s8445_s0 = inlined_call_operand.vmem [shape: f32[2,16,16,4], index: 0, kind: input, shape index: {}]   ;;  %s8446_s1 = inlined_call_operand.vmem [shape: f32[3,12,4], index: 1, kind: input, shape index: {}]   ;;  %s8447_s2 = inlined_call_operand.vmem [shape: f32[1,4], index: 2, kind: input, shape index: {}]   ;;  %s8448_s3 = inlined_call_operand.vmem [shape: f32[3,12,4], index: 3, kind: input, shape index: {}]   ;;  %s8449_s4 = inlined_call_operand.vmem [shape: f32[1,4], index: 4, kind: input, shape index: {}]   ;;  %s8450_s5 = inlined_call_operand.vmem [shape: f32[2,16,16,4], index: 5, kind: output, shape index: {}]  }
   0x1 LB: > { %s4584_s19 = sadd.s32 4294967295, %s5743_s18   ;;  %p4588_p0 = scmp.ge.s32.totalorder %s5743_s18, 1  ;;  %s5743_s18 = sphi %s5779_s18, %s15_s18  }
   0x2   : > { %p187_p1 = scmp.lt.s32.totalorder %s5743_s18, 3 }
   0x4   : > { %p188_p2 = pnand %p4588_p0, %p187_p1 }
   0x6   : > { %191 = sbr.rel (%p188_p2) target bundleno = 1196 (0x4ac), region = 40 }
   0xd   : > { %vm257_vm0 = vcmask 31744   ;;  %v8451_v0 = vmov 0.0   ;;  %p215_p3 = scmp.lt.s32.totalorder %s4584_s19, 1  ;;  %v973_v1 = vld [vmem:[%s8446_s1] sm:$0xff]  ;;  %v974_v2 = vld [vmem:[%s8446_s1 + $0x8] sm:$0xf] }
   0xe   : > { %266 = vst.msk [vmem:[#allocation2 + $0x28] sm:$0xff] %vm257_vm0, %v8451_v0  ;;  %258 = vst.msk [vmem:[#allocation2] sm:$0xff] %vm257_vm0, %v8451_v0  ;;  %v4642_v3 = vld [vmem:[%s8446_s1 + $0x10] sm:$0xff]  ;;  %vm1120_vm1 = vcmask 1043456   ;;  %v5657_v4 = vpack.c.bf16 %v974_v2, %v973_v1  ;;  %v4643_v5 = vld [vmem:[%s8446_s1 + $0x18] sm:$0xf] }
   0xf   : > { %259 = vst.msk [vmem:[#allocation2 + $0x8] sm:$0xff] %vm257_vm0, %v8451_v0  ;;  %260 = vst.msk [vmem:[#allocation2 + $0x10] sm:$0xff] %vm257_vm0, %v8451_v0  ;;  %s8472_s19 = smov (!%p215_p3, %s4584_s19), 1  ;;  %vm5746_vm2 = vmmov 1   ;;  %v5663_v7 = vpack.c.bf16 %v4643_v5, %v4642_v3  ;;  %s5747_s7 = smov 4   ;;  %vm975_vm4 = vcmask 97280  }
  0x10   : > { %262 = vst.msk [vmem:[#allocation2 + $0x198] sm:$0xff] %vm257_vm0, %v8451_v0  ;;  %263 = vst.msk [vmem:[#allocation2 + $0x1a0] sm:$0xff] %vm257_vm0, %v8451_v0  ;;  %s4899_s26 = sshll.u32 %s8472_s19, 8  ;;  %s5748_s8 = smov 8   ;;  %vm923_vm5 = vcmask 64512  }
  0x11   : > { %264 = vst.msk [vmem:[#allocation2 + $0x1a8] sm:$0xff] %vm257_vm0, %v8451_v0  ;;  %267 = vst.msk [vmem:[#allocation2 + $0x40] sm:$0xff] %vm257_vm0, %v8451_v0  ;;  %s5867_s6 = scalar_lea.vmem %s8445_s0, %s4899_s26  ;;  %s8220_s10 = scalar_lea.vmem %s8450_s5, %s4899_s26 }
  0x12   : > { %268 = vst.msk [vmem:[#allocation2 + $0x58] sm:$0xff] %vm257_vm0, %v8451_v0  ;;  %269 = vst.msk [vmem:[#allocation2 + $0x70] sm:$0xff] %vm257_vm0, %v8451_v0  ;;  %v227_v8 = vld [vmem:[%s5867_s6 + $0x10] sm:$0xff]  ;;  %v225_v9 = vld [vmem:[%s5867_s6] sm:$0xff] }
  0x13   : > { %270 = vst.msk [vmem:[#allocation2 + $0x88] sm:$0xff] %vm257_vm0, %v8451_v0  ;;  %271 = vst.msk [vmem:[#allocation2 + $0xa0] sm:$0xff] %vm257_vm0, %v8451_v0  ;;  %v228_v10 = vld [vmem:[%s5867_s6 + $0x18] sm:$0xff]  ;;  %v284_v13 = vmax.f32 %v227_v8, 0.0  ;;  %v282_v14 = vmax.f32 %v225_v9, 0.0  ;;  %v226_v16 = vld [vmem:[%s5867_s6 + $0x8] sm:$0xff] }
  0x14   : > { %272 = vst.msk [vmem:[#allocation2 + $0xb8] sm:$0xff] %vm257_vm0, %v8451_v0  ;;  %273 = vst.msk [vmem:[#allocation2 + $0xd0] sm:$0xff] %vm257_vm0, %v8451_v0  ;;  %v285_v15 = vmax.f32 %v228_v10, 0.0  ;;  %v283_v17 = vmax.f32 %v226_v16, 0.0  ;;  %v229_v18 = vld [vmem:[%s5867_s6 + $0x20] sm:$0xff]  ;;  %v230_v19 = vld [vmem:[%s5867_s6 + $0x28] sm:$0xff] }
  0x15   : > { %274 = vst.msk [vmem:[#allocation2 + $0xe8] sm:$0xff] %vm257_vm0, %v8451_v0  ;;  %275 = vst.msk [vmem:[#allocation2 + $0x100] sm:$0xff] %vm257_vm0, %v8451_v0  ;;  %v5878_v11 = vld [vmem:[#allocation2 + $0x28] sm:$0xff]  ;;  %v286_v20 = vmax.f32 %v229_v18, 0.0  ;;  %v287_v21 = vmax.f32 %v230_v19, 0.0  ;;  %v231_v22 = vld [vmem:[%s5867_s6 + $0x30] sm:$0xff] }
  0x16   : > { %276 = vst.msk [vmem:[#allocation2 + $0x118] sm:$0xff] %vm257_vm0, %v8451_v0  ;;  %277 = vst.msk [vmem:[#allocation2 + $0x130] sm:$0xff] %vm257_vm0, %v8451_v0  ;;  %543 = vrot.lane.b32.xlu0 %v5878_v11, %s5747_s7  ;;  %v232_v23 = vld [vmem:[%s5867_s6 + $0x38] sm:$0xff]  ;;  %v288_v24 = vmax.f32 %v231_v22, 0.0  ;;  %v233_v26 = vld [vmem:[%s5867_s6 + $0x40] sm:$0xff] }
  0x17   : > { %278 = vst.msk [vmem:[#allocation2 + $0x148] sm:$0xff] %vm257_vm0, %v8451_v0  ;;  %279 = vst.msk [vmem:[#allocation2 + $0x160] sm:$0xff] %vm257_vm0, %v8451_v0  ;;  %v289_v25 = vmax.f32 %v232_v23, 0.0  ;;  %v234_v27 = vld [vmem:[%s5867_s6 + $0x48] sm:$0xff]  ;;  %v290_v28 = vmax.f32 %v233_v26, 0.0  ;;  %v235_v30 = vld [vmem:[%s5867_s6 + $0x50] sm:$0xff] }
  0x18   : > { %280 = vst.msk [vmem:[#allocation2 + $0x178] sm:$0xff] %vm257_vm0, %v8451_v0  ;;  %281 = vst.msk [vmem:[#allocation2 + $0x190] sm:$0xff] %vm257_vm0, %v8451_v0  ;;  %v5880_v12 = vld [vmem:[#allocation2 + $0x40] sm:$0xff]  ;;  %v291_v29 = vmax.f32 %v234_v27, 0.0  ;;  %v236_v31 = vld [vmem:[%s5867_s6 + $0x58] sm:$0xff]  ;;  %v292_v32 = vmax.f32 %v235_v30, 0.0 }
  0x19   : > { %2494 = vst.msk [vmem:[#allocation3] sm:$0xff] %vm257_vm0, %v8451_v0  ;;  %2495 = vst.msk [vmem:[#allocation3 + $0x8] sm:$0xff] %vm257_vm0, %v8451_v0  ;;  %549 = vrot.lane.b32.xlu1 %v5880_v12, %s5747_s7  ;;  %v293_v33 = vmax.f32 %v236_v31, 0.0  ;;  %v237_v34 = vld [vmem:[%s5867_s6 + $0x60] sm:$0xff]  ;;  %v238_v35 = vld [vmem:[%s5867_s6 + $0x68] sm:$0xff] }
  0x1a   : > { %2496 = vst.msk [vmem:[#allocation3 + $0x10] sm:$0xff] %vm257_vm0, %v8451_v0  ;;  %2498 = vst.msk [vmem:[#allocation3 + $0x198] sm:$0xff] %vm257_vm0, %v8451_v0  ;;  %735 = vrot.lane.b32.xlu0 %v5880_v12, %s5748_s8  ;;  %v294_v36 = vmax.f32 %v237_v34, 0.0  ;;  %v295_v37 = vmax.f32 %v238_v35, 0.0  ;;  %v239_v38 = vld [vmem:[%s5867_s6 + $0x70] sm:$0xff]  ;;  %v240_v39 = vld [vmem:[%s5867_s6 + $0x78] sm:$0xff] }
  0x1b   : > { %2499 = vst.msk [vmem:[#allocation3 + $0x1a0] sm:$0xff] %vm257_vm0, %v8451_v0  ;;  %2500 = vst.msk [vmem:[#allocation3 + $0x1a8] sm:$0xff] %vm257_vm0, %v8451_v0  ;;  %v296_v40 = vmax.f32 %v239_v38, 0.0  ;;  %v297_v41 = vmax.f32 %v240_v39, 0.0  ;;  %v241_v42 = vld [vmem:[%s5867_s6 + $0x80] sm:$0xff]  ;;  %v242_v43 = vld [vmem:[%s5867_s6 + $0x88] sm:$0xff] }
  0x1c   : > { %vm5869_vm3 = vmpackc.low %vm1120_vm1, %vm5746_vm2  ;;  %316 = vst.msk [vmem:[#allocation2 + $0x30] sm:$0xff] %vm257_vm0, %v284_v13  ;;  %v298_v44 = vmax.f32 %v241_v42, 0.0  ;;  %v299_v45 = vmax.f32 %v242_v43, 0.0  ;;  %v243_v46 = vld [vmem:[%s5867_s6 + $0x90] sm:$0xff]  ;;  %v244_v47 = vld [vmem:[%s5867_s6 + $0x98] sm:$0xff] }
  0x1d   : > { %5659 = vmatprep.subr.msk.bf16.mxu0 %vm5869_vm3, %v5657_v4  ;;  %5665 = vmatprep.subr.msk.bf16.mxu1 %vm5869_vm3, %v5663_v7  ;;  %314 = vst.msk [vmem:[#allocation2 + $0x18] sm:$0xff] %vm257_vm0, %v282_v14  ;;  %317 = vst.msk [vmem:[#allocation2 + $0x38] sm:$0xff] %vm257_vm0, %v285_v15  ;;  %v300_v50 = vmax.f32 %v243_v46, 0.0  ;;  %v301_v51 = vmax.f32 %v244_v47, 0.0  ;;  %v245_v52 = vld [vmem:[%s5867_s6 + $0xa0] sm:$0xff]  ;;  %v246_v56 = vld [vmem:[%s5867_s6 + $0xa8] sm:$0xff] }
  0x1e   : > { %5662 = vmatpush3.bf16.msk.msra.mxu0 %vm5869_vm3, %v5657_v4  ;;  %5668 = vmatpush3.bf16.msk.msra.mxu1 %vm5869_vm3, %v5663_v7  ;;  %315 = vst.msk [vmem:[#allocation2 + $0x20] sm:$0xff] %vm257_vm0, %v283_v17  ;;  %318 = vst.msk [vmem:[#allocation2 + $0x48] sm:$0xff] %vm257_vm0, %v286_v20  ;;  %v302_v55 = vmax.f32 %v245_v52, 0.0  ;;  %v303_v57 = vmax.f32 %v246_v56, 0.0  ;;  %v247_v58 = vld [vmem:[%s5867_s6 + $0xb0] sm:$0xff]  ;;  %v248_v60 = vld [vmem:[%s5867_s6 + $0xb8] sm:$0xff] }
  0x1f   : > { %319 = vst.msk [vmem:[#allocation2 + $0x50] sm:$0xff] %vm257_vm0, %v287_v21  ;;  %320 = vst.msk [vmem:[#allocation2 + $0x60] sm:$0xff] %vm257_vm0, %v288_v24  ;;  %v304_v59 = vmax.f32 %v247_v58, 0.0  ;;  %v305_v61 = vmax.f32 %v248_v60, 0.0  ;;  %v249_v63 = vld [vmem:[%s5867_s6 + $0xc0] sm:$0xff]  ;;  %v250_v3 = vld [vmem:[%s5867_s6 + $0xc8] sm:$0xff] }
  0x20   : > { %321 = vst.msk [vmem:[#allocation2 + $0x68] sm:$0xff] %vm257_vm0, %v289_v25  ;;  %322 = vst.msk [vmem:[#allocation2 + $0x78] sm:$0xff] %vm257_vm0, %v290_v28  ;;  %v306_v2 = vmax.f32 %v249_v63, 0.0  ;;  %v251_v4 = vld [vmem:[%s5867_s6 + $0xd0] sm:$0xff]  ;;  %v307_v5 = vmax.f32 %v250_v3, 0.0  ;;  %v252_v8 = vld [vmem:[%s5867_s6 + $0xd8] sm:$0xff] }
  0x21   : > { %323 = vst.msk [vmem:[#allocation2 + $0x80] sm:$0xff] %vm257_vm0, %v291_v29  ;;  %324 = vst.msk [vmem:[#allocation2 + $0x90] sm:$0xff] %vm257_vm0, %v292_v32  ;;  %v308_v7 = vmax.f32 %v251_v4, 0.0  ;;  %v309_v9 = vmax.f32 %v252_v8, 0.0  ;;  %v5974_v10 = vld [vmem:[#allocation2 + $0x58] sm:$0xff]  ;;  %v253_v13 = vld [vmem:[%s5867_s6 + $0xe0] sm:$0xff] }
  0x22   : > { %325 = vst.msk [vmem:[#allocation2 + $0x98] sm:$0xff] %vm257_vm0, %v293_v33  ;;  %326 = vst.msk [vmem:[#allocation2 + $0xa8] sm:$0xff] %vm257_vm0, %v294_v36  ;;  %v310_v14 = vmax.f32 %v253_v13, 0.0  ;;  %v254_v16 = vld [vmem:[%s5867_s6 + $0xe8] sm:$0xff]  ;;  %v5997_v19 = vld [vmem:[#allocation2 + $0x70] sm:$0xff] }
  0x23   : > { %327 = vst.msk [vmem:[#allocation2 + $0xb0] sm:$0xff] %vm257_vm0, %v295_v37  ;;  %v5925_v48 = vld [vmem:[#allocation2 + $0x30] sm:$0xff]  ;;  %328 = vst.msk [vmem:[#allocation2 + $0xc0] sm:$0xff] %vm257_vm0, %v296_v40  ;;  %v311_v17 = vmax.f32 %v254_v16, 0.0  ;;  %v256_v23 = vld [vmem:[%s5867_s6 + $0xf8] sm:$0xff] }
  0x24   : > { %v5927_v49 = vld [vmem:[#allocation2 + $0x18] sm:$0xff]  ;;  %329 = vst.msk [vmem:[#allocation2 + $0xc8] sm:$0xff] %vm257_vm0, %v297_v41  ;;  %731 = vrot.lane.b32.xlu1 %v5925_v48, %s5748_s8  ;;  %330 = vst.msk [vmem:[#allocation2 + $0xd8] sm:$0xff] %vm257_vm0, %v298_v44  ;;  %v255_v20 = vld [vmem:[%s5867_s6 + $0xf0] sm:$0xff]  ;;  %v313_v24 = vmax.f32 %v256_v23, 0.0 }
  0x25   : > { %539 = vrot.lane.b32.xlu0 %v5927_v49, %s5747_s7  ;;  %331 = vst.msk [vmem:[#allocation2 + $0xe0] sm:$0xff] %vm257_vm0, %v299_v45  ;;  %v5938_v53 = vld [vmem:[#allocation2 + $0x38] sm:$0xff]  ;;  %v5940_v54 = vld [vmem:[#allocation2 + $0x20] sm:$0xff]  ;;  %332 = vst.msk [vmem:[#allocation2 + $0xf0] sm:$0xff] %vm257_vm0, %v300_v50  ;;  %v312_v21 = vmax.f32 %v255_v20, 0.0 }
  0x26   : > { %333 = vst.msk [vmem:[#allocation2 + $0xf8] sm:$0xff] %vm257_vm0, %v301_v51  ;;  %334 = vst.msk [vmem:[#allocation2 + $0x108] sm:$0xff] %vm257_vm0, %v302_v55  ;;  %v5958_v62 = vld [vmem:[#allocation2 + $0x48] sm:$0xff]  ;;  %v5961_v1 = vld [vmem:[#allocation2 + $0x50] sm:$0xff] }
  0x27   : > { %335 = vst.msk [vmem:[#allocation2 + $0x110] sm:$0xff] %vm257_vm0, %v303_v57  ;;  %336 = vst.msk [vmem:[#allocation2 + $0x120] sm:$0xff] %vm257_vm0, %v304_v59  ;;  %v5982_v15 = vld [vmem:[#allocation2 + $0x60] sm:$0xff]  ;;  %v5990_v18 = vld [vmem:[#allocation2 + $0x68] sm:$0xff] }
  0x28   : > { %733 = vrot.lane.b32.xlu1 %v5938_v53, %s5748_s8  ;;  %337 = vst.msk [vmem:[#allocation2 + $0x128] sm:$0xff] %vm257_vm0, %v305_v61  ;;  %338 = vst.msk [vmem:[#allocation2 + $0x138] sm:$0xff] %vm257_vm0, %v306_v2  ;;  %v6004_v22 = vld [vmem:[#allocation2 + $0x78] sm:$0xff]  ;;  %v6012_v25 = vld [vmem:[#allocation2 + $0x80] sm:$0xff] }
  0x29   : > { %541 = vrot.lane.b32.xlu0 %v5940_v54, %s5747_s7  ;;  %339 = vst.msk [vmem:[#allocation2 + $0x140] sm:$0xff] %vm257_vm0, %v307_v5  ;;  %340 = vst.msk [vmem:[#allocation2 + $0x150] sm:$0xff] %vm257_vm0, %v308_v7  ;;  %v6019_v26 = vld [vmem:[#allocation2 + $0x88] sm:$0xff]  ;;  %v6025_v27 = vld [vmem:[#allocation2 + $0x90] sm:$0xff] }
  0x2a   : > { %341 = vst.msk [vmem:[#allocation2 + $0x158] sm:$0xff] %vm257_vm0, %v309_v9  ;;  %342 = vst.msk [vmem:[#allocation2 + $0x168] sm:$0xff] %vm257_vm0, %v310_v14  ;;  %v6031_v28 = vld [vmem:[#allocation2 + $0x98] sm:$0xff]  ;;  %v6037_v29 = vld [vmem:[#allocation2 + $0xa0] sm:$0xff] }
  0x2b   : > { %343 = vst.msk [vmem:[#allocation2 + $0x170] sm:$0xff] %vm257_vm0, %v311_v17  ;;  %344 = vst.msk [vmem:[#allocation2 + $0x180] sm:$0xff] %vm257_vm0, %v312_v21  ;;  %v6043_v30 = vld [vmem:[#allocation2 + $0xa8] sm:$0xff]  ;;  %v6049_v31 = vld [vmem:[#allocation2 + $0xb0] sm:$0xff] }
  0x2c   : > { %545 = vrot.lane.b32.xlu1 %v5925_v48, %s5747_s7  ;;  %345 = vst.msk [vmem:[#allocation2 + $0x188] sm:$0xff] %vm257_vm0, %v313_v24  ;;  %v6055_v32 = vld [vmem:[#allocation2 + $0xb8] sm:$0xff]  ;;  %v6061_v33 = vld [vmem:[#allocation2 + $0xc0] sm:$0xff]  ;;  %v6067_v34 = vld [vmem:[#allocation2 + $0xc8] sm:$0xff] }
  0x2d   : > { %547 = vrot.lane.b32.xlu0 %v5938_v53, %s5747_s7  ;;  %v6073_v35 = vld [vmem:[#allocation2 + $0xd0] sm:$0xff]  ;;  %v6079_v36 = vld [vmem:[#allocation2 + $0xd8] sm:$0xff]  ;;  %v4693_v37 = vld [vmem:[%s8446_s1 + $0x20] sm:$0xff] }
  0x2e   : > { %v4694_v38 = vld [vmem:[%s8446_s1 + $0x28] sm:$0xf]  ;;  %v6091_v40 = vld [vmem:[#allocation2 + $0xe0] sm:$0xff]  ;;  %v6105_v42 = vld [vmem:[#allocation2 + $0xf0] sm:$0xff] }
  0x2f   : > { %v5669_v39 = vpack.c.bf16 %v4694_v38, %v4693_v37  ;;  %v6099_v41 = vld [vmem:[#allocation2 + $0xe8] sm:$0xff]  ;;  %v6111_v43 = vld [vmem:[#allocation2 + $0xf8] sm:$0xff]  ;;  %v6117_v44 = vld [vmem:[#allocation2 + $0x100] sm:$0xff] }
  0x30   : > { %737 = vrot.lane.b32.xlu1 %v5958_v62, %s5748_s8  ;;  %v6123_v45 = vld [vmem:[#allocation2 + $0x108] sm:$0xff]  ;;  %v6129_v47 = vld [vmem:[#allocation2 + $0x110] sm:$0xff]  ;;  %v6135_v52 = vld [vmem:[#allocation2 + $0x118] sm:$0xff] }
  0x31   : > { %739 = vrot.lane.b32.xlu0 %v5961_v1, %s5748_s8  ;;  %5671 = vmatprep.subr.msk.bf16.mxu0 %vm5869_vm3, %v5669_v39  ;;  %v346_v55 = vld [vmem:[#allocation2] sm:$0xff]  ;;  %v348_v59 = vld [vmem:[#allocation2 + $0x10] sm:$0xff]  ;;  %v347_v63 = vld [vmem:[#allocation2 + $0x8] sm:$0xff] }
  0x32   : > { %v6141_v56 = vld [vmem:[#allocation2 + $0x120] sm:$0xff]  ;;  %v6155_v2 = vld [vmem:[#allocation2 + $0x128] sm:$0xff]  ;;  %v6173_v13 = vld [vmem:[#allocation2 + $0x130] sm:$0xff] }
  0x33   : > { %v6187_v20 = vld [vmem:[#allocation2 + $0x138] sm:$0xff] }
  0x34   : > { %741 = vrot.lane.b32.xlu1 %v5974_v10, %s5748_s8 }
  0x35   : > { %551 = vrot.lane.b32.xlu0 %v5958_v62, %s5747_s7 }
  0x38   : > { %553 = vrot.lane.b32.xlu1 %v5961_v1, %s5747_s7 }
  0x39   : > { %743 = vrot.lane.b32.xlu0 %v5982_v15, %s5748_s8 }
  0x3c   : > { %745 = vrot.lane.b32.xlu1 %v5990_v18, %s5748_s8 }
  0x3d   : > { %555 = vrot.lane.b32.xlu0 %v5974_v10, %s5747_s7 }
  0x40   : > { %557 = vrot.lane.b32.xlu1 %v5982_v15, %s5747_s7 }
  0x41   : > { %747 = vrot.lane.b32.xlu0 %v5997_v19, %s5748_s8 }
  0x44   : > { %749 = vrot.lane.b32.xlu1 %v6004_v22, %s5748_s8 }
  0x45   : > { %559 = vrot.lane.b32.xlu0 %v5990_v18, %s5747_s7 }
  0x48   : > { %561 = vrot.lane.b32.xlu1 %v5997_v19, %s5747_s7 }
  0x49   : > { %751 = vrot.lane.b32.xlu0 %v6012_v25, %s5748_s8 }
  0x4c   : > { %753 = vrot.lane.b32.xlu1 %v6019_v26, %s5748_s8 }
  0x4d   : > { %563 = vrot.lane.b32.xlu0 %v6004_v22, %s5747_s7 }
  0x50   : > { %565 = vrot.lane.b32.xlu1 %v6012_v25, %s5747_s7 }
  0x51   : > { %755 = vrot.lane.b32.xlu0 %v6025_v27, %s5748_s8 }
  0x54   : > { %757 = vrot.lane.b32.xlu1 %v6031_v28, %s5748_s8 }
  0x55   : > { %567 = vrot.lane.b32.xlu0 %v6019_v26, %s5747_s7 }
  0x58   : > { %569 = vrot.lane.b32.xlu1 %v6025_v27, %s5747_s7 }
  0x59   : > { %759 = vrot.lane.b32.xlu0 %v6037_v29, %s5748_s8 }
  0x5c   : > { %761 = vrot.lane.b32.xlu1 %v6043_v30, %s5748_s8 }
  0x5d   : > { %571 = vrot.lane.b32.xlu0 %v6031_v28, %s5747_s7 }
  0x60   : > { %573 = vrot.lane.b32.xlu1 %v6037_v29, %s5747_s7 }
  0x61   : > { %763 = vrot.lane.b32.xlu0 %v6049_v31, %s5748_s8 }
  0x64   : > { %765 = vrot.lane.b32.xlu1 %v6055_v32, %s5748_s8 }
  0x65   : > { %575 = vrot.lane.b32.xlu0 %v6043_v30, %s5747_s7 }
  0x68   : > { %577 = vrot.lane.b32.xlu1 %v6049_v31, %s5747_s7 }
  0x69   : > { %767 = vrot.lane.b32.xlu0 %v6061_v33, %s5748_s8 }
  0x6c   : > { %769 = vrot.lane.b32.xlu1 %v6067_v34, %s5748_s8 }
  0x6d   : > { %579 = vrot.lane.b32.xlu0 %v6055_v32, %s5747_s7 }
  0x70   : > { %581 = vrot.lane.b32.xlu1 %v6061_v33, %s5747_s7 }
  0x71   : > { %771 = vrot.lane.b32.xlu0 %v6073_v35, %s5748_s8 }
  0x74   : > { %773 = vrot.lane.b32.xlu1 %v6079_v36, %s5748_s8 }
  0x75   : > { %583 = vrot.lane.b32.xlu0 %v6067_v34, %s5747_s7 }
  0x78   : > { %585 = vrot.lane.b32.xlu1 %v6073_v35, %s5747_s7 }
  0x79   : > { %775 = vrot.lane.b32.xlu0 %v6091_v40, %s5748_s8 }
  0x7c   : > { %777 = vrot.lane.b32.xlu1 %v6099_v41, %s5748_s8 }
  0x7d   : > { %587 = vrot.lane.b32.xlu0 %v6079_v36, %s5747_s7 }
  0x80   : > { %589 = vrot.lane.b32.xlu1 %v6091_v40, %s5747_s7 }
  0x81   : > { %779 = vrot.lane.b32.xlu0 %v6105_v42, %s5748_s8 }
  0x84   : > { %781 = vrot.lane.b32.xlu1 %v6111_v43, %s5748_s8 }
  0x85   : > { %591 = vrot.lane.b32.xlu0 %v6099_v41, %s5747_s7 }
  0x88   : > { %593 = vrot.lane.b32.xlu1 %v6105_v42, %s5747_s7  ;;  %v544_v46 = vpop.permute.xlu0 %543 }
  0x89   : > { %783 = vrot.lane.b32.xlu0 %v6117_v44, %s5748_s8  ;;  %v877_v3 = vsel %vm257_vm0, %v348_v59, %v544_v46 }
  0x8b   : > { %v550_v50 = vpop.permute.xlu1 %549 }
  0x8c   : > { %785 = vrot.lane.b32.xlu1 %v6123_v45, %s5748_s8  ;;  %v736_v51 = vpop.permute.xlu0 %735 }
  0x8d   : > { %595 = vrot.lane.b32.xlu0 %v6111_v43, %s5747_s7  ;;  %v6167_v9 = vsel %vm923_vm5, %v877_v3, %v736_v51 }
  0x90   : > { %597 = vrot.lane.b32.xlu1 %v6117_v44, %s5747_s7 }
  0x91   : > { %787 = vrot.lane.b32.xlu0 %v6129_v47, %s5748_s8 }
  0x94   : > { %789 = vrot.lane.b32.xlu1 %v6135_v52, %s5748_s8 }
  0x95   : > { %599 = vrot.lane.b32.xlu0 %v6123_v45, %s5747_s7 }
  0x96   : > { %v732_v57 = vpop.permute.xlu1 %731 }
  0x97   : > { %v540_v58 = vpop.permute.xlu0 %539 }
  0x98   : > { %v875_v60 = vsel %vm257_vm0, %v346_v55, %v540_v58  ;;  %601 = vrot.lane.b32.xlu1 %v6129_v47, %s5747_s7 }
  0x99   : > { %791 = vrot.lane.b32.xlu0 %v6141_v56, %s5748_s8  ;;  %v6149_v61 = vsel %vm923_vm5, %v875_v60, %v732_v57 }
  0x9a   : > { %5205 = vmatprep.mubr.msk.f32.mxu0 %vm975_vm4, %v6149_v61  ;;  %5281 = vmatprep.mubr.msk.f32.mxu1 %vm975_vm4, %v6149_v61  ;;  %v734_v4 = vpop.permute.xlu1 %733 }
  0x9b   : > { %v542_v5 = vpop.permute.xlu0 %541 }
  0x9c   : > { %v876_v7 = vsel %vm257_vm0, %v347_v63, %v542_v5  ;;  %793 = vrot.lane.b32.xlu1 %v6155_v2, %s5748_s8 }
  0x9d   : > { %603 = vrot.lane.b32.xlu0 %v6135_v52, %s5747_s7  ;;  %v6164_v8 = vsel %vm923_vm5, %v876_v7, %v734_v4 }
  0x9e   : > { %5206 = vmatmul.mubr.msk.f32.vlgmr.msra.gmra.mrb[0].mxu0 %vm975_vm4, %v6164_v8  ;;  %5282 = vmatmul.mubr.msk.f32.vlgmr.msra.gmra.mrb[0].mxu1 %vm975_vm4, %v6164_v8  ;;  %v546_v14 = vpop.permute.xlu1 %545 }
  0x9f   : > { %5208 = vmatprep.mubr.msk.f32.mxu0 %vm975_vm4, %v6167_v9  ;;  %5284 = vmatprep.mubr.msk.f32.mxu1 %vm975_vm4, %v6167_v9  ;;  %v548_v16 = vpop.permute.xlu0 %547  ;;  %v878_v21 = vsel %vm257_vm0, %v5927_v49, %v546_v14  ;;  %v6205_v49 = vld [vmem:[#allocation2 + $0x140] sm:$0xff] }
  0xa0   : > { %5674 = vmatpush3.bf16.msk.msra.mxu0 %vm5869_vm3, %v5669_v39  ;;  %v879_v17 = vsel %vm257_vm0, %v5940_v54, %v548_v16  ;;  %605 = vrot.lane.b32.xlu1 %v6141_v56, %s5747_s7  ;;  %v880_v54 = vsel %vm257_vm0, %v5878_v11, %v550_v50  ;;  %v6226_v11 = vld [vmem:[#allocation2 + $0x148] sm:$0xff] }
  0xa1   : > { %795 = vrot.lane.b32.xlu0 %v6173_v13, %s5748_s8 }
  0xa2   : > { %v738_v23 = vpop.permute.xlu1 %737 }
  0xa3   : > { %v740_v24 = vpop.permute.xlu0 %739  ;;  %v6192_v37 = vsel %vm923_vm5, %v878_v21, %v738_v23 }
  0xa4   : > { %v6195_v38 = vsel %vm923_vm5, %v879_v17, %v740_v24  ;;  %797 = vrot.lane.b32.xlu1 %v6187_v20, %s5748_s8  ;;  %5209 = vmatmul.mubr.msk.f32.gmra.mrb[2].mxu0 %vm975_vm4, %v6192_v37 }
  0xa5   : > { %607 = vrot.lane.b32.xlu0 %v6155_v2, %s5747_s7  ;;  %5285 = vmatmul.mubr.msk.f32.gmra.mrb[2].mxu1 %vm975_vm4, %v6192_v37 }
  0xa6   : > { %5211 = vmatprep.mubr.msk.f32.mxu0 %vm975_vm4, %v6195_v38  ;;  %5287 = vmatprep.mubr.msk.f32.mxu1 %vm975_vm4, %v6195_v38  ;;  %v742_v39 = vpop.permute.xlu1 %741 }
  0xa7   : > { %v552_v46 = vpop.permute.xlu0 %551  ;;  %v6214_v51 = vsel %vm923_vm5, %v880_v54, %v742_v39 }
  0xa8   : > { %v881_v55 = vsel %vm257_vm0, %v5925_v48, %v552_v46  ;;  %609 = vrot.lane.b32.xlu1 %v6173_v13, %s5747_s7  ;;  %5212 = vmatmul.mubr.msk.f32.gmra.mrb[4].mxu0 %vm975_vm4, %v6214_v51  ;;  %v6239_v48 = vld [vmem:[#allocation2 + $0x150] sm:$0xff] }
  0xa9   : > { %799 = vrot.lane.b32.xlu0 %v6205_v49, %s5748_s8  ;;  %5288 = vmatmul.mubr.msk.f32.gmra.mrb[4].mxu1 %vm975_vm4, %v6214_v51 }
  0xaa   : > { %v554_v50 = vpop.permute.xlu1 %553 }
  0xab   : > { %v744_v57 = vpop.permute.xlu0 %743  ;;  %v882_v59 = vsel %vm257_vm0, %v5938_v53, %v554_v50  ;;  %v6256_v53 = vld [vmem:[#allocation2 + $0x158] sm:$0xff] }
  0xac   : > { %v6229_v58 = vsel %vm923_vm5, %v881_v55, %v744_v57  ;;  %801 = vrot.lane.b32.xlu1 %v6226_v11, %s5748_s8 }
  0xad   : > { %611 = vrot.lane.b32.xlu0 %v6187_v20, %s5747_s7  ;;  %5214 = vmatprep.mubr.msk.f32.mxu0 %vm975_vm4, %v6229_v58 }
  0xae   : > { %5290 = vmatprep.mubr.msk.f32.mxu1 %vm975_vm4, %v6229_v58  ;;  %v746_v60 = vpop.permute.xlu1 %745 }
  0xaf   : > { %v556_v63 = vpop.permute.xlu0 %555  ;;  %v6244_v3 = vsel %vm923_vm5, %v882_v59, %v746_v60 }
  0xb0   : > { %v883_v4 = vsel %vm257_vm0, %v5880_v12, %v556_v63  ;;  %613 = vrot.lane.b32.xlu1 %v6205_v49, %s5747_s7  ;;  %5215 = vmatmul.mubr.msk.f32.gmra.mrb[6].mxu0 %vm975_vm4, %v6244_v3  ;;  %v6269_v12 = vld [vmem:[#allocation2 + $0x160] sm:$0xff] }
  0xb1   : > { %803 = vrot.lane.b32.xlu0 %v6239_v48, %s5748_s8  ;;  %5291 = vmatmul.mubr.msk.f32.gmra.mrb[6].mxu1 %vm975_vm4, %v6244_v3 }
  0xb2   : > { %v558_v5 = vpop.permute.xlu1 %557 }
  0xb3   : > { %v748_v7 = vpop.permute.xlu0 %747  ;;  %v884_v16 = vsel %vm257_vm0, %v5958_v62, %v558_v5  ;;  %v6286_v62 = vld [vmem:[#allocation2 + $0x168] sm:$0xff] }
  0xb4   : > { %v6259_v14 = vsel %vm923_vm5, %v883_v4, %v748_v7  ;;  %805 = vrot.lane.b32.xlu1 %v6256_v53, %s5748_s8 }
  0xb5   : > { %615 = vrot.lane.b32.xlu0 %v6226_v11, %s5747_s7  ;;  %5217 = vmatprep.mubr.msk.f32.mxu0 %vm975_vm4, %v6259_v14 }
  0xb6   : > { %5293 = vmatprep.mubr.msk.f32.mxu1 %vm975_vm4, %v6259_v14  ;;  %v750_v17 = vpop.permute.xlu1 %749 }
  0xb7   : > { %v560_v21 = vpop.permute.xlu0 %559  ;;  %v6274_v23 = vsel %vm923_vm5, %v884_v16, %v750_v17 }
  0xb8   : > { %v885_v24 = vsel %vm257_vm0, %v5961_v1, %v560_v21  ;;  %617 = vrot.lane.b32.xlu1 %v6239_v48, %s5747_s7  ;;  %5218 = vmatmul.mubr.msk.f32.gmra.mrb[8].mxu0 %vm975_vm4, %v6274_v23  ;;  %v6299_v1 = vld [vmem:[#allocation2 + $0x170] sm:$0xff] }
  0xb9   : > { %807 = vrot.lane.b32.xlu0 %v6269_v12, %s5748_s8  ;;  %5294 = vmatmul.mubr.msk.f32.gmra.mrb[8].mxu1 %vm975_vm4, %v6274_v23 }
  0xba   : > { %v562_v54 = vpop.permute.xlu1 %561 }
  0xbb   : > { %v752_v39 = vpop.permute.xlu0 %751  ;;  %v886_v55 = vsel %vm257_vm0, %v5974_v10, %v562_v54  ;;  %v6316_v10 = vld [vmem:[#allocation2 + $0x178] sm:$0xff] }
  0xbc   : > { %v6289_v46 = vsel %vm923_vm5, %v885_v24, %v752_v39  ;;  %809 = vrot.lane.b32.xlu1 %v6286_v62, %s5748_s8 }
  0xbd   : > { %619 = vrot.lane.b32.xlu0 %v6256_v53, %s5747_s7  ;;  %5220 = vmatprep.mubr.msk.f32.mxu0 %vm975_vm4, %v6289_v46 }
  0xbe   : > { %5296 = vmatprep.mubr.msk.f32.mxu1 %vm975_vm4, %v6289_v46  ;;  %v754_v50 = vpop.permute.xlu1 %753 }
  0xbf   : > { %v564_v57 = vpop.permute.xlu0 %563  ;;  %v6304_v59 = vsel %vm923_vm5, %v886_v55, %v754_v50 }
  0xc0   : > { %v887_v60 = vsel %vm257_vm0, %v5982_v15, %v564_v57  ;;  %621 = vrot.lane.b32.xlu1 %v6269_v12, %s5747_s7  ;;  %5221 = vmatmul.mubr.msk.f32.gmra.mrb[10].mxu0 %vm975_vm4, %v6304_v59  ;;  %v485_v15 = vld [vmem:[#allocation2 + $0x180] sm:$0xff] }
  0xc1   : > { %811 = vrot.lane.b32.xlu0 %v6299_v1, %s5748_s8  ;;  %5297 = vmatmul.mubr.msk.f32.gmra.mrb[10].mxu1 %vm975_vm4, %v6304_v59 }
  0xc2   : > { %v566_v63 = vpop.permute.xlu1 %565 }
  0xc3   : > { %v756_v4 = vpop.permute.xlu0 %755  ;;  %v888_v7 = vsel %vm257_vm0, %v5990_v18, %v566_v63  ;;  %v486_v18 = vld [vmem:[#allocation2 + $0x188] sm:$0xff] }
  0xc4   : > { %v6319_v5 = vsel %vm923_vm5, %v887_v60, %v756_v4  ;;  %813 = vrot.lane.b32.xlu1 %v6316_v10, %s5748_s8 }
  0xc5   : > { %623 = vrot.lane.b32.xlu0 %v6286_v62, %s5747_s7  ;;  %5223 = vmatprep.mubr.msk.f32.mxu0 %vm975_vm4, %v6319_v5 }
  0xc6   : > { %5299 = vmatprep.mubr.msk.f32.mxu1 %vm975_vm4, %v6319_v5  ;;  %v758_v16 = vpop.permute.xlu1 %757 }
  0xc7   : > { %v568_v17 = vpop.permute.xlu0 %567  ;;  %v6332_v21 = vsel %vm923_vm5, %v888_v7, %v758_v16  ;;  %v488_v7 = vld [vmem:[#allocation2 + $0x198] sm:$0xff] }
  0xc8   : > { %v889_v24 = vsel %vm257_vm0, %v5997_v19, %v568_v17  ;;  %625 = vrot.lane.b32.xlu1 %v6299_v1, %s5747_s7  ;;  %5224 = vmatmul.mubr.msk.f32.gmra.mrb[12].mxu0 %vm975_vm4, %v6332_v21  ;;  %v487_v19 = vld [vmem:[#allocation2 + $0x190] sm:$0xff] }
  0xc9   : > { %815 = vrot.lane.b32.xlu0 %v485_v15, %s5748_s8  ;;  %5300 = vmatmul.mubr.msk.f32.gmra.mrb[12].mxu1 %vm975_vm4, %v6332_v21 }
  0xca   : > { %v570_v54 = vpop.permute.xlu1 %569 }
  0xcb   : > { %v760_v39 = vpop.permute.xlu0 %759  ;;  %v890_v50 = vsel %vm257_vm0, %v6004_v22, %v570_v54 }
  0xcc   : > { %v6344_v55 = vsel %vm923_vm5, %v889_v24, %v760_v39  ;;  %817 = vrot.lane.b32.xlu1 %v486_v18, %s5748_s8 }
  0xcd   : > { %627 = vrot.lane.b32.xlu0 %v6316_v10, %s5747_s7  ;;  %5226 = vmatprep.mubr.msk.f32.mxu0 %vm975_vm4, %v6344_v55 }
  0xce   : > { %5302 = vmatprep.mubr.msk.f32.mxu1 %vm975_vm4, %v6344_v55  ;;  %v762_v57 = vpop.permute.xlu1 %761 }
  0xcf   : > { %v572_v60 = vpop.permute.xlu0 %571  ;;  %v6356_v63 = vsel %vm923_vm5, %v890_v50, %v762_v57 }
  0xd0   : > { %v891_v4 = vsel %vm257_vm0, %v6012_v25, %v572_v60  ;;  %629 = vrot.lane.b32.xlu1 %v485_v15, %s5747_s7  ;;  %5227 = vmatmul.mubr.msk.f32.gmra.mrb[14].mxu0 %vm975_vm4, %v6356_v63  ;;  %v489_v25 = vld [vmem:[#allocation2 + $0x1a0] sm:$0xff] }
  0xd1   : > { %819 = vrot.lane.b32.xlu0 %v487_v19, %s5748_s8  ;;  %5303 = vmatmul.mubr.msk.f32.gmra.mrb[14].mxu1 %vm975_vm4, %v6356_v63 }
  0xd2   : > { %v574_v22 = vpop.permute.xlu1 %573 }
  0xd3   : > { %v764_v16 = vpop.permute.xlu0 %763  ;;  %v892_v15 = vsel %vm257_vm0, %v6019_v26, %v574_v22 }
  0xd4   : > { %v6367_v17 = vsel %vm923_vm5, %v891_v4, %v764_v16  ;;  %821 = vrot.lane.b32.xlu1 %v488_v7, %s5748_s8 }
  0xd5   : > { %631 = vrot.lane.b32.xlu0 %v486_v18, %s5747_s7  ;;  %5229 = vmatprep.mubr.msk.f32.mxu0 %vm975_vm4, %v6367_v17  ;;  %v490_v18 = vld [vmem:[#allocation2 + $0x1a8] sm:$0xff] }
  0xd6   : > { %5305 = vmatprep.mubr.msk.f32.mxu1 %vm975_vm4, %v6367_v17  ;;  %v766_v24 = vpop.permute.xlu1 %765 }
  0xd7   : > { %v576_v54 = vpop.permute.xlu0 %575  ;;  %v6378_v39 = vsel %vm923_vm5, %v892_v15, %v766_v24 }
  0xd8   : > { %v893_v50 = vsel %vm257_vm0, %v6025_v27, %v576_v54  ;;  %633 = vrot.lane.b32.xlu1 %v487_v19, %s5747_s7  ;;  %5230 = vmatmul.mubr.msk.f32.gmra.mrb[16].mxu0 %vm975_vm4, %v6378_v39 }
  0xd9   : > { %823 = vrot.lane.b32.xlu0 %v489_v25, %s5748_s8  ;;  %5306 = vmatmul.mubr.msk.f32.gmra.mrb[16].mxu1 %vm975_vm4, %v6378_v39 }
  0xda   : > { %v578_v26 = vpop.permute.xlu1 %577 }
  0xdb   : > { %v768_v57 = vpop.permute.xlu0 %767  ;;  %v894_v27 = vsel %vm257_vm0, %v6031_v28, %v578_v26 }
  0xdc   : > { %v6389_v60 = vsel %vm923_vm5, %v893_v50, %v768_v57  ;;  %825 = vrot.lane.b32.xlu1 %v490_v18, %s5748_s8 }
  0xdd   : > { %5232 = vmatprep.mubr.msk.f32.mxu0 %vm975_vm4, %v6389_v60  ;;  %5308 = vmatprep.mubr.msk.f32.mxu1 %vm975_vm4, %v6389_v60 }
  0xde   : > { %v770_v19 = vpop.permute.xlu1 %769 }
  0xdf   : > { %v580_v4 = vpop.permute.xlu0 %579  ;;  %v6399_v7 = vsel %vm923_vm5, %v894_v27, %v770_v19 }
  0xe0   : > { %v895_v22 = vsel %vm257_vm0, %v6037_v29, %v580_v4  ;;  %5233 = vmatmul.mubr.msk.f32.gmra.mrb[18].mxu0 %vm975_vm4, %v6399_v7  ;;  %5309 = vmatmul.mubr.msk.f32.gmra.mrb[18].mxu1 %vm975_vm4, %v6399_v7 }
  0xe2   : > { %v582_v16 = vpop.permute.xlu1 %581 }
  0xe3   : > { %v772_v25 = vpop.permute.xlu0 %771  ;;  %v896_v28 = vsel %vm257_vm0, %v6043_v30, %v582_v16 }
  0xe4   : > { %v6408_v15 = vsel %vm923_vm5, %v895_v22, %v772_v25 }
  0xe5   : > { %5235 = vmatprep.mubr.msk.f32.mxu0 %vm975_vm4, %v6408_v15  ;;  %5311 = vmatprep.mubr.msk.f32.mxu1 %vm975_vm4, %v6408_v15 }
  0xe6   : > { %v774_v29 = vpop.permute.xlu1 %773 }
  0xe7   : > { %v584_v24 = vpop.permute.xlu0 %583  ;;  %v6417_v54 = vsel %vm923_vm5, %v896_v28, %v774_v29 }
  0xe8   : > { %v897_v50 = vsel %vm257_vm0, %v6049_v31, %v584_v24  ;;  %5236 = vmatmul.mubr.msk.f32.gmra.mrb[20].mxu0 %vm975_vm4, %v6417_v54  ;;  %5312 = vmatmul.mubr.msk.f32.gmra.mrb[20].mxu1 %vm975_vm4, %v6417_v54 }
  0xea   : > { %v586_v18 = vpop.permute.xlu1 %585 }
  0xeb   : > { %v776_v26 = vpop.permute.xlu0 %775  ;;  %v898_v30 = vsel %vm257_vm0, %v6055_v32, %v586_v18 }
  0xec   : > { %v6426_v57 = vsel %vm923_vm5, %v897_v50, %v776_v26 }
  0xed   : > { %5238 = vmatprep.mubr.msk.f32.mxu0 %vm975_vm4, %v6426_v57  ;;  %5314 = vmatprep.mubr.msk.f32.mxu1 %vm975_vm4, %v6426_v57 }
  0xee   : > { %v778_v31 = vpop.permute.xlu1 %777 }
  0xef   : > { %v588_v27 = vpop.permute.xlu0 %587  ;;  %v6435_v19 = vsel %vm923_vm5, %v898_v30, %v778_v31 }
  0xf0   : > { %v899_v4 = vsel %vm257_vm0, %v6061_v33, %v588_v27  ;;  %5239 = vmatmul.mubr.msk.f32.gmra.mrb[22].mxu0 %vm975_vm4, %v6435_v19  ;;  %5315 = vmatmul.mubr.msk.f32.gmra.mrb[22].mxu1 %vm975_vm4, %v6435_v19 }
  0xf2   : > { %v590_v22 = vpop.permute.xlu1 %589 }
  0xf3   : > { %v780_v16 = vpop.permute.xlu0 %779  ;;  %v900_v32 = vsel %vm257_vm0, %v6067_v34, %v590_v22 }
  0xf4   : > { %v6444_v25 = vsel %vm923_vm5, %v899_v4, %v780_v16 }
  0xf5   : > { %5241 = vmatprep.mubr.msk.f32.mxu0 %vm975_vm4, %v6444_v25  ;;  %5317 = vmatprep.mubr.msk.f32.mxu1 %vm975_vm4, %v6444_v25 }
  0xf6   : > { %v782_v33 = vpop.permute.xlu1 %781 }
  0xf7   : > { %v592_v28 = vpop.permute.xlu0 %591  ;;  %v6453_v29 = vsel %vm923_vm5, %v900_v32, %v782_v33 }
  0xf8   : > { %v901_v24 = vsel %vm257_vm0, %v6073_v35, %v592_v28  ;;  %5242 = vmatmul.mubr.msk.f32.gmra.mrb[24].mxu0 %vm975_vm4, %v6453_v29  ;;  %5318 = vmatmul.mubr.msk.f32.gmra.mrb[24].mxu1 %vm975_vm4, %v6453_v29 }
  0xfa   : > { %v594_v50 = vpop.permute.xlu1 %593 }
  0xfb   : > { %v784_v18 = vpop.permute.xlu0 %783  ;;  %v902_v34 = vsel %vm257_vm0, %v6079_v36, %v594_v50 }
  0xfc   : > { %v6462_v26 = vsel %vm923_vm5, %v901_v24, %v784_v18 }
  0xfd   : > { %5244 = vmatprep.mubr.msk.f32.mxu0 %vm975_vm4, %v6462_v26  ;;  %5320 = vmatprep.mubr.msk.f32.mxu1 %vm975_vm4, %v6462_v26 }
  0xfe   : > { %v786_v35 = vpop.permute.xlu1 %785 }
  0xff   : > { %v596_v30 = vpop.permute.xlu0 %595  ;;  %v6471_v31 = vsel %vm923_vm5, %v902_v34, %v786_v35 }
 0x100   : > { %v903_v27 = vsel %vm257_vm0, %v6091_v40, %v596_v30  ;;  %5245 = vmatmul.mubr.msk.f32.gmra.mrb[26].mxu0 %vm975_vm4, %v6471_v31  ;;  %5321 = vmatmul.mubr.msk.f32.gmra.mrb[26].mxu1 %vm975_vm4, %v6471_v31 }
 0x102   : > { %v598_v4 = vpop.permute.xlu1 %597 }
 0x103   : > { %v788_v22 = vpop.permute.xlu0 %787  ;;  %v904_v36 = vsel %vm257_vm0, %v6099_v41, %v598_v4 }
 0x104   : > { %v6480_v16 = vsel %vm923_vm5, %v903_v27, %v788_v22 }
 0x105   : > { %5247 = vmatprep.mubr.msk.f32.mxu0 %vm975_vm4, %v6480_v16  ;;  %5323 = vmatprep.mubr.msk.f32.mxu1 %vm975_vm4, %v6480_v16 }
 0x106   : > { %v790_v40 = vpop.permute.xlu1 %789 }
 0x107   : > { %v600_v32 = vpop.permute.xlu0 %599  ;;  %v6489_v33 = vsel %vm923_vm5, %v904_v36, %v790_v40 }
 0x108   : > { %v905_v28 = vsel %vm257_vm0, %v6105_v42, %v600_v32  ;;  %5248 = vmatmul.mubr.msk.f32.gmra.mrb[28].mxu0 %vm975_vm4, %v6489_v33  ;;  %5324 = vmatmul.mubr.msk.f32.gmra.mrb[28].mxu1 %vm975_vm4, %v6489_v33 }
 0x10a   : > { %v602_v24 = vpop.permute.xlu1 %601 }
 0x10b   : > { %v792_v50 = vpop.permute.xlu0 %791  ;;  %v906_v41 = vsel %vm257_vm0, %v6111_v43, %v602_v24 }
 0x10c   : > { %v6498_v18 = vsel %vm923_vm5, %v905_v28, %v792_v50 }
 0x10d   : > { %5250 = vmatprep.mubr.msk.f32.mxu0 %vm975_vm4, %v6498_v18  ;;  %5326 = vmatprep.mubr.msk.f32.mxu1 %vm975_vm4, %v6498_v18 }
 0x10e   : > { %v794_v42 = vpop.permute.xlu1 %793 }
 0x10f   : > { %v604_v34 = vpop.permute.xlu0 %603  ;;  %v6507_v35 = vsel %vm923_vm5, %v906_v41, %v794_v42 }
 0x110   : > { %v907_v30 = vsel %vm257_vm0, %v6117_v44, %v604_v34  ;;  %5251 = vmatmul.mubr.msk.f32.gmra.mrb[30].mxu0 %vm975_vm4, %v6507_v35  ;;  %5327 = vmatmul.mubr.msk.f32.gmra.mrb[30].mxu1 %vm975_vm4, %v6507_v35 }
 0x112   : > { %v606_v27 = vpop.permute.xlu1 %605 }
 0x113   : > { %v796_v4 = vpop.permute.xlu0 %795  ;;  %v908_v43 = vsel %vm257_vm0, %v6123_v45, %v606_v27 }
 0x114   : > { %v6516_v22 = vsel %vm923_vm5, %v907_v30, %v796_v4 }
 0x115   : > { %5253 = vmatprep.mubr.msk.f32.mxu0 %vm975_vm4, %v6516_v22  ;;  %5329 = vmatprep.mubr.msk.f32.mxu1 %vm975_vm4, %v6516_v22 }
 0x116   : > { %v798_v44 = vpop.permute.xlu1 %797 }
 0x117   : > { %v608_v36 = vpop.permute.xlu0 %607  ;;  %v6525_v40 = vsel %vm923_vm5, %v908_v43, %v798_v44 }
 0x118   : > { %v909_v32 = vsel %vm257_vm0, %v6129_v47, %v608_v36  ;;  %5254 = vmatmul.mubr.msk.f32.gmra.mrb[32].mxu0 %vm975_vm4, %v6525_v40  ;;  %5330 = vmatmul.mubr.msk.f32.gmra.mrb[32].mxu1 %vm975_vm4, %v6525_v40 }
 0x11a   : > { %v610_v28 = vpop.permute.xlu1 %609 }
 0x11b   : > { %v800_v24 = vpop.permute.xlu0 %799  ;;  %v910_v45 = vsel %vm257_vm0, %v6135_v52, %v610_v28 }
 0x11c   : > { %v6534_v50 = vsel %vm923_vm5, %v909_v32, %v800_v24 }
 0x11d   : > { %5256 = vmatprep.mubr.msk.f32.mxu0 %vm975_vm4, %v6534_v50  ;;  %5332 = vmatprep.mubr.msk.f32.mxu1 %vm975_vm4, %v6534_v50 }
 0x11e   : > { %v802_v47 = vpop.permute.xlu1 %801 }
 0x11f   : > { %v612_v41 = vpop.permute.xlu0 %611  ;;  %v6543_v42 = vsel %vm923_vm5, %v910_v45, %v802_v47 }
 0x120   : > { %v911_v34 = vsel %vm257_vm0, %v6141_v56, %v612_v41  ;;  %5257 = vmatmul.mubr.msk.f32.gmra.mrb[34].mxu0 %vm975_vm4, %v6543_v42  ;;  %5333 = vmatmul.mubr.msk.f32.gmra.mrb[34].mxu1 %vm975_vm4, %v6543_v42 }
 0x122   : > { %v614_v30 = vpop.permute.xlu1 %613 }
 0x123   : > { %v804_v27 = vpop.permute.xlu0 %803  ;;  %v912_v52 = vsel %vm257_vm0, %v6155_v2, %v614_v30 }
 0x124   : > { %v6552_v4 = vsel %vm923_vm5, %v911_v34, %v804_v27 }
 0x125   : > { %5259 = vmatprep.mubr.msk.f32.mxu0 %vm975_vm4, %v6552_v4  ;;  %5335 = vmatprep.mubr.msk.f32.mxu1 %vm975_vm4, %v6552_v4 }
 0x126   : > { %v806_v56 = vpop.permute.xlu1 %805 }
 0x127   : > { %v616_v43 = vpop.permute.xlu0 %615  ;;  %v6561_v44 = vsel %vm923_vm5, %v912_v52, %v806_v56 }
 0x128   : > { %v913_v36 = vsel %vm257_vm0, %v6173_v13, %v616_v43  ;;  %5260 = vmatmul.mubr.msk.f32.gmra.mrb[36].mxu0 %vm975_vm4, %v6561_v44  ;;  %5336 = vmatmul.mubr.msk.f32.gmra.mrb[36].mxu1 %vm975_vm4, %v6561_v44 }
 0x12a   : > { %v618_v32 = vpop.permute.xlu1 %617 }
 0x12b   : > { %v808_v28 = vpop.permute.xlu0 %807  ;;  %v914_v2 = vsel %vm257_vm0, %v6187_v20, %v618_v32 }
 0x12c   : > { %v6570_v24 = vsel %vm923_vm5, %v913_v36, %v808_v28 }
 0x12d   : > { %5262 = vmatprep.mubr.msk.f32.mxu0 %vm975_vm4, %v6570_v24  ;;  %5338 = vmatprep.mubr.msk.f32.mxu1 %vm975_vm4, %v6570_v24 }
 0x12e   : > { %v810_v13 = vpop.permute.xlu1 %809 }
 0x12f   : > { %v620_v45 = vpop.permute.xlu0 %619  ;;  %v6579_v47 = vsel %vm923_vm5, %v914_v2, %v810_v13 }
 0x130   : > { %v915_v41 = vsel %vm257_vm0, %v6205_v49, %v620_v45  ;;  %5263 = vmatmul.mubr.msk.f32.gmra.mrb[38].mxu0 %vm975_vm4, %v6579_v47  ;;  %5339 = vmatmul.mubr.msk.f32.gmra.mrb[38].mxu1 %vm975_vm4, %v6579_v47 }
 0x132   : > { %v622_v34 = vpop.permute.xlu1 %621 }
 0x133   : > { %v812_v30 = vpop.permute.xlu0 %811  ;;  %v916_v20 = vsel %vm257_vm0, %v6226_v11, %v622_v34 }
 0x134   : > { %v6588_v27 = vsel %vm923_vm5, %v915_v41, %v812_v30 }
 0x135   : > { %5265 = vmatprep.mubr.msk.f32.mxu0 %vm975_vm4, %v6588_v27  ;;  %5341 = vmatprep.mubr.msk.f32.mxu1 %vm975_vm4, %v6588_v27 }
 0x136   : > { %v814_v49 = vpop.permute.xlu1 %813 }
 0x137   : > { %v624_v52 = vpop.permute.xlu0 %623  ;;  %v6597_v56 = vsel %vm923_vm5, %v916_v20, %v814_v49 }
 0x138   : > { %v917_v43 = vsel %vm257_vm0, %v6239_v48, %v624_v52  ;;  %5266 = vmatmul.mubr.msk.f32.gmra.mrb[40].mxu0 %vm975_vm4, %v6597_v56  ;;  %5342 = vmatmul.mubr.msk.f32.gmra.mrb[40].mxu1 %vm975_vm4, %v6597_v56 }
 0x13a   : > { %v626_v36 = vpop.permute.xlu1 %625 }
 0x13b   : > { %v816_v32 = vpop.permute.xlu0 %815  ;;  %v918_v11 = vsel %vm257_vm0, %v6256_v53, %v626_v36 }
 0x13c   : > { %v6606_v28 = vsel %vm923_vm5, %v917_v43, %v816_v32 }
 0x13d   : > { %5268 = vmatprep.mubr.msk.f32.mxu0 %vm975_vm4, %v6606_v28  ;;  %5344 = vmatprep.mubr.msk.f32.mxu1 %vm975_vm4, %v6606_v28 }
 0x13e   : > { %v818_v48 = vpop.permute.xlu1 %817 }
 0x13f   : > { %v628_v2 = vpop.permute.xlu0 %627  ;;  %v6615_v13 = vsel %vm923_vm5, %v918_v11, %v818_v48 }
 0x140   : > { %v919_v45 = vsel %vm257_vm0, %v6269_v12, %v628_v2  ;;  %5269 = vmatmul.mubr.msk.f32.gmra.mrb[42].mxu0 %vm975_vm4, %v6615_v13  ;;  %5345 = vmatmul.mubr.msk.f32.gmra.mrb[42].mxu1 %vm975_vm4, %v6615_v13 }
 0x142   : > { %v630_v41 = vpop.permute.xlu1 %629 }
 0x143   : > { %v820_v34 = vpop.permute.xlu0 %819  ;;  %v920_v53 = vsel %vm257_vm0, %v6286_v62, %v630_v41 }
 0x144   : > { %v6624_v30 = vsel %vm923_vm5, %v919_v45, %v820_v34 }
 0x145   : > { %5271 = vmatprep.mubr.msk.f32.mxu0 %vm975_vm4, %v6624_v30  ;;  %5347 = vmatprep.mubr.msk.f32.mxu1 %vm975_vm4, %v6624_v30 }
 0x146   : > { %v822_v12 = vpop.permute.xlu1 %821 }
 0x147   : > { %v632_v20 = vpop.permute.xlu0 %631  ;;  %v6633_v49 = vsel %vm923_vm5, %v920_v53, %v822_v12 }
 0x148   : > { %v921_v52 = vsel %vm257_vm0, %v6299_v1, %v632_v20  ;;  %5272 = vmatmul.mubr.msk.f32.gmra.mrb[44].mxu0 %vm975_vm4, %v6633_v49  ;;  %5348 = vmatmul.mubr.msk.f32.gmra.mrb[44].mxu1 %vm975_vm4, %v6633_v49 }
 0x14a   : > { %v634_v43 = vpop.permute.xlu1 %633 }
 0x14b   : > { %v824_v36 = vpop.permute.xlu0 %823  ;;  %v922_v62 = vsel %vm257_vm0, %v6316_v10, %v634_v43 }
 0x14c   : > { %v6642_v32 = vsel %vm923_vm5, %v921_v52, %v824_v36 }
 0x14d   : > { %5274 = vmatprep.mubr.msk.f32.mxu0 %vm975_vm4, %v6642_v32  ;;  %5350 = vmatprep.mubr.msk.f32.mxu1 %vm975_vm4, %v6642_v32 }
 0x14e   : > { %v826_v1 = vpop.permute.xlu1 %825 }
 0x14f   : > { %v6651_v11 = vsel %vm923_vm5, %v922_v62, %v826_v1 }
 0x150   : > { %5275 = vmatmul.mubr.msk.f32.gmra.mrb[46].mxu0 %vm975_vm4, %v6651_v11  ;;  %5351 = vmatmul.mubr.msk.f32.gmra.mrb[46].mxu1 %vm975_vm4, %v6651_v11 }
 0x151   : > { %5357 = vmatprep.mubr.msk.f32.mxu0 %vm975_vm4, %v6149_v61  ;;  %v2099_v61 = vlaneseq }
 0x154   : > { %5358 = vmatmul.mubr.msk.f32.vlgmr.msra.gmra.mrb[48].mxu0 %vm975_vm4, %v6164_v8  ;;  %v6687_v8 = vshrl.u32 %v2099_v61, 7 }
 0x155   : > { %5360 = vmatprep.mubr.msk.f32.mxu0 %vm975_vm4, %v6167_v9 }
 0x156   : > { %vm2101_vm6 = vcmp.lt.s32.totalorder %v6687_v8, 1  ;;  %vm2246_vm7 = vcmp.lt.s32.totalorder %v6687_v8, 7 }
 0x158   : > { %5361 = vmatmul.mubr.msk.f32.gmra.mrb[50].mxu0 %vm975_vm4, %v6192_v37 }
 0x159   : > { %5363 = vmatprep.mubr.msk.f32.mxu0 %vm975_vm4, %v6195_v38 }
 0x15c   : > { %5364 = vmatmul.mubr.msk.f32.gmra.mrb[52].mxu0 %vm975_vm4, %v6214_v51 }
 0x15d   : > { %5366 = vmatprep.mubr.msk.f32.mxu0 %vm975_vm4, %v6229_v58 }
 0x160   : > { %5367 = vmatmul.mubr.msk.f32.gmra.mrb[54].mxu0 %vm975_vm4, %v6244_v3 }
 0x161   : > { %5369 = vmatprep.mubr.msk.f32.mxu0 %vm975_vm4, %v6259_v14 }
 0x164   : > { %5370 = vmatmul.mubr.msk.f32.gmra.mrb[56].mxu0 %vm975_vm4, %v6274_v23 }
 0x165   : > { %5372 = vmatprep.mubr.msk.f32.mxu0 %vm975_vm4, %v6289_v46 }
 0x168   : > { %5373 = vmatmul.mubr.msk.f32.gmra.mrb[58].mxu0 %vm975_vm4, %v6304_v59 }
 0x169   : > { %5375 = vmatprep.mubr.msk.f32.mxu0 %vm975_vm4, %v6319_v5 }
 0x16c   : > { %5376 = vmatmul.mubr.msk.f32.gmra.mrb[60].mxu0 %vm975_vm4, %v6332_v21 }
 0x16d   : > { %5378 = vmatprep.mubr.msk.f32.mxu0 %vm975_vm4, %v6344_v55 }
 0x170   : > { %5379 = vmatmul.mubr.msk.f32.gmra.mrb[62].mxu0 %vm975_vm4, %v6356_v63 }
 0x171   : > { %v5207_v9 = vpop.f32.mrb[0].mxu0  ;;  %v5283_v37 = vpop.f32.mrb[0].mxu1  ;;  %5381 = vmatprep.mubr.msk.f32.mxu0 %vm975_vm4, %v6367_v17 }
 0x172   : > { %v2052_v38 = vrot.slane %v5207_v9, 7  ;;  %v6691_v51 = vpop.f32.mrb[1].mxu0  ;;  %v6694_v58 = vpop.f32.mrb[1].mxu1 }
 0x173   : > { %v8453_v3 = vrot.slane %v6691_v51, 7 }
 0x174   : > { %5382 = vmatmul.mubr.msk.f32.gmra.mrb[64].mxu0 %vm975_vm4, %v6378_v39 }
 0x175   : > { %v2148_v14 = vsel %vm2101_vm6, %v8453_v3, %v2052_v38  ;;  %5384 = vmatprep.mubr.msk.f32.mxu0 %vm975_vm4, %v6389_v60 }
 0x176   : > { %v6705_v23 = vadd.f32 %v5283_v37, %v2148_v14 }
 0x177   : > { %v5210_v46 = vpop.f32.mrb[2].mxu0 }
 0x178   : > { %v5286_v59 = vpop.f32.mrb[2].mxu1  ;;  %5385 = vmatmul.mubr.msk.f32.gmra.mrb[66].mxu0 %vm975_vm4, %v6399_v7  ;;  %v2054_v10 = vrot.slane %v5210_v46, 7  ;;  %v1200_v5 = vpop.f32.mrb[3].mxu0 }
 0x179   : > { %v1511_v21 = vpop.f32.mrb[3].mxu1  ;;  %5387 = vmatprep.mubr.msk.f32.mxu0 %vm975_vm4, %v6408_v15  ;;  %v2053_v55 = vrot.slane %v1200_v5, 7 }
 0x17b   : > { %v2146_v63 = vsel %vm2101_vm6, %v2053_v55, %v2054_v10  ;;  %v2147_v17 = vsel %vm2101_vm6, %v2052_v38, %v2053_v55  ;;  %v5213_v39 = vpop.f32.mrb[4].mxu0 }
 0x17c   : > { %v5289_v60 = vpop.f32.mrb[4].mxu1  ;;  %5388 = vmatmul.mubr.msk.f32.gmra.mrb[68].mxu0 %vm975_vm4, %v6417_v54  ;;  %v6719_v48 = vadd.f32 %v5286_v59, %v2146_v63  ;;  %v6721_v7 = vadd.f32 %v2147_v17, %v1511_v21  ;;  %v2056_v2 = vrot.slane %v5213_v39, 7  ;;  %v1210_v45 = vpop.f32.mrb[5].mxu0 }
 0x17d   : > { %v1521_v41 = vpop.f32.mrb[5].mxu1  ;;  %5390 = vmatprep.mubr.msk.f32.mxu0 %vm975_vm4, %v6426_v57  ;;  %v2055_v15 = vrot.slane %v1210_v45, 7 }
 0x17f   : > { %v2144_v34 = vsel %vm2101_vm6, %v2055_v15, %v2056_v2  ;;  %v2145_v53 = vsel %vm2101_vm6, %v2054_v10, %v2055_v15 }
 0x180   : > { %5391 = vmatmul.mubr.msk.f32.gmra.mrb[70].mxu0 %vm975_vm4, %v6435_v19  ;;  %v6731_v54 = vadd.f32 %v5289_v60, %v2144_v34  ;;  %v6733_v12 = vadd.f32 %v2145_v53, %v1521_v41 }
 0x181   : > { %5393 = vmatprep.mubr.msk.f32.mxu0 %vm975_vm4, %v6444_v25 }
 0x183   : > { %v5216_v20 = vpop.f32.mrb[6].mxu0 }
 0x184   : > { %v5292_v52 = vpop.f32.mrb[6].mxu1  ;;  %5394 = vmatmul.mubr.msk.f32.gmra.mrb[72].mxu0 %vm975_vm4, %v6453_v29  ;;  %v2058_v57 = vrot.slane %v5216_v20, 7  ;;  %v1220_v43 = vpop.f32.mrb[7].mxu0 }
 0x185   : > { %v1531_v36 = vpop.f32.mrb[7].mxu1  ;;  %5396 = vmatprep.mubr.msk.f32.mxu0 %vm975_vm4, %v6462_v26  ;;  %v2057_v62 = vrot.slane %v1220_v43, 7 }
 0x187   : > { %v2142_v19 = vsel %vm2101_vm6, %v2057_v62, %v2058_v57  ;;  %v2143_v1 = vsel %vm2101_vm6, %v2056_v2, %v2057_v62 }
 0x188   : > { %5397 = vmatmul.mubr.msk.f32.gmra.mrb[74].mxu0 %vm975_vm4, %v6471_v31  ;;  %v6747_v25 = vadd.f32 %v5292_v52, %v2142_v19  ;;  %v6749_v61 = vadd.f32 %v2143_v1, %v1531_v36 }
 0x189   : > { %5399 = vmatprep.mubr.msk.f32.mxu0 %vm975_vm4, %v6480_v16 }
 0x18b   : > { %v5219_v29 = vpop.f32.mrb[8].mxu0 }
 0x18c   : > { %v5295_v9 = vpop.f32.mrb[8].mxu1  ;;  %5400 = vmatmul.mubr.msk.f32.gmra.mrb[76].mxu0 %vm975_vm4, %v6489_v33  ;;  %v2060_v26 = vrot.slane %v5219_v29, 7  ;;  %v1230_v37 = vpop.f32.mrb[9].mxu0 }
 0x18d   : > { %v1541_v38 = vpop.f32.mrb[9].mxu1  ;;  %5402 = vmatprep.mubr.msk.f32.mxu0 %vm975_vm4, %v6498_v18  ;;  %v2059_v14 = vrot.slane %v1230_v37, 7 }
 0x18f   : > { %v2140_v31 = vsel %vm2101_vm6, %v2059_v14, %v2060_v26  ;;  %v2141_v46 = vsel %vm2101_vm6, %v2058_v57, %v2059_v14 }
 0x190   : > { %5403 = vmatmul.mubr.msk.f32.gmra.mrb[78].mxu0 %vm975_vm4, %v6507_v35  ;;  %v6763_v16 = vadd.f32 %v5295_v9, %v2140_v31  ;;  %v6765_v59 = vadd.f32 %v2141_v46, %v1541_v38 }
 0x191   : > { %5405 = vmatprep.mubr.msk.f32.mxu0 %vm975_vm4, %v6516_v22 }
 0x193   : > { %v5222_v33 = vpop.f32.mrb[10].mxu0 }
 0x194   : > { %v5298_v10 = vpop.f32.mrb[10].mxu1  ;;  %5406 = vmatmul.mubr.msk.f32.gmra.mrb[80].mxu0 %vm975_vm4, %v6525_v40  ;;  %v2062_v18 = vrot.slane %v5222_v33, 7  ;;  %v1240_v5 = vpop.f32.mrb[11].mxu0 }
 0x195   : > { %v1551_v21 = vpop.f32.mrb[11].mxu1  ;;  %5408 = vmatprep.mubr.msk.f32.mxu0 %vm975_vm4, %v6534_v50  ;;  %v2061_v55 = vrot.slane %v1240_v5, 7 }
 0x197   : > { %v2138_v35 = vsel %vm2101_vm6, %v2061_v55, %v2062_v18  ;;  %v2139_v63 = vsel %vm2101_vm6, %v2060_v26, %v2061_v55 }
 0x198   : > { %5409 = vmatmul.mubr.msk.f32.gmra.mrb[82].mxu0 %vm975_vm4, %v6543_v42  ;;  %v6779_v22 = vadd.f32 %v5298_v10, %v2138_v35  ;;  %v6781_v17 = vadd.f32 %v2139_v63, %v1551_v21 }
 0x199   : > { %5411 = vmatprep.mubr.msk.f32.mxu0 %vm975_vm4, %v6552_v4 }
 0x19b   : > { %v5225_v40 = vpop.f32.mrb[12].mxu0 }
 0x19c   : > { %v5301_v39 = vpop.f32.mrb[12].mxu1  ;;  %5412 = vmatmul.mubr.msk.f32.gmra.mrb[84].mxu0 %vm975_vm4, %v6561_v44  ;;  %v2064_v50 = vrot.slane %v5225_v40, 7  ;;  %v1250_v60 = vpop.f32.mrb[13].mxu0 }
 0x19d   : > { %v1561_v2 = vpop.f32.mrb[13].mxu1  ;;  %5414 = vmatprep.mubr.msk.f32.mxu0 %vm975_vm4, %v6570_v24  ;;  %v2063_v45 = vrot.slane %v1250_v60, 7 }
 0x19f   : > { %v2136_v42 = vsel %vm2101_vm6, %v2063_v45, %v2064_v50  ;;  %v2137_v41 = vsel %vm2101_vm6, %v2062_v18, %v2063_v45 }
 0x1a0   : > { %5415 = vmatmul.mubr.msk.f32.gmra.mrb[86].mxu0 %vm975_vm4, %v6579_v47  ;;  %v6795_v4 = vadd.f32 %v5301_v39, %v2136_v42  ;;  %v6797_v15 = vadd.f32 %v2137_v41, %v1561_v2 }
 0x1a1   : > { %5417 = vmatprep.mubr.msk.f32.mxu0 %vm975_vm4, %v6588_v27 }
 0x1a3   : > { %v5228_v44 = vpop.f32.mrb[14].mxu0 }
 0x1a4   : > { %v5304_v34 = vpop.f32.mrb[14].mxu1  ;;  %5418 = vmatmul.mubr.msk.f32.gmra.mrb[88].mxu0 %vm975_vm4, %v6597_v56  ;;  %v2066_v24 = vrot.slane %v5228_v44, 7  ;;  %v1260_v53 = vpop.f32.mrb[15].mxu0 }
 0x1a5   : > { %v1571_v20 = vpop.f32.mrb[15].mxu1  ;;  %5420 = vmatprep.mubr.msk.f32.mxu0 %vm975_vm4, %v6606_v28  ;;  %v2065_v52 = vrot.slane %v1260_v53, 7 }
 0x1a7   : > { %v2134_v47 = vsel %vm2101_vm6, %v2065_v52, %v2066_v24  ;;  %v2135_v57 = vsel %vm2101_vm6, %v2064_v50, %v2065_v52 }
 0x1a8   : > { %5421 = vmatmul.mubr.msk.f32.gmra.mrb[90].mxu0 %vm975_vm4, %v6615_v13  ;;  %v6811_v27 = vadd.f32 %v5304_v34, %v2134_v47  ;;  %v6813_v43 = vadd.f32 %v2135_v57, %v1571_v20 }
 0x1a9   : > { %5423 = vmatprep.mubr.msk.f32.mxu0 %vm975_vm4, %v6624_v30 }
 0x1ab   : > { %v5231_v56 = vpop.f32.mrb[16].mxu0 }
 0x1ac   : > { %v5307_v36 = vpop.f32.mrb[16].mxu1  ;;  %5424 = vmatmul.mubr.msk.f32.gmra.mrb[92].mxu0 %vm975_vm4, %v6633_v49  ;;  %v2068_v28 = vrot.slane %v5231_v56, 7  ;;  %v1270_v62 = vpop.f32.mrb[17].mxu0 }
 0x1ad   : > { %v1581_v19 = vpop.f32.mrb[17].mxu1  ;;  %5426 = vmatprep.mubr.msk.f32.mxu0 %vm975_vm4, %v6642_v32  ;;  %v2067_v1 = vrot.slane %v1270_v62, 7 }
 0x1af   : > { %v2132_v13 = vsel %vm2101_vm6, %v2067_v1, %v2068_v28  ;;  %v2133_v29 = vsel %vm2101_vm6, %v2066_v24, %v2067_v1 }
 0x1b0   : > { %5427 = vmatmul.mubr.msk.f32.gmra.mrb[94].mxu0 %vm975_vm4, %v6651_v11  ;;  %v6827_v30 = vadd.f32 %v5307_v36, %v2132_v13  ;;  %v6829_v9 = vadd.f32 %v2133_v29, %v1581_v19  ;;  %v2659_v11 = vld [vmem:[#allocation3 + $0x198] sm:$0xff] }
 0x1b1   : > { %2992 = vrot.lane.b32.xlu1 %v2659_v11, %s5748_s8 }
 0x1b3   : > { %v5234_v49 = vpop.f32.mrb[18].mxu0  ;;  %v5310_v26 = vpop.f32.mrb[18].mxu1 }
 0x1b4   : > { %v2070_v37 = vrot.slane %v5234_v49, 7  ;;  %v1280_v38 = vpop.f32.mrb[19].mxu0  ;;  %v1591_v14 = vpop.f32.mrb[19].mxu1 }
 0x1b5   : > { %v2069_v32 = vrot.slane %v1280_v38, 7 }
 0x1b7   : > { %v2130_v31 = vsel %vm2101_vm6, %v2069_v32, %v2070_v37  ;;  %v2131_v46 = vsel %vm2101_vm6, %v2068_v28, %v2069_v32 }
 0x1b8   : > { %v6835_v33 = vadd.f32 %v5310_v26, %v2130_v31  ;;  %v6837_v10 = vadd.f32 %v2131_v46, %v1591_v14 }
 0x1bb   : > { %v5237_v18 = vpop.f32.mrb[20].mxu0  ;;  %v5313_v5 = vpop.f32.mrb[20].mxu1 }
 0x1bc   : > { %v2072_v21 = vrot.slane %v5237_v18, 7  ;;  %v1290_v55 = vpop.f32.mrb[21].mxu0  ;;  %v1601_v35 = vpop.f32.mrb[21].mxu1 }
 0x1bd   : > { %v2071_v63 = vrot.slane %v1290_v55, 7 }
 0x1bf   : > { %v2128_v40 = vsel %vm2101_vm6, %v2071_v63, %v2072_v21  ;;  %v2129_v39 = vsel %vm2101_vm6, %v2070_v37, %v2071_v63 }
 0x1c0   : > { %v6844_v50 = vadd.f32 %v5313_v5, %v2128_v40  ;;  %v6846_v60 = vadd.f32 %v2129_v39, %v1601_v35 }
 0x1c3   : > { %v5240_v2 = vpop.f32.mrb[22].mxu0  ;;  %v5316_v45 = vpop.f32.mrb[22].mxu1 }
 0x1c4   : > { %v2074_v42 = vrot.slane %v5240_v2, 7  ;;  %v1300_v41 = vpop.f32.mrb[23].mxu0  ;;  %v1611_v44 = vpop.f32.mrb[23].mxu1 }
 0x1c5   : > { %v2073_v34 = vrot.slane %v1300_v41, 7 }
 0x1c7   : > { %v2126_v24 = vsel %vm2101_vm6, %v2073_v34, %v2074_v42  ;;  %v2127_v53 = vsel %vm2101_vm6, %v2072_v21, %v2073_v34 }
 0x1c8   : > { %v6852_v20 = vadd.f32 %v5316_v45, %v2126_v24  ;;  %v6854_v52 = vadd.f32 %v2127_v53, %v1611_v44 }
 0x1cb   : > { %v5243_v47 = vpop.f32.mrb[24].mxu0  ;;  %v5319_v57 = vpop.f32.mrb[24].mxu1 }
 0x1cc   : > { %v2076_v56 = vrot.slane %v5243_v47, 7  ;;  %v1310_v36 = vpop.f32.mrb[25].mxu0  ;;  %v1621_v28 = vpop.f32.mrb[25].mxu1 }
 0x1cd   : > { %v2075_v62 = vrot.slane %v1310_v36, 7 }
 0x1cf   : > { %v2124_v19 = vsel %vm2101_vm6, %v2075_v62, %v2076_v56  ;;  %v2125_v1 = vsel %vm2101_vm6, %v2074_v42, %v2075_v62 }
 0x1d0   : > { %v6860_v13 = vadd.f32 %v5319_v57, %v2124_v19  ;;  %v6862_v29 = vadd.f32 %v2125_v1, %v1621_v28 }
 0x1d3   : > { %v5246_v49 = vpop.f32.mrb[26].mxu0  ;;  %v5322_v26 = vpop.f32.mrb[26].mxu1 }
 0x1d4   : > { %v2078_v37 = vrot.slane %v5246_v49, 7  ;;  %v1320_v38 = vpop.f32.mrb[27].mxu0  ;;  %v1631_v14 = vpop.f32.mrb[27].mxu1 }
 0x1d5   : > { %v2077_v32 = vrot.slane %v1320_v38, 7 }
 0x1d7   : > { %v2122_v31 = vsel %vm2101_vm6, %v2077_v32, %v2078_v37  ;;  %v2123_v46 = vsel %vm2101_vm6, %v2076_v56, %v2077_v32 }
 0x1d8   : > { %v6868_v11 = vadd.f32 %v5322_v26, %v2122_v31  ;;  %v6870_v18 = vadd.f32 %v2123_v46, %v1631_v14 }
 0x1db   : > { %v5249_v5 = vpop.f32.mrb[28].mxu0  ;;  %v5325_v21 = vpop.f32.mrb[28].mxu1 }
 0x1dc   : > { %v2080_v55 = vrot.slane %v5249_v5, 7  ;;  %v1330_v35 = vpop.f32.mrb[29].mxu0  ;;  %v1641_v63 = vpop.f32.mrb[29].mxu1 }
 0x1dd   : > { %v2079_v40 = vrot.slane %v1330_v35, 7 }
 0x1df   : > { %v2120_v39 = vsel %vm2101_vm6, %v2079_v40, %v2080_v55  ;;  %v2121_v2 = vsel %vm2101_vm6, %v2078_v37, %v2079_v40 }
 0x1e0   : > { %v6876_v45 = vadd.f32 %v5325_v21, %v2120_v39  ;;  %v6878_v42 = vadd.f32 %v2121_v2, %v1641_v63 }
 0x1e3   : > { %v5252_v41 = vpop.f32.mrb[30].mxu0  ;;  %v5328_v44 = vpop.f32.mrb[30].mxu1 }
 0x1e4   : > { %v2082_v34 = vrot.slane %v5252_v41, 7  ;;  %v1340_v24 = vpop.f32.mrb[31].mxu0  ;;  %v1651_v53 = vpop.f32.mrb[31].mxu1 }
 0x1e5   : > { %v2081_v47 = vrot.slane %v1340_v24, 7 }
 0x1e7   : > { %v2118_v57 = vsel %vm2101_vm6, %v2081_v47, %v2082_v34  ;;  %v2119_v56 = vsel %vm2101_vm6, %v2080_v55, %v2081_v47 }
 0x1e8   : > { %v6884_v36 = vadd.f32 %v5328_v44, %v2118_v57  ;;  %v6886_v28 = vadd.f32 %v2119_v56, %v1651_v53 }
 0x1eb   : > { %v5255_v62 = vpop.f32.mrb[32].mxu0  ;;  %v5331_v19 = vpop.f32.mrb[32].mxu1 }
 0x1ec   : > { %v2084_v1 = vrot.slane %v5255_v62, 7  ;;  %v1350_v49 = vpop.f32.mrb[33].mxu0  ;;  %v1661_v26 = vpop.f32.mrb[33].mxu1 }
 0x1ed   : > { %v2083_v37 = vrot.slane %v1350_v49, 7 }
 0x1ef   : > { %v2116_v38 = vsel %vm2101_vm6, %v2083_v37, %v2084_v1  ;;  %v2117_v14 = vsel %vm2101_vm6, %v2082_v34, %v2083_v37 }
 0x1f0   : > { %v6892_v32 = vadd.f32 %v5331_v19, %v2116_v38  ;;  %v6894_v31 = vadd.f32 %v2117_v14, %v1661_v26 }
 0x1f3   : > { %v5258_v46 = vpop.f32.mrb[34].mxu0  ;;  %v5334_v5 = vpop.f32.mrb[34].mxu1 }
 0x1f4   : > { %v2086_v21 = vrot.slane %v5258_v46, 7  ;;  %v1360_v55 = vpop.f32.mrb[35].mxu0  ;;  %v1671_v35 = vpop.f32.mrb[35].mxu1 }
 0x1f5   : > { %v2085_v63 = vrot.slane %v1360_v55, 7 }
 0x1f7   : > { %v2114_v40 = vsel %vm2101_vm6, %v2085_v63, %v2086_v21  ;;  %v2115_v39 = vsel %vm2101_vm6, %v2084_v1, %v2085_v63 }
 0x1f8   : > { %v6900_v2 = vadd.f32 %v5334_v5, %v2114_v40  ;;  %v6902_v41 = vadd.f32 %v2115_v39, %v1671_v35 }
 0x1fb   : > { %v5261_v44 = vpop.f32.mrb[36].mxu0  ;;  %v5337_v34 = vpop.f32.mrb[36].mxu1 }
 0x1fc   : > { %v2088_v24 = vrot.slane %v5261_v44, 7  ;;  %v1370_v53 = vpop.f32.mrb[37].mxu0  ;;  %v1681_v47 = vpop.f32.mrb[37].mxu1 }
 0x1fd   : > { %v2087_v57 = vrot.slane %v1370_v53, 7 }
 0x1ff   : > { %v2112_v56 = vsel %vm2101_vm6, %v2087_v57, %v2088_v24  ;;  %v2113_v62 = vsel %vm2101_vm6, %v2086_v21, %v2087_v57 }
 0x200   : > { %v6908_v19 = vadd.f32 %v5337_v34, %v2112_v56  ;;  %v6910_v49 = vadd.f32 %v2113_v62, %v1681_v47 }
 0x203   : > { %v5264_v1 = vpop.f32.mrb[38].mxu0  ;;  %v5340_v26 = vpop.f32.mrb[38].mxu1 }
 0x204   : > { %v2090_v37 = vrot.slane %v5264_v1, 7  ;;  %v1380_v38 = vpop.f32.mrb[39].mxu0  ;;  %v1691_v14 = vpop.f32.mrb[39].mxu1 }
 0x205   : > { %v2089_v46 = vrot.slane %v1380_v38, 7 }
 0x207   : > { %v2110_v5 = vsel %vm2101_vm6, %v2089_v46, %v2090_v37  ;;  %v2111_v55 = vsel %vm2101_vm6, %v2088_v24, %v2089_v46 }
 0x208   : > { %v6916_v35 = vadd.f32 %v5340_v26, %v2110_v5  ;;  %v6918_v63 = vadd.f32 %v2111_v55, %v1691_v14 }
 0x20b   : > { %v5267_v21 = vpop.f32.mrb[40].mxu0  ;;  %v5343_v40 = vpop.f32.mrb[40].mxu1 }
 0x20c   : > { %v2092_v39 = vrot.slane %v5267_v21, 7  ;;  %v1390_v44 = vpop.f32.mrb[41].mxu0  ;;  %v1701_v34 = vpop.f32.mrb[41].mxu1 }
 0x20d   : > { %v2091_v53 = vrot.slane %v1390_v44, 7 }
 0x20f   : > { %v2108_v47 = vsel %vm2101_vm6, %v2091_v53, %v2092_v39  ;;  %v2109_v57 = vsel %vm2101_vm6, %v2090_v37, %v2091_v53 }
 0x210   : > { %v6924_v56 = vadd.f32 %v5343_v40, %v2108_v47  ;;  %v6926_v62 = vadd.f32 %v2109_v57, %v1701_v34 }
 0x213   : > { %v5270_v24 = vpop.f32.mrb[42].mxu0  ;;  %v5346_v1 = vpop.f32.mrb[42].mxu1 }
 0x214   : > { %v2094_v26 = vrot.slane %v5270_v24, 7  ;;  %v1400_v38 = vpop.f32.mrb[43].mxu0  ;;  %v1711_v14 = vpop.f32.mrb[43].mxu1 }
 0x215   : > { %v2093_v46 = vrot.slane %v1400_v38, 7 }
 0x217   : > { %v2106_v5 = vsel %vm2101_vm6, %v2093_v46, %v2094_v26  ;;  %v2107_v55 = vsel %vm2101_vm6, %v2092_v39, %v2093_v46 }
 0x218   : > { %v6932_v21 = vadd.f32 %v5346_v1, %v2106_v5  ;;  %v6934_v44 = vadd.f32 %v2107_v55, %v1711_v14 }
 0x21a   : > { %8458 = vst [vmem:[#allocation4_spill] sm:$0xff] %v6932_v21 }
 0x21b   : > { %v5273_v37 = vpop.f32.mrb[44].mxu0  ;;  %v5349_v40 = vpop.f32.mrb[44].mxu1 }
 0x21c   : > { %v2096_v34 = vrot.slane %v5273_v37, 7  ;;  %v1410_v53 = vpop.f32.mrb[45].mxu0  ;;  %v1721_v47 = vpop.f32.mrb[45].mxu1  ;;  %v8460_v37 = vrot.slane %v6691_v51, 7 }
 0x21d   : > { %v2095_v57 = vrot.slane %v1410_v53, 7 }
 0x21f   : > { %v2104_v24 = vsel %vm2101_vm6, %v2095_v57, %v2096_v34  ;;  %v2105_v38 = vsel %vm2101_vm6, %v2094_v26, %v2095_v57 }
 0x220   : > { %v6940_v0 = vadd.f32 %v5349_v40, %v2104_v24  ;;  %v6942_v3 = vadd.f32 %v2105_v38, %v1721_v47 }
 0x222   : > { %8459 = vst [vmem:[#allocation5_spill] sm:$0xff] %v6940_v0 }
 0x223   : > { %v5276_v39 = vpop.f32.mrb[46].mxu0  ;;  %v5352_v1 = vpop.f32.mrb[46].mxu1 }
 0x224   : > { %v2098_v14 = vrot.slane %v5276_v39, 7  ;;  %v1420_v46 = vpop.f32.mrb[47].mxu0  ;;  %v1731_v5 = vpop.f32.mrb[47].mxu1 }
 0x225   : > { %v2097_v55 = vrot.slane %v1420_v46, 7 }
 0x226   : > { %v2149_v53 = vsel %vm2101_vm6, %v2098_v14, %v8460_v37 }
 0x227   : > { %v2150_v21 = vadd.f32 %v2149_v53, %v6694_v58  ;;  %v2102_v26 = vsel %vm2101_vm6, %v2097_v55, %v2098_v14  ;;  %v2103_v40 = vsel %vm2101_vm6, %v2096_v34, %v2097_v55  ;;  %v5359_v47 = vpop.f32.mrb[48].mxu0  ;;  %v6964_v58 = vld [vmem:[%s8447_s2] ss:$0 sm:$0xff] }
 0x228   : > { %v6953_v57 = vadd.f32 %v5352_v1, %v2102_v26  ;;  %v6955_v24 = vadd.f32 %v2103_v40, %v1731_v5  ;;  %v2199_v38 = vrot.slane %v5359_v47, 1  ;;  %v6957_v39 = vpop.f32.mrb[49].mxu0  ;;  %v3143_v53 = vld [vmem:[%s8448_s3] sm:$0xff]  ;;  %v3144_v26 = vld [vmem:[%s8448_s3 + $0x8] sm:$0xf] }
 0x229   : > { %8463 = vst [vmem:[#allocation8_spill] sm:$0xff] %v6957_v39  ;;  %v8454_v51 = vrot.slane %v6957_v39, 1 }
 0x22a   : > { %8461 = vst [vmem:[#allocation6_spill] sm:$0xff] %v6953_v57  ;;  %8462 = vst [vmem:[#allocation7_spill] sm:$0xff] %v6955_v24 }
 0x22b   : > { %v2293_v34 = vsel %vm2246_vm7, %v8454_v51, %v2199_v38  ;;  %v5362_v1 = vpop.f32.mrb[50].mxu0 }
 0x22c   : > { %v2295_v14 = vadd.f32 %v2293_v34, %v2150_v21  ;;  %v2201_v46 = vrot.slane %v5362_v1, 1  ;;  %v1822_v5 = vpop.f32.mrb[51].mxu0  ;;  %v5675_v34 = vpack.c.bf16 %v3144_v26, %v3143_v53 }
 0x22d   : > { %v2200_v55 = vrot.slane %v1822_v5, 1 }
 0x22e   : > { %v2349_v37 = vadd.f32 %v6964_v58, %v2295_v14  ;;  %5677 = vmatprep.subr.msk.bf16.mxu1 %vm5869_vm3, %v5675_v34 }
 0x22f   : > { %v2291_v40 = vsel %vm2246_vm7, %v2200_v55, %v2201_v46  ;;  %v2292_v47 = vsel %vm2246_vm7, %v2199_v38, %v2200_v55  ;;  %v5365_v21 = vpop.f32.mrb[52].mxu0  ;;  %5680 = vmatpush3.bf16.msk.msra.mxu1 %vm5869_vm3, %v5675_v34 }
 0x230   : > { %v2397_v1 = vmax.f32 %v2349_v37, 0.0  ;;  %v2296_v5 = vadd.f32 %v2292_v47, %v6705_v23  ;;  %v2297_v14 = vadd.f32 %v2291_v40, %v6721_v7  ;;  %v2203_v51 = vrot.slane %v5365_v21, 1  ;;  %v1832_v24 = vpop.f32.mrb[53].mxu0  ;;  %v4794_v23 = vld [vmem:[%s8448_s3 + $0x10] sm:$0xff]  ;;  %v4795_v7 = vld [vmem:[%s8448_s3 + $0x18] sm:$0xf] }
 0x231   : > { %v2202_v0 = vrot.slane %v1832_v24, 1  ;;  %v5681_v37 = vpack.c.bf16 %v4795_v7, %v4794_v23 }
 0x232   : > { %2446 = vst.msk [vmem:[#allocation3 + $0x18] sm:$0xff] %vm257_vm0, %v2397_v1  ;;  %v2350_v57 = vadd.f32 %v6964_v58, %v2296_v5  ;;  %v2351_v39 = vadd.f32 %v6964_v58, %v2297_v14 }
 0x233   : > { %v2289_v24 = vsel %vm2246_vm7, %v2202_v0, %v2203_v51  ;;  %v2290_v38 = vsel %vm2246_vm7, %v2201_v46, %v2202_v0  ;;  %v5368_v55 = vpop.f32.mrb[54].mxu0  ;;  %5683 = vmatprep.subr.msk.bf16.mxu0 %vm5869_vm3, %v5681_v37 }
 0x234   : > { %v2398_v53 = vmax.f32 %v2350_v57, 0.0  ;;  %v2399_v26 = vmax.f32 %v2351_v39, 0.0  ;;  %v2298_v40 = vadd.f32 %v2290_v38, %v6719_v48  ;;  %v2299_v47 = vadd.f32 %v2289_v24, %v6733_v12  ;;  %v1842_v21 = vpop.f32.mrb[55].mxu0  ;;  %5686 = vmatpush3.bf16.msk.msra.mxu0 %vm5869_vm3, %v5681_v37 }
 0x235   : > { %v2205_v34 = vrot.slane %v5368_v55, 1  ;;  %v2204_v1 = vrot.slane %v1842_v21, 1  ;;  %v8464_v48 = vmov 0.0  }
 0x236   : > { %2447 = vst.msk [vmem:[#allocation3 + $0x20] sm:$0xff] %vm257_vm0, %v2398_v53  ;;  %2448 = vst.msk [vmem:[#allocation3 + $0x28] sm:$0xff] %vm257_vm0, %v2399_v26  ;;  %v2352_v0 = vadd.f32 %v6964_v58, %v2298_v40  ;;  %v2353_v46 = vadd.f32 %v6964_v58, %v2299_v47 }
 0x237   : > { %2501 = vst.msk [vmem:[#allocation3 + $0x28] sm:$0xff] %vm257_vm0, %v8464_v48  ;;  %v2287_v12 = vsel %vm2246_vm7, %v2204_v1, %v2205_v34  ;;  %v2288_v57 = vsel %vm2246_vm7, %v2203_v51, %v2204_v1  ;;  %v5371_v39 = vpop.f32.mrb[56].mxu0 }
 0x238   : > { %v2400_v5 = vmax.f32 %v2352_v0, 0.0  ;;  %v2401_v14 = vmax.f32 %v2353_v46, 0.0  ;;  %v2300_v23 = vadd.f32 %v2288_v57, %v6731_v54  ;;  %v2301_v7 = vadd.f32 %v2287_v12, %v6749_v61  ;;  %v1852_v24 = vpop.f32.mrb[57].mxu0 }
 0x239   : > { %v2207_v38 = vrot.slane %v5371_v39, 1  ;;  %v2206_v55 = vrot.slane %v1852_v24, 1  ;;  %v7018_v37 = vld [vmem:[#allocation3 + $0x18] sm:$0xff] }
 0x23a   : > { %2449 = vst.msk [vmem:[#allocation3 + $0x30] sm:$0xff] %vm257_vm0, %v2400_v5  ;;  %2450 = vst.msk [vmem:[#allocation3 + $0x38] sm:$0xff] %vm257_vm0, %v2401_v14  ;;  %v2354_v53 = vadd.f32 %v6964_v58, %v2300_v23  ;;  %v2355_v51 = vadd.f32 %v6964_v58, %v2301_v7  ;;  %2710 = vrot.lane.b32.xlu0 %v7018_v37, %s5747_s7 }
 0x23b   : > { %v2285_v54 = vsel %vm2246_vm7, %v2206_v55, %v2207_v38  ;;  %v2286_v61 = vsel %vm2246_vm7, %v2205_v34, %v2206_v55  ;;  %v5374_v26 = vpop.f32.mrb[58].mxu0 }
 0x23c   : > { %v2402_v40 = vmax.f32 %v2354_v53, 0.0  ;;  %v2403_v47 = vmax.f32 %v2355_v51, 0.0  ;;  %v2302_v21 = vadd.f32 %v2286_v61, %v6747_v25  ;;  %v2303_v1 = vadd.f32 %v2285_v54, %v6765_v59  ;;  %v1862_v0 = vpop.f32.mrb[59].mxu0 }
 0x23d   : > { %v2209_v46 = vrot.slane %v5374_v26, 1  ;;  %v2208_v12 = vrot.slane %v1862_v0, 1  ;;  %v7032_v57 = vld [vmem:[#allocation3 + $0x20] sm:$0xff] }
 0x23e   : > { %2451 = vst.msk [vmem:[#allocation3 + $0x40] sm:$0xff] %vm257_vm0, %v2402_v40  ;;  %2452 = vst.msk [vmem:[#allocation3 + $0x48] sm:$0xff] %vm257_vm0, %v2403_v47  ;;  %v2356_v39 = vadd.f32 %v6964_v58, %v2302_v21  ;;  %v2357_v34 = vadd.f32 %v6964_v58, %v2303_v1  ;;  %2712 = vrot.lane.b32.xlu1 %v7032_v57, %s5747_s7  ;;  %v7040_v5 = vld [vmem:[#allocation3 + $0x28] sm:$0xff] }
 0x23f   : > { %2502 = vst.msk [vmem:[#allocation3 + $0x40] sm:$0xff] %vm257_vm0, %v8464_v48  ;;  %v2283_v25 = vsel %vm2246_vm7, %v2208_v12, %v2209_v46  ;;  %v2284_v59 = vsel %vm2246_vm7, %v2207_v38, %v2208_v12  ;;  %2714 = vrot.lane.b32.xlu0 %v7040_v5, %s5747_s7  ;;  %v5377_v14 = vpop.f32.mrb[60].mxu0 }
 0x240   : > { %v2404_v23 = vmax.f32 %v2356_v39, 0.0  ;;  %v2405_v7 = vmax.f32 %v2357_v34, 0.0  ;;  %v2304_v24 = vadd.f32 %v2284_v59, %v6763_v16  ;;  %v2305_v55 = vadd.f32 %v2283_v25, %v6781_v17  ;;  %v1872_v53 = vpop.f32.mrb[61].mxu0 }
 0x241   : > { %v2211_v51 = vrot.slane %v5377_v14, 1  ;;  %v2210_v54 = vrot.slane %v1872_v53, 1  ;;  %v7052_v61 = vld [vmem:[#allocation3 + $0x38] sm:$0xff]  ;;  %v7054_v26 = vld [vmem:[#allocation3 + $0x30] sm:$0xff] }
 0x242   : > { %2453 = vst.msk [vmem:[#allocation3 + $0x50] sm:$0xff] %vm257_vm0, %v2404_v23  ;;  %2454 = vst.msk [vmem:[#allocation3 + $0x58] sm:$0xff] %vm257_vm0, %v2405_v7  ;;  %v2358_v38 = vadd.f32 %v6964_v58, %v2304_v24  ;;  %v2359_v40 = vadd.f32 %v6964_v58, %v2305_v55  ;;  %2904 = vrot.lane.b32.xlu1 %v7052_v61, %s5748_s8 }
 0x243   : > { %2503 = vst.msk [vmem:[#allocation3 + $0x58] sm:$0xff] %vm257_vm0, %v8464_v48  ;;  %v2281_v16 = vsel %vm2246_vm7, %v2210_v54, %v2211_v51  ;;  %v2282_v17 = vsel %vm2246_vm7, %v2209_v46, %v2210_v54  ;;  %2902 = vrot.lane.b32.xlu0 %v7054_v26, %s5748_s8  ;;  %v5380_v47 = vpop.f32.mrb[62].mxu0 }
 0x244   : > { %v2406_v21 = vmax.f32 %v2358_v38, 0.0  ;;  %v2407_v1 = vmax.f32 %v2359_v40, 0.0  ;;  %v2306_v0 = vadd.f32 %v2282_v17, %v6779_v22  ;;  %v2307_v12 = vadd.f32 %v2281_v16, %v6797_v15  ;;  %v1882_v39 = vpop.f32.mrb[63].mxu0 }
 0x245   : > { %v2213_v34 = vrot.slane %v5380_v47, 1  ;;  %v2212_v25 = vrot.slane %v1882_v39, 1  ;;  %v7086_v40 = vld [vmem:[#allocation3 + $0x48] sm:$0xff] }
 0x246   : > { %2455 = vst.msk [vmem:[#allocation3 + $0x60] sm:$0xff] %vm257_vm0, %v2406_v21  ;;  %2456 = vst.msk [vmem:[#allocation3 + $0x68] sm:$0xff] %vm257_vm0, %v2407_v1  ;;  %v2360_v59 = vadd.f32 %v6964_v58, %v2306_v0  ;;  %v2361_v46 = vadd.f32 %v6964_v58, %v2307_v12  ;;  %2716 = vrot.lane.b32.xlu1 %v7054_v26, %s5747_s7  ;;  %v7102_v47 = vld [vmem:[#allocation3 + $0x40] sm:$0xff] }
 0x247   : > { %v2279_v14 = vsel %vm2246_vm7, %v2212_v25, %v2213_v34  ;;  %v2280_v22 = vsel %vm2246_vm7, %v2211_v51, %v2212_v25  ;;  %2718 = vrot.lane.b32.xlu0 %v7052_v61, %s5747_s7  ;;  %v5383_v15 = vpop.f32.mrb[64].mxu0 }
 0x248   : > { %v2408_v23 = vmax.f32 %v2360_v59, 0.0  ;;  %v2409_v7 = vmax.f32 %v2361_v46, 0.0  ;;  %v2308_v24 = vadd.f32 %v2280_v22, %v6795_v4  ;;  %v2309_v55 = vadd.f32 %v2279_v14, %v6813_v43  ;;  %v1892_v53 = vpop.f32.mrb[65].mxu0 }
 0x249   : > { %v2215_v54 = vrot.slane %v5383_v15, 1  ;;  %v2214_v38 = vrot.slane %v1892_v53, 1 }
 0x24a   : > { %2457 = vst.msk [vmem:[#allocation3 + $0x70] sm:$0xff] %vm257_vm0, %v2408_v23  ;;  %2458 = vst.msk [vmem:[#allocation3 + $0x78] sm:$0xff] %vm257_vm0, %v2409_v7  ;;  %v2362_v51 = vadd.f32 %v6964_v58, %v2308_v24  ;;  %v2363_v16 = vadd.f32 %v6964_v58, %v2309_v55  ;;  %2908 = vrot.lane.b32.xlu1 %v7086_v40, %s5748_s8 }
 0x24b   : > { %2504 = vst.msk [vmem:[#allocation3 + $0x70] sm:$0xff] %vm257_vm0, %v8464_v48  ;;  %v2277_v4 = vsel %vm2246_vm7, %v2214_v38, %v2215_v54  ;;  %v2278_v43 = vsel %vm2246_vm7, %v2213_v34, %v2214_v38  ;;  %2722 = vrot.lane.b32.xlu0 %v7086_v40, %s5747_s7  ;;  %v5386_v17 = vpop.f32.mrb[66].mxu0  ;;  %v7122_v38 = vld [vmem:[#allocation3 + $0x50] sm:$0xff] }
 0x24c   : > { %v2410_v21 = vmax.f32 %v2362_v51, 0.0  ;;  %v2411_v1 = vmax.f32 %v2363_v16, 0.0  ;;  %v2310_v0 = vadd.f32 %v2278_v43, %v6811_v27  ;;  %v2311_v12 = vadd.f32 %v2277_v4, %v6829_v9  ;;  %v1902_v39 = vpop.f32.mrb[67].mxu0  ;;  %v7136_v4 = vld [vmem:[#allocation3 + $0x58] sm:$0xff] }
 0x24d   : > { %v2217_v25 = vrot.slane %v5386_v17, 1  ;;  %v2216_v59 = vrot.slane %v1902_v39, 1 }
 0x24e   : > { %2459 = vst.msk [vmem:[#allocation3 + $0x80] sm:$0xff] %vm257_vm0, %v2410_v21  ;;  %2460 = vst.msk [vmem:[#allocation3 + $0x88] sm:$0xff] %vm257_vm0, %v2411_v1  ;;  %v2364_v34 = vadd.f32 %v6964_v58, %v2310_v0  ;;  %v2365_v46 = vadd.f32 %v6964_v58, %v2311_v12  ;;  %2720 = vrot.lane.b32.xlu1 %v7102_v47, %s5747_s7 }
 0x24f   : > { %2505 = vst.msk [vmem:[#allocation3 + $0x88] sm:$0xff] %vm257_vm0, %v8464_v48  ;;  %v2275_v27 = vsel %vm2246_vm7, %v2216_v59, %v2217_v25  ;;  %v2276_v9 = vsel %vm2246_vm7, %v2215_v54, %v2216_v59  ;;  %2906 = vrot.lane.b32.xlu0 %v7102_v47, %s5748_s8  ;;  %v5389_v14 = vpop.f32.mrb[68].mxu0 }
 0x250   : > { %v2412_v22 = vmax.f32 %v2364_v34, 0.0  ;;  %v2413_v15 = vmax.f32 %v2365_v46, 0.0  ;;  %v2312_v23 = vadd.f32 %v2276_v9, %v6827_v30  ;;  %v2313_v7 = vadd.f32 %v2275_v27, %v6837_v10  ;;  %v1912_v24 = vpop.f32.mrb[69].mxu0 }
 0x251   : > { %v2219_v55 = vrot.slane %v5389_v14, 1  ;;  %v2218_v53 = vrot.slane %v1912_v24, 1 }
 0x252   : > { %2461 = vst.msk [vmem:[#allocation3 + $0x90] sm:$0xff] %vm257_vm0, %v2412_v22  ;;  %2462 = vst.msk [vmem:[#allocation3 + $0x98] sm:$0xff] %vm257_vm0, %v2413_v15  ;;  %v2366_v54 = vadd.f32 %v6964_v58, %v2312_v23  ;;  %v2367_v51 = vadd.f32 %v6964_v58, %v2313_v7  ;;  %2724 = vrot.lane.b32.xlu1 %v7122_v38, %s5747_s7  ;;  %v7156_v7 = vld [vmem:[#allocation3 + $0x68] sm:$0xff] }
 0x253   : > { %v2273_v30 = vsel %vm2246_vm7, %v2218_v53, %v2219_v55  ;;  %v2274_v10 = vsel %vm2246_vm7, %v2217_v25, %v2218_v53  ;;  %2910 = vrot.lane.b32.xlu0 %v7122_v38, %s5748_s8  ;;  %v5392_v16 = vpop.f32.mrb[70].mxu0  ;;  %v7164_v53 = vld [vmem:[#allocation3 + $0x60] sm:$0xff] }
 0x254   : > { %v2414_v43 = vmax.f32 %v2366_v54, 0.0  ;;  %v2415_v17 = vmax.f32 %v2367_v51, 0.0  ;;  %v2314_v21 = vadd.f32 %v2274_v10, %v6835_v33  ;;  %v2315_v1 = vadd.f32 %v2273_v30, %v6846_v60  ;;  %v1922_v0 = vpop.f32.mrb[71].mxu0 }
 0x255   : > { %v2221_v12 = vrot.slane %v5392_v16, 1  ;;  %v2220_v39 = vrot.slane %v1922_v0, 1 }
 0x256   : > { %2463 = vst.msk [vmem:[#allocation3 + $0xa0] sm:$0xff] %vm257_vm0, %v2414_v43  ;;  %2464 = vst.msk [vmem:[#allocation3 + $0xa8] sm:$0xff] %vm257_vm0, %v2415_v17  ;;  %v2368_v25 = vadd.f32 %v6964_v58, %v2314_v21  ;;  %v2369_v59 = vadd.f32 %v6964_v58, %v2315_v1  ;;  %2912 = vrot.lane.b32.xlu1 %v7136_v4, %s5748_s8 }
 0x257   : > { %2506 = vst.msk [vmem:[#allocation3 + $0xa0] sm:$0xff] %vm257_vm0, %v8464_v48  ;;  %v2271_v33 = vsel %vm2246_vm7, %v2220_v39, %v2221_v12  ;;  %v2272_v60 = vsel %vm2246_vm7, %v2219_v55, %v2220_v39  ;;  %2726 = vrot.lane.b32.xlu0 %v7136_v4, %s5747_s7  ;;  %v5395_v34 = vpop.f32.mrb[72].mxu0 }
 0x258   : > { %v2416_v46 = vmax.f32 %v2368_v25, 0.0  ;;  %v2417_v27 = vmax.f32 %v2369_v59, 0.0  ;;  %v2316_v9 = vadd.f32 %v2272_v60, %v6844_v50  ;;  %v2317_v14 = vadd.f32 %v2271_v33, %v6854_v52  ;;  %v1932_v22 = vpop.f32.mrb[73].mxu0 }
 0x259   : > { %v2223_v15 = vrot.slane %v5395_v34, 1  ;;  %v2222_v23 = vrot.slane %v1932_v22, 1 }
 0x25a   : > { %2465 = vst.msk [vmem:[#allocation3 + $0xb0] sm:$0xff] %vm257_vm0, %v2416_v46  ;;  %2466 = vst.msk [vmem:[#allocation3 + $0xb8] sm:$0xff] %vm257_vm0, %v2417_v27  ;;  %v2370_v24 = vadd.f32 %v6964_v58, %v2316_v9  ;;  %v2371_v55 = vadd.f32 %v6964_v58, %v2317_v14  ;;  %2916 = vrot.lane.b32.xlu1 %v7156_v7, %s5748_s8  ;;  %v7190_v27 = vld [vmem:[#allocation3 + $0x78] sm:$0xff] }
 0x25b   : > { %2507 = vst.msk [vmem:[#allocation3 + $0xb8] sm:$0xff] %vm257_vm0, %v8464_v48  ;;  %v2269_v50 = vsel %vm2246_vm7, %v2222_v23, %v2223_v15  ;;  %v2270_v52 = vsel %vm2246_vm7, %v2221_v12, %v2222_v23  ;;  %2914 = vrot.lane.b32.xlu0 %v7164_v53, %s5748_s8  ;;  %v5398_v54 = vpop.f32.mrb[74].mxu0 }
 0x25c   : > { %v2418_v51 = vmax.f32 %v2370_v24, 0.0  ;;  %v2419_v30 = vmax.f32 %v2371_v55, 0.0  ;;  %v2318_v10 = vadd.f32 %v2270_v52, %v6852_v20  ;;  %v2319_v16 = vadd.f32 %v2269_v50, %v6862_v29  ;;  %v1942_v43 = vpop.f32.mrb[75].mxu0 }
 0x25d   : > { %v2225_v17 = vrot.slane %v5398_v54, 1  ;;  %v2224_v21 = vrot.slane %v1942_v43, 1 }
 0x25e   : > { %2467 = vst.msk [vmem:[#allocation3 + $0xc0] sm:$0xff] %vm257_vm0, %v2418_v51  ;;  %2468 = vst.msk [vmem:[#allocation3 + $0xc8] sm:$0xff] %vm257_vm0, %v2419_v30  ;;  %v2372_v1 = vadd.f32 %v6964_v58, %v2318_v10  ;;  %v2373_v0 = vadd.f32 %v6964_v58, %v2319_v16  ;;  %2728 = vrot.lane.b32.xlu1 %v7164_v53, %s5747_s7 }
 0x25f   : > { %v2267_v12 = vsel %vm2246_vm7, %v2224_v21, %v2225_v17  ;;  %v2268_v20 = vsel %vm2246_vm7, %v2223_v15, %v2224_v21  ;;  %2730 = vrot.lane.b32.xlu0 %v7156_v7, %s5747_s7  ;;  %v5401_v29 = vpop.f32.mrb[76].mxu0  ;;  %v7206_v15 = vld [vmem:[#allocation3 + $0x70] sm:$0xff] }
 0x260   : > { %v2420_v39 = vmax.f32 %v2372_v1, 0.0  ;;  %v2421_v25 = vmax.f32 %v2373_v0, 0.0  ;;  %v2320_v59 = vadd.f32 %v2268_v20, %v6860_v13  ;;  %v2321_v33 = vadd.f32 %v2267_v12, %v6870_v18  ;;  %v1952_v60 = vpop.f32.mrb[77].mxu0 }
 0x261   : > { %v2227_v34 = vrot.slane %v5401_v29, 1  ;;  %v2226_v46 = vrot.slane %v1952_v60, 1  ;;  %v7226_v29 = vld [vmem:[#allocation3 + $0x80] sm:$0xff] }
 0x262   : > { %2469 = vst.msk [vmem:[#allocation3 + $0xd0] sm:$0xff] %vm257_vm0, %v2420_v39  ;;  %2470 = vst.msk [vmem:[#allocation3 + $0xd8] sm:$0xff] %vm257_vm0, %v2421_v25  ;;  %v2374_v9 = vadd.f32 %v6964_v58, %v2320_v59  ;;  %v2375_v14 = vadd.f32 %v6964_v58, %v2321_v33  ;;  %2920 = vrot.lane.b32.xlu1 %v7190_v27, %s5748_s8  ;;  %v7240_v33 = vld [vmem:[#allocation3 + $0x88] sm:$0xff] }
 0x263   : > { %2508 = vst.msk [vmem:[#allocation3 + $0xd0] sm:$0xff] %vm257_vm0, %v8464_v48  ;;  %v2265_v13 = vsel %vm2246_vm7, %v2226_v46, %v2227_v34  ;;  %v2266_v18 = vsel %vm2246_vm7, %v2225_v17, %v2226_v46  ;;  %2734 = vrot.lane.b32.xlu0 %v7190_v27, %s5747_s7  ;;  %v5404_v22 = vpop.f32.mrb[78].mxu0 }
 0x264   : > { %v2422_v23 = vmax.f32 %v2374_v9, 0.0  ;;  %v2423_v24 = vmax.f32 %v2375_v14, 0.0  ;;  %v2322_v55 = vadd.f32 %v2266_v18, %v6868_v11  ;;  %v2323_v50 = vadd.f32 %v2265_v13, %v6878_v42  ;;  %v1962_v52 = vpop.f32.mrb[79].mxu0 }
 0x265   : > { %v2229_v54 = vrot.slane %v5404_v22, 1  ;;  %v2228_v51 = vrot.slane %v1962_v52, 1 }
 0x266   : > { %2471 = vst.msk [vmem:[#allocation3 + $0xe0] sm:$0xff] %vm257_vm0, %v2422_v23  ;;  %2472 = vst.msk [vmem:[#allocation3 + $0xe8] sm:$0xff] %vm257_vm0, %v2423_v24  ;;  %v2376_v30 = vadd.f32 %v6964_v58, %v2322_v55  ;;  %v2377_v10 = vadd.f32 %v6964_v58, %v2323_v50  ;;  %2732 = vrot.lane.b32.xlu1 %v7206_v15, %s5747_s7 }
 0x267   : > { %2509 = vst.msk [vmem:[#allocation3 + $0xe8] sm:$0xff] %vm257_vm0, %v8464_v48  ;;  %v2263_v11 = vsel %vm2246_vm7, %v2228_v51, %v2229_v54  ;;  %v2264_v42 = vsel %vm2246_vm7, %v2227_v34, %v2228_v51  ;;  %2918 = vrot.lane.b32.xlu0 %v7206_v15, %s5748_s8  ;;  %v5407_v16 = vpop.f32.mrb[80].mxu0 }
 0x268   : > { %v2424_v43 = vmax.f32 %v2376_v30, 0.0  ;;  %v2425_v17 = vmax.f32 %v2377_v10, 0.0  ;;  %v2324_v21 = vadd.f32 %v2264_v42, %v6876_v45  ;;  %v2325_v1 = vadd.f32 %v2263_v11, %v6886_v28  ;;  %v1972_v0 = vpop.f32.mrb[81].mxu0  ;;  %v7260_v11 = vld [vmem:[#allocation3 + $0x98] sm:$0xff] }
 0x269   : > { %v2231_v12 = vrot.slane %v5407_v16, 1  ;;  %v2230_v20 = vrot.slane %v1972_v0, 1 }
 0x26a   : > { %2473 = vst.msk [vmem:[#allocation3 + $0xf0] sm:$0xff] %vm257_vm0, %v2424_v43  ;;  %2474 = vst.msk [vmem:[#allocation3 + $0xf8] sm:$0xff] %vm257_vm0, %v2425_v17  ;;  %v2378_v39 = vadd.f32 %v6964_v58, %v2324_v21  ;;  %v2379_v25 = vadd.f32 %v6964_v58, %v2325_v1  ;;  %2736 = vrot.lane.b32.xlu1 %v7226_v29, %s5747_s7  ;;  %v7268_v43 = vld [vmem:[#allocation3 + $0x90] sm:$0xff] }
 0x26b   : > { %v2261_v45 = vsel %vm2246_vm7, %v2230_v20, %v2231_v12  ;;  %v2262_v28 = vsel %vm2246_vm7, %v2229_v54, %v2230_v20  ;;  %2922 = vrot.lane.b32.xlu0 %v7226_v29, %s5748_s8  ;;  %v5410_v59 = vpop.f32.mrb[82].mxu0 }
 0x26c   : > { %v2426_v60 = vmax.f32 %v2378_v39, 0.0  ;;  %v2427_v34 = vmax.f32 %v2379_v25, 0.0  ;;  %v2326_v46 = vadd.f32 %v2262_v28, %v6884_v36  ;;  %v2327_v9 = vadd.f32 %v2261_v45, %v6894_v31  ;;  %v1982_v14 = vpop.f32.mrb[83].mxu0 }
 0x26d   : > { %v2233_v13 = vrot.slane %v5410_v59, 1  ;;  %v2232_v18 = vrot.slane %v1982_v14, 1 }
 0x26e   : > { %2475 = vst.msk [vmem:[#allocation3 + $0x100] sm:$0xff] %vm257_vm0, %v2426_v60  ;;  %2476 = vst.msk [vmem:[#allocation3 + $0x108] sm:$0xff] %vm257_vm0, %v2427_v34  ;;  %v2380_v22 = vadd.f32 %v6964_v58, %v2326_v46  ;;  %v2381_v23 = vadd.f32 %v6964_v58, %v2327_v9  ;;  %2924 = vrot.lane.b32.xlu1 %v7240_v33, %s5748_s8 }
 0x26f   : > { %2510 = vst.msk [vmem:[#allocation3 + $0x100] sm:$0xff] %vm257_vm0, %v8464_v48  ;;  %v2259_v36 = vsel %vm2246_vm7, %v2232_v18, %v2233_v13  ;;  %v2260_v31 = vsel %vm2246_vm7, %v2231_v12, %v2232_v18  ;;  %2738 = vrot.lane.b32.xlu0 %v7240_v33, %s5747_s7  ;;  %v5413_v24 = vpop.f32.mrb[84].mxu0 }
 0x270   : > { %v2428_v55 = vmax.f32 %v2380_v22, 0.0  ;;  %v2429_v50 = vmax.f32 %v2381_v23, 0.0  ;;  %v2328_v52 = vadd.f32 %v2260_v31, %v6892_v32  ;;  %v2329_v54 = vadd.f32 %v2259_v36, %v6902_v41  ;;  %v1992_v51 = vpop.f32.mrb[85].mxu0  ;;  %v7294_v22 = vld [vmem:[#allocation3 + $0xa8] sm:$0xff] }
 0x271   : > { %v2235_v30 = vrot.slane %v5413_v24, 1  ;;  %v2234_v10 = vrot.slane %v1992_v51, 1  ;;  %v7310_v24 = vld [vmem:[#allocation3 + $0xa0] sm:$0xff] }
 0x272   : > { %2477 = vst.msk [vmem:[#allocation3 + $0x110] sm:$0xff] %vm257_vm0, %v2428_v55  ;;  %2478 = vst.msk [vmem:[#allocation3 + $0x118] sm:$0xff] %vm257_vm0, %v2429_v50  ;;  %v2382_v42 = vadd.f32 %v6964_v58, %v2328_v52  ;;  %v2383_v16 = vadd.f32 %v6964_v58, %v2329_v54  ;;  %2928 = vrot.lane.b32.xlu1 %v7260_v11, %s5748_s8 }
 0x273   : > { %2511 = vst.msk [vmem:[#allocation3 + $0x118] sm:$0xff] %vm257_vm0, %v8464_v48  ;;  %v2257_v32 = vsel %vm2246_vm7, %v2234_v10, %v2235_v30  ;;  %v2258_v41 = vsel %vm2246_vm7, %v2233_v13, %v2234_v10  ;;  %2926 = vrot.lane.b32.xlu0 %v7268_v43, %s5748_s8  ;;  %v5416_v17 = vpop.f32.mrb[86].mxu0 }
 0x274   : > { %v2430_v21 = vmax.f32 %v2382_v42, 0.0  ;;  %v2431_v1 = vmax.f32 %v2383_v16, 0.0  ;;  %v2330_v0 = vadd.f32 %v2258_v41, %v6900_v2  ;;  %v2331_v12 = vadd.f32 %v2257_v32, %v6910_v49  ;;  %v2002_v20 = vpop.f32.mrb[87].mxu0 }
 0x275   : > { %v2237_v39 = vrot.slane %v5416_v17, 1  ;;  %v2236_v25 = vrot.slane %v2002_v20, 1 }
 0x276   : > { %2479 = vst.msk [vmem:[#allocation3 + $0x120] sm:$0xff] %vm257_vm0, %v2430_v21  ;;  %2480 = vst.msk [vmem:[#allocation3 + $0x128] sm:$0xff] %vm257_vm0, %v2431_v1  ;;  %v2384_v45 = vadd.f32 %v6964_v58, %v2330_v0  ;;  %v2385_v28 = vadd.f32 %v6964_v58, %v2331_v12  ;;  %2740 = vrot.lane.b32.xlu1 %v7268_v43, %s5747_s7 }
 0x277   : > { %v2255_v59 = vsel %vm2246_vm7, %v2236_v25, %v2237_v39  ;;  %v2256_v2 = vsel %vm2246_vm7, %v2235_v30, %v2236_v25  ;;  %2742 = vrot.lane.b32.xlu0 %v7260_v11, %s5747_s7  ;;  %v5419_v49 = vpop.f32.mrb[88].mxu0 }
 0x278   : > { %v2432_v60 = vmax.f32 %v2384_v45, 0.0  ;;  %v2433_v34 = vmax.f32 %v2385_v28, 0.0  ;;  %v2332_v46 = vadd.f32 %v2256_v2, %v6908_v19  ;;  %v2333_v9 = vadd.f32 %v2255_v59, %v6918_v63  ;;  %v2012_v14 = vpop.f32.mrb[89].mxu0  ;;  %v7344_v59 = vld [vmem:[#allocation3 + $0xb8] sm:$0xff] }
 0x279   : > { %v2239_v13 = vrot.slane %v5419_v49, 1  ;;  %v2238_v18 = vrot.slane %v2012_v14, 1 }
 0x27a   : > { %2481 = vst.msk [vmem:[#allocation3 + $0x130] sm:$0xff] %vm257_vm0, %v2432_v60  ;;  %2482 = vst.msk [vmem:[#allocation3 + $0x138] sm:$0xff] %vm257_vm0, %v2433_v34  ;;  %v2386_v23 = vadd.f32 %v6964_v58, %v2332_v46  ;;  %v2387_v36 = vadd.f32 %v6964_v58, %v2333_v9  ;;  %2932 = vrot.lane.b32.xlu1 %v7294_v22, %s5748_s8  ;;  %v8465_v60 = vld [vmem:[#allocation4_spill] sm:$0xff] }
 0x27b   : > { %2512 = vst.msk [vmem:[#allocation3 + $0x130] sm:$0xff] %vm257_vm0, %v8464_v48  ;;  %v2253_v19 = vsel %vm2246_vm7, %v2238_v18, %v2239_v13  ;;  %v2254_v63 = vsel %vm2246_vm7, %v2237_v39, %v2238_v18  ;;  %2746 = vrot.lane.b32.xlu0 %v7294_v22, %s5747_s7  ;;  %v5422_v31 = vpop.f32.mrb[90].mxu0  ;;  %v7330_v39 = vld [vmem:[#allocation3 + $0xb0] sm:$0xff] }
 0x27c   : > { %v2434_v55 = vmax.f32 %v2386_v23, 0.0  ;;  %v2435_v50 = vmax.f32 %v2387_v36, 0.0  ;;  %v2334_v52 = vadd.f32 %v2254_v63, %v6916_v35  ;;  %v2335_v54 = vadd.f32 %v2253_v19, %v6926_v62  ;;  %v2022_v51 = vpop.f32.mrb[91].mxu0  ;;  %v8466_v36 = vld [vmem:[#allocation8_spill] sm:$0xff] }
 0x27d   : > { %v2241_v30 = vrot.slane %v5422_v31, 1  ;;  %v2240_v10 = vrot.slane %v2022_v51, 1  ;;  %v8467_v19 = vrot.slane %v8466_v36, 1  ;;  %v8469_v51 = vld [vmem:[#allocation5_spill] sm:$0xff] }
 0x27e   : > { %2483 = vst.msk [vmem:[#allocation3 + $0x140] sm:$0xff] %vm257_vm0, %v2434_v55  ;;  %2484 = vst.msk [vmem:[#allocation3 + $0x148] sm:$0xff] %vm257_vm0, %v2435_v50  ;;  %v2388_v42 = vadd.f32 %v6964_v58, %v2334_v52  ;;  %v2389_v16 = vadd.f32 %v6964_v58, %v2335_v54  ;;  %2744 = vrot.lane.b32.xlu1 %v7310_v24, %s5747_s7  ;;  %v8468_v52 = vld [vmem:[#allocation6_spill] sm:$0xff] }
 0x27f   : > { %2513 = vst.msk [vmem:[#allocation3 + $0x148] sm:$0xff] %vm257_vm0, %v8464_v48  ;;  %v2251_v35 = vsel %vm2246_vm7, %v2240_v10, %v2241_v30  ;;  %v2252_v62 = vsel %vm2246_vm7, %v2239_v13, %v2240_v10  ;;  %2930 = vrot.lane.b32.xlu0 %v7310_v24, %s5748_s8  ;;  %v5425_v32 = vpop.f32.mrb[92].mxu0  ;;  %v8470_v10 = vld [vmem:[#allocation7_spill] sm:$0xff] }
 0x280   : > { %v2436_v41 = vmax.f32 %v2388_v42, 0.0  ;;  %v2437_v17 = vmax.f32 %v2389_v16, 0.0  ;;  %v2336_v21 = vadd.f32 %v2252_v62, %v6924_v56  ;;  %v2337_v1 = vadd.f32 %v2251_v35, %v6934_v44  ;;  %v2032_v0 = vpop.f32.mrb[93].mxu0  ;;  %v7369_v16 = vld [vmem:[#allocation3 + $0xc8] sm:$0xff] }
 0x281   : > { %v2243_v12 = vrot.slane %v5425_v32, 1  ;;  %v2242_v20 = vrot.slane %v2032_v0, 1  ;;  %v7377_v32 = vld [vmem:[#allocation3 + $0xc0] sm:$0xff]  ;;  %v4846_v0 = vld [vmem:[%s8448_s3 + $0x28] sm:$0xf] }
 0x282   : > { %2485 = vst.msk [vmem:[#allocation3 + $0x150] sm:$0xff] %vm257_vm0, %v2436_v41  ;;  %2486 = vst.msk [vmem:[#allocation3 + $0x158] sm:$0xff] %vm257_vm0, %v2437_v17  ;;  %v2390_v25 = vadd.f32 %v6964_v58, %v2336_v21  ;;  %v2391_v45 = vadd.f32 %v6964_v58, %v2337_v1  ;;  %2748 = vrot.lane.b32.xlu1 %v7330_v39, %s5747_s7 }
 0x283   : > { %v2249_v56 = vsel %vm2246_vm7, %v2242_v20, %v2243_v12  ;;  %v2250_v44 = vsel %vm2246_vm7, %v2241_v30, %v2242_v20  ;;  %2934 = vrot.lane.b32.xlu0 %v7330_v39, %s5748_s8  ;;  %v5428_v28 = vpop.f32.mrb[94].mxu0  ;;  %v7399_v20 = vld [vmem:[#allocation3 + $0xd8] sm:$0xff] }
 0x284   : > { %v2438_v2 = vmax.f32 %v2390_v25, 0.0  ;;  %v2439_v49 = vmax.f32 %v2391_v45, 0.0  ;;  %v2338_v34 = vadd.f32 %v2250_v44, %v8465_v60  ;;  %v2339_v46 = vadd.f32 %v2249_v56, %v6942_v3  ;;  %v2042_v9 = vpop.f32.mrb[95].mxu0  ;;  %v7413_v25 = vld [vmem:[#allocation3 + $0xe0] sm:$0xff]  ;;  %v7419_v45 = vld [vmem:[#allocation3 + $0xe8] sm:$0xff]  ;;  %v7425_v56 = vld [vmem:[#allocation3 + $0xf8] sm:$0xff] }
 0x285   : > { %v2245_v14 = vrot.slane %v5428_v28, 1  ;;  %v2244_v13 = vrot.slane %v2042_v9, 1  ;;  %v7429_v44 = vld [vmem:[#allocation3 + $0xf0] sm:$0xff]  ;;  %v7437_v28 = vld [vmem:[#allocation3 + $0x108] sm:$0xff] }
 0x286   : > { %2487 = vst.msk [vmem:[#allocation3 + $0x160] sm:$0xff] %vm257_vm0, %v2438_v2  ;;  %2488 = vst.msk [vmem:[#allocation3 + $0x168] sm:$0xff] %vm257_vm0, %v2439_v49  ;;  %v2392_v18 = vadd.f32 %v6964_v58, %v2338_v34  ;;  %v2393_v23 = vadd.f32 %v6964_v58, %v2339_v46  ;;  %2936 = vrot.lane.b32.xlu1 %v7344_v59, %s5748_s8  ;;  %v7441_v2 = vpop.permute.xlu1 %2992  ;;  %v7445_v49 = vld [vmem:[#allocation3 + $0x100] sm:$0xff]  ;;  %v7451_v9 = vld [vmem:[#allocation3 + $0x110] sm:$0xff] }
 0x287   : > { %2514 = vst.msk [vmem:[#allocation3 + $0x160] sm:$0xff] %vm257_vm0, %v8464_v48  ;;  %v2294_v3 = vsel %vm2246_vm7, %v2245_v14, %v8467_v19  ;;  %v2247_v63 = vsel %vm2246_vm7, %v2244_v13, %v2245_v14  ;;  %v2248_v31 = vsel %vm2246_vm7, %v2243_v12, %v2244_v13  ;;  %2750 = vrot.lane.b32.xlu0 %v7344_v59, %s5747_s7  ;;  %v2517_v14 = vld [vmem:[#allocation3] sm:$0xff]  ;;  %v2518_v13 = vld [vmem:[#allocation3 + $0x8] sm:$0xff] }
 0x288   : > { %v2440_v55 = vmax.f32 %v2392_v18, 0.0  ;;  %v2441_v50 = vmax.f32 %v2393_v23, 0.0  ;;  %v2342_v54 = vadd.f32 %v2294_v3, %v8468_v52  ;;  %v2340_v30 = vadd.f32 %v2248_v31, %v8469_v51  ;;  %v7457_v18 = vld [vmem:[#allocation3 + $0x118] sm:$0xff]  ;;  %v7479_v52 = vld [vmem:[#allocation3 + $0x128] sm:$0xff] }
 0x289   : > { %v2341_v42 = vadd.f32 %v2247_v63, %v8470_v10  ;;  %v2519_v10 = vld [vmem:[#allocation3 + $0x10] sm:$0xff] }
 0x28a   : > { %2489 = vst.msk [vmem:[#allocation3 + $0x170] sm:$0xff] %vm257_vm0, %v2440_v55  ;;  %2490 = vst.msk [vmem:[#allocation3 + $0x178] sm:$0xff] %vm257_vm0, %v2441_v50  ;;  %v2396_v35 = vadd.f32 %v6964_v58, %v2342_v54  ;;  %v2394_v62 = vadd.f32 %v6964_v58, %v2340_v30  ;;  %2940 = vrot.lane.b32.xlu1 %v7369_v16, %s5748_s8  ;;  %v7485_v54 = vld [vmem:[#allocation3 + $0x120] sm:$0xff] }
 0x28b   : > { %2515 = vst.msk [vmem:[#allocation3 + $0x178] sm:$0xff] %vm257_vm0, %v8464_v48  ;;  %v2395_v41 = vadd.f32 %v6964_v58, %v2341_v42  ;;  %2938 = vrot.lane.b32.xlu0 %v7377_v32, %s5748_s8  ;;  %v4845_v58 = vld [vmem:[%s8448_s3 + $0x20] sm:$0xff] }
 0x28c   : > { %v2444_v17 = vmax.f32 %v2396_v35, 0.0  ;;  %v2442_v21 = vmax.f32 %v2394_v62, 0.0  ;;  %v5687_v12 = vpack.c.bf16 %v4846_v0, %v4845_v58  ;;  %v7494_v62 = vld [vmem:[#allocation3 + $0x138] sm:$0xff] }
 0x28d   : > { %v2443_v1 = vmax.f32 %v2395_v41, 0.0 }
 0x28e   : > { %2493 = vst.msk [vmem:[#allocation3 + $0x190] sm:$0xff] %vm257_vm0, %v2444_v17  ;;  %2491 = vst.msk [vmem:[#allocation3 + $0x180] sm:$0xff] %vm257_vm0, %v2442_v21  ;;  %2752 = vrot.lane.b32.xlu1 %v7377_v32, %s5747_s7  ;;  %5689 = vmatprep.subr.msk.bf16.mxu1 %vm5869_vm3, %v5687_v12 }
 0x28f   : > { %2516 = vst.msk [vmem:[#allocation3 + $0x190] sm:$0xff] %vm257_vm0, %v8464_v48  ;;  %2492 = vst.msk [vmem:[#allocation3 + $0x188] sm:$0xff] %vm257_vm0, %v2443_v1  ;;  %2754 = vrot.lane.b32.xlu0 %v7369_v16, %s5747_s7  ;;  %v7407_v48 = vld [vmem:[#allocation3 + $0xd0] sm:$0xff] }
 0x290   : > { %v7510_v1 = vld [vmem:[#allocation3 + $0x130] sm:$0xff] }
 0x292   : > { %2944 = vrot.lane.b32.xlu1 %v7399_v20, %s5748_s8 }
 0x293   : > { %2758 = vrot.lane.b32.xlu0 %v7399_v20, %s5747_s7 }
 0x296   : > { %2756 = vrot.lane.b32.xlu1 %v7407_v48, %s5747_s7 }
 0x297   : > { %2942 = vrot.lane.b32.xlu0 %v7407_v48, %s5748_s8 }
 0x29a   : > { %2760 = vrot.lane.b32.xlu1 %v7413_v25, %s5747_s7 }
 0x29b   : > { %2946 = vrot.lane.b32.xlu0 %v7413_v25, %s5748_s8 }
 0x29e   : > { %2948 = vrot.lane.b32.xlu1 %v7419_v45, %s5748_s8 }
 0x29f   : > { %2762 = vrot.lane.b32.xlu0 %v7419_v45, %s5747_s7 }
 0x2a2   : > { %2952 = vrot.lane.b32.xlu1 %v7425_v56, %s5748_s8 }
 0x2a3   : > { %2950 = vrot.lane.b32.xlu0 %v7429_v44, %s5748_s8 }
 0x2a6   : > { %2764 = vrot.lane.b32.xlu1 %v7429_v44, %s5747_s7 }
 0x2a7   : > { %2766 = vrot.lane.b32.xlu0 %v7425_v56, %s5747_s7 }
 0x2aa   : > { %2956 = vrot.lane.b32.xlu1 %v7437_v28, %s5748_s8 }
 0x2ab   : > { %2770 = vrot.lane.b32.xlu0 %v7437_v28, %s5747_s7 }
 0x2ac   : > { %v2711_v60 = vpop.permute.xlu0 %2710 }
 0x2ad   : > { %v3046_v36 = vsel %vm257_vm0, %v2517_v14, %v2711_v60  ;;  %v7540_v14 = vld [vmem:[#allocation3 + $0x140] sm:$0xff] }
 0x2ae   : > { %2768 = vrot.lane.b32.xlu1 %v7445_v49, %s5747_s7 }
 0x2af   : > { %2954 = vrot.lane.b32.xlu0 %v7445_v49, %s5748_s8 }
 0x2b0   : > { %v2713_v34 = vpop.permute.xlu1 %2712 }
 0x2b1   : > { %v2715_v46 = vpop.permute.xlu0 %2714  ;;  %v3047_v3 = vsel %vm257_vm0, %v2518_v13, %v2713_v34  ;;  %v7546_v13 = vld [vmem:[#allocation3 + $0x148] sm:$0xff] }
 0x2b2   : > { %2772 = vrot.lane.b32.xlu1 %v7451_v9, %s5747_s7  ;;  %v3048_v6 = vsel %vm257_vm0, %v2519_v10, %v2715_v46 }
 0x2b3   : > { %2958 = vrot.lane.b32.xlu0 %v7451_v9, %s5748_s8 }
 0x2b4   : > { %v2905_v23 = vpop.permute.xlu1 %2904 }
 0x2b5   : > { %v2903_v19 = vpop.permute.xlu0 %2902  ;;  %v7467_v31 = vsel %vm923_vm5, %v3047_v3, %v2905_v23 }
 0x2b6   : > { %v7462_v63 = vsel %vm923_vm5, %v3046_v36, %v2903_v19  ;;  %2960 = vrot.lane.b32.xlu1 %v7457_v18, %s5748_s8 }
 0x2b7   : > { %5433 = vmatprep.mubr.msk.f32.mxu1 %vm975_vm4, %v7462_v63  ;;  %5509 = vmatprep.mubr.msk.f32.mxu0 %vm975_vm4, %v7462_v63 }
 0x2b8   : > { %2774 = vrot.lane.b32.xlu0 %v7457_v18, %s5747_s7  ;;  %5434 = vmatmul.mubr.msk.f32.vlgmr.msra.gmra.mrb[48].mxu1 %vm975_vm4, %v7467_v31  ;;  %v2717_v55 = vpop.permute.xlu1 %2716 }
 0x2b9   : > { %5510 = vmatmul.mubr.msk.f32.vlgmr.msra.gmra.mrb[96].mxu0 %vm975_vm4, %v7467_v31  ;;  %v2719_v50 = vpop.permute.xlu0 %2718  ;;  %5692 = vmatpush3.bf16.msk.msra.mxu1 %vm5869_vm3, %v5687_v12  ;;  %v3049_v41 = vsel %vm257_vm0, %v7018_v37, %v2717_v55 }
 0x2ba   : > { %2964 = vrot.lane.b32.xlu1 %v7479_v52, %s5748_s8  ;;  %v3050_v58 = vsel %vm257_vm0, %v7032_v57, %v2719_v50  ;;  %v7570_v50 = vld [vmem:[#allocation3 + $0x158] sm:$0xff] }
 0x2bc   : > { %2962 = vrot.lane.b32.xlu0 %v7485_v54, %s5748_s8  ;;  %v2909_v51 = vpop.permute.xlu1 %2908 }
 0x2bd   : > { %v2723_v30 = vpop.permute.xlu0 %2722  ;;  %v7504_v21 = vsel %vm923_vm5, %v3049_v41, %v2909_v51  ;;  %v7574_v51 = vld [vmem:[#allocation3 + $0x150] sm:$0xff] }
 0x2be   : > { %2776 = vrot.lane.b32.xlu1 %v7485_v54, %s5747_s7  ;;  %v3052_v23 = vsel %vm257_vm0, %v7054_v26, %v2723_v30 }
 0x2c0   : > { %2778 = vrot.lane.b32.xlu0 %v7479_v52, %s5747_s7  ;;  %v2721_v42 = vpop.permute.xlu1 %2720 }
 0x2c1   : > { %v2907_v35 = vpop.permute.xlu0 %2906  ;;  %v3051_v60 = vsel %vm257_vm0, %v7040_v5, %v2721_v42 }
 0x2c2   : > { %v7499_v17 = vsel %vm923_vm5, %v3048_v6, %v2907_v35  ;;  %2968 = vrot.lane.b32.xlu1 %v7494_v62, %s5748_s8 }
 0x2c3   : > { %5436 = vmatprep.mubr.msk.f32.mxu1 %vm975_vm4, %v7499_v17  ;;  %5512 = vmatprep.mubr.msk.f32.mxu0 %vm975_vm4, %v7499_v17 }
 0x2c4   : > { %2782 = vrot.lane.b32.xlu0 %v7494_v62, %s5747_s7  ;;  %5437 = vmatmul.mubr.msk.f32.gmra.mrb[50].mxu1 %vm975_vm4, %v7504_v21  ;;  %v2725_v37 = vpop.permute.xlu1 %2724 }
 0x2c5   : > { %5513 = vmatmul.mubr.msk.f32.gmra.mrb[98].mxu0 %vm975_vm4, %v7504_v21  ;;  %v2911_v0 = vpop.permute.xlu0 %2910  ;;  %v3053_v3 = vsel %vm257_vm0, %v7052_v61, %v2725_v37  ;;  %v7587_v37 = vld [vmem:[#allocation3 + $0x168] sm:$0xff] }
 0x2c6   : > { %v7521_v12 = vsel %vm923_vm5, %v3050_v58, %v2911_v0  ;;  %2780 = vrot.lane.b32.xlu1 %v7510_v1, %s5747_s7 }
 0x2c7   : > { %5439 = vmatprep.mubr.msk.f32.mxu1 %vm975_vm4, %v7521_v12  ;;  %5515 = vmatprep.mubr.msk.f32.mxu0 %vm975_vm4, %v7521_v12 }
 0x2c8   : > { %2966 = vrot.lane.b32.xlu0 %v7510_v1, %s5748_s8  ;;  %v2913_v57 = vpop.permute.xlu1 %2912 }
 0x2c9   : > { %v7534_v34 = vsel %vm923_vm5, %v3051_v60, %v2913_v57  ;;  %v2727_v46 = vpop.permute.xlu0 %2726  ;;  %v7602_v60 = vld [vmem:[#allocation3 + $0x160] sm:$0xff] }
 0x2ca   : > { %5440 = vmatmul.mubr.msk.f32.gmra.mrb[52].mxu1 %vm975_vm4, %v7534_v34  ;;  %5516 = vmatmul.mubr.msk.f32.gmra.mrb[100].mxu0 %vm975_vm4, %v7534_v34  ;;  %v3054_v6 = vsel %vm257_vm0, %v7102_v47, %v2727_v46 }
 0x2cb   : > { %2784 = vrot.lane.b32.xlu1 %v7540_v14, %s5747_s7 }
 0x2cc   : > { %2970 = vrot.lane.b32.xlu0 %v7540_v14, %s5748_s8  ;;  %v2917_v5 = vpop.permute.xlu1 %2916 }
 0x2cd   : > { %v2915_v36 = vpop.permute.xlu0 %2914  ;;  %v7560_v55 = vsel %vm923_vm5, %v3053_v3, %v2917_v5  ;;  %v7630_v3 = vld [vmem:[#allocation3 + $0x170] sm:$0xff] }
 0x2ce   : > { %v7551_v19 = vsel %vm923_vm5, %v3052_v23, %v2915_v36 }
 0x2cf   : > { %2972 = vrot.lane.b32.xlu1 %v7546_v13, %s5748_s8  ;;  %5442 = vmatprep.mubr.msk.f32.mxu1 %vm975_vm4, %v7551_v19 }
 0x2d0   : > { %5518 = vmatprep.mubr.msk.f32.mxu0 %vm975_vm4, %v7551_v19  ;;  %2786 = vrot.lane.b32.xlu0 %v7546_v13, %s5747_s7  ;;  %v2729_v26 = vpop.permute.xlu1 %2728 }
 0x2d1   : > { %5443 = vmatmul.mubr.msk.f32.gmra.mrb[54].mxu1 %vm975_vm4, %v7560_v55  ;;  %5519 = vmatmul.mubr.msk.f32.gmra.mrb[102].mxu0 %vm975_vm4, %v7560_v55  ;;  %v2731_v61 = vpop.permute.xlu0 %2730  ;;  %v3055_v58 = vsel %vm257_vm0, %v7086_v40, %v2729_v26  ;;  %v7636_v26 = vld [vmem:[#allocation3 + $0x178] sm:$0xff] }
 0x2d2   : > { %v3056_v40 = vsel %vm257_vm0, %v7122_v38, %v2731_v61 }
 0x2d3   : > { %2976 = vrot.lane.b32.xlu1 %v7570_v50, %s5748_s8 }
 0x2d4   : > { %2974 = vrot.lane.b32.xlu0 %v7574_v51, %s5748_s8  ;;  %v2921_v30 = vpop.permute.xlu1 %2920 }
 0x2d5   : > { %v2735_v10 = vpop.permute.xlu0 %2734  ;;  %v7596_v0 = vsel %vm923_vm5, %v3055_v58, %v2921_v30  ;;  %v2656_v58 = vld [vmem:[#allocation3 + $0x180] sm:$0xff] }
 0x2d6   : > { %v3058_v61 = vsel %vm257_vm0, %v7164_v53, %v2735_v10  ;;  %v2657_v10 = vld [vmem:[#allocation3 + $0x188] sm:$0xff] }
 0x2d7   : > { %2788 = vrot.lane.b32.xlu1 %v7574_v51, %s5747_s7 }
 0x2d8   : > { %2790 = vrot.lane.b32.xlu0 %v7570_v50, %s5747_s7  ;;  %v2733_v42 = vpop.permute.xlu1 %2732 }
 0x2d9   : > { %v2919_v35 = vpop.permute.xlu0 %2918  ;;  %v3057_v5 = vsel %vm257_vm0, %v7136_v4, %v2733_v42 }
 0x2da   : > { %v7585_v41 = vsel %vm923_vm5, %v3054_v6, %v2919_v35 }
 0x2db   : > { %2980 = vrot.lane.b32.xlu1 %v7587_v37, %s5748_s8  ;;  %5445 = vmatprep.mubr.msk.f32.mxu1 %vm975_vm4, %v7585_v41 }
 0x2dc   : > { %5521 = vmatprep.mubr.msk.f32.mxu0 %vm975_vm4, %v7585_v41  ;;  %2794 = vrot.lane.b32.xlu0 %v7587_v37, %s5747_s7  ;;  %v2737_v47 = vpop.permute.xlu1 %2736 }
 0x2dd   : > { %5446 = vmatmul.mubr.msk.f32.gmra.mrb[56].mxu1 %vm975_vm4, %v7596_v0  ;;  %5522 = vmatmul.mubr.msk.f32.gmra.mrb[104].mxu0 %vm975_vm4, %v7596_v0  ;;  %v2923_v57 = vpop.permute.xlu0 %2922  ;;  %v3059_v6 = vsel %vm257_vm0, %v7156_v7, %v2737_v47 }
 0x2de   : > { %v7611_v46 = vsel %vm923_vm5, %v3056_v40, %v2923_v57  ;;  %v2658_v57 = vld [vmem:[#allocation3 + $0x190] sm:$0xff] }
 0x2df   : > { %2792 = vrot.lane.b32.xlu1 %v7602_v60, %s5747_s7  ;;  %5448 = vmatprep.mubr.msk.f32.mxu1 %vm975_vm4, %v7611_v46 }
 0x2e0   : > { %5524 = vmatprep.mubr.msk.f32.mxu0 %vm975_vm4, %v7611_v46  ;;  %2978 = vrot.lane.b32.xlu0 %v7602_v60, %s5748_s8  ;;  %v2925_v38 = vpop.permute.xlu1 %2924 }
 0x2e1   : > { %v7624_v23 = vsel %vm923_vm5, %v3057_v5, %v2925_v38  ;;  %v2739_v36 = vpop.permute.xlu0 %2738 }
 0x2e2   : > { %5449 = vmatmul.mubr.msk.f32.gmra.mrb[58].mxu1 %vm975_vm4, %v7624_v23  ;;  %5525 = vmatmul.mubr.msk.f32.gmra.mrb[106].mxu0 %vm975_vm4, %v7624_v23  ;;  %v3060_v38 = vsel %vm257_vm0, %v7206_v15, %v2739_v36  ;;  %v2661_v36 = vld [vmem:[#allocation3 + $0x1a8] sm:$0xff] }
 0x2e3   : > { %2796 = vrot.lane.b32.xlu1 %v7630_v3, %s5747_s7 }
 0x2e4   : > { %2982 = vrot.lane.b32.xlu0 %v7630_v3, %s5748_s8  ;;  %v2929_v4 = vpop.permute.xlu1 %2928 }
 0x2e5   : > { %v2927_v30 = vpop.permute.xlu0 %2926  ;;  %v7650_v35 = vsel %vm923_vm5, %v3059_v6, %v2929_v4 }
 0x2e6   : > { %v7641_v42 = vsel %vm923_vm5, %v3058_v61, %v2927_v30 }
 0x2e7   : > { %2984 = vrot.lane.b32.xlu1 %v7636_v26, %s5748_s8  ;;  %5451 = vmatprep.mubr.msk.f32.mxu1 %vm975_vm4, %v7641_v42 }
 0x2e8   : > { %5527 = vmatprep.mubr.msk.f32.mxu0 %vm975_vm4, %v7641_v42  ;;  %2798 = vrot.lane.b32.xlu0 %v7636_v26, %s5747_s7  ;;  %v2741_v53 = vpop.permute.xlu1 %2740 }
 0x2e9   : > { %5452 = vmatmul.mubr.msk.f32.gmra.mrb[60].mxu1 %vm975_vm4, %v7650_v35  ;;  %5528 = vmatmul.mubr.msk.f32.gmra.mrb[108].mxu0 %vm975_vm4, %v7650_v35  ;;  %v2743_v7 = vpop.permute.xlu0 %2742  ;;  %v3061_v30 = vsel %vm257_vm0, %v7190_v27, %v2741_v53  ;;  %v2660_v53 = vld [vmem:[#allocation3 + $0x1a0] sm:$0xff] }
 0x2eb   : > { %2988 = vrot.lane.b32.xlu1 %v2657_v10, %s5748_s8 }
 0x2ec   : > { %2986 = vrot.lane.b32.xlu0 %v2656_v58, %s5748_s8  ;;  %v2933_v47 = vpop.permute.xlu1 %2932 }
 0x2ed   : > { %v2747_v40 = vpop.permute.xlu0 %2746  ;;  %v7675_v6 = vsel %vm923_vm5, %v3061_v30, %v2933_v47 }
 0x2ef   : > { %2800 = vrot.lane.b32.xlu1 %v2656_v58, %s5747_s7  ;;  %v3062_v58 = vsel %vm257_vm0, %v7226_v29, %v2743_v7 }
 0x2f0   : > { %2990 = vrot.lane.b32.xlu0 %v2658_v57, %s5748_s8  ;;  %v2745_v5 = vpop.permute.xlu1 %2744 }
 0x2f1   : > { %v2931_v4 = vpop.permute.xlu0 %2930 }
 0x2f2   : > { %v7667_v61 = vsel %vm923_vm5, %v3060_v38, %v2931_v4 }
 0x2f3   : > { %2804 = vrot.lane.b32.xlu1 %v2658_v57, %s5747_s7  ;;  %5454 = vmatprep.mubr.msk.f32.mxu1 %vm975_vm4, %v7667_v61 }
 0x2f4   : > { %5530 = vmatprep.mubr.msk.f32.mxu0 %vm975_vm4, %v7667_v61  ;;  %2802 = vrot.lane.b32.xlu0 %v2657_v10, %s5747_s7  ;;  %v2749_v15 = vpop.permute.xlu1 %2748  ;;  %v3063_v10 = vsel %vm257_vm0, %v7240_v33, %v2745_v5  ;;  %v3064_v33 = vsel %vm257_vm0, %v7268_v43, %v2747_v40 }
 0x2f5   : > { %5455 = vmatmul.mubr.msk.f32.gmra.mrb[62].mxu1 %vm975_vm4, %v7675_v6  ;;  %5531 = vmatmul.mubr.msk.f32.gmra.mrb[110].mxu0 %vm975_vm4, %v7675_v6  ;;  %v2935_v27 = vpop.permute.xlu0 %2934  ;;  %v3065_v4 = vsel %vm257_vm0, %v7260_v11, %v2749_v15 }
 0x2f6   : > { %v7687_v47 = vsel %vm923_vm5, %v3062_v58, %v2935_v27 }
 0x2f7   : > { %2996 = vrot.lane.b32.xlu1 %v2661_v36, %s5748_s8  ;;  %5457 = vmatprep.mubr.msk.f32.mxu1 %vm975_vm4, %v7687_v47 }
 0x2f8   : > { %5533 = vmatprep.mubr.msk.f32.mxu0 %vm975_vm4, %v7687_v47  ;;  %2994 = vrot.lane.b32.xlu0 %v2660_v53, %s5748_s8  ;;  %v2937_v29 = vpop.permute.xlu1 %2936 }
 0x2f9   : > { %v7698_v7 = vsel %vm923_vm5, %v3063_v10, %v2937_v29  ;;  %v2751_v57 = vpop.permute.xlu0 %2750 }
 0x2fa   : > { %5458 = vmatmul.mubr.msk.f32.gmra.mrb[64].mxu1 %vm975_vm4, %v7698_v7  ;;  %5534 = vmatmul.mubr.msk.f32.gmra.mrb[112].mxu0 %vm975_vm4, %v7698_v7  ;;  %v3066_v27 = vsel %vm257_vm0, %v7310_v24, %v2751_v57 }
 0x2fc   : > { %v2941_v38 = vpop.permute.xlu1 %2940 }
 0x2fd   : > { %v2939_v5 = vpop.permute.xlu0 %2938  ;;  %v7712_v36 = vsel %vm923_vm5, %v3065_v4, %v2941_v38 }
 0x2fe   : > { %v7709_v30 = vsel %vm923_vm5, %v3064_v33, %v2939_v5 }
 0x2ff   : > { %5460 = vmatprep.mubr.msk.f32.mxu1 %vm975_vm4, %v7709_v30  ;;  %5536 = vmatprep.mubr.msk.f32.mxu0 %vm975_vm4, %v7709_v30 }
 0x300   : > { %5461 = vmatmul.mubr.msk.f32.gmra.mrb[66].mxu1 %vm975_vm4, %v7712_v36  ;;  %5537 = vmatmul.mubr.msk.f32.gmra.mrb[114].mxu0 %vm975_vm4, %v7712_v36  ;;  %v2753_v43 = vpop.permute.xlu1 %2752 }
 0x301   : > { %v2755_v11 = vpop.permute.xlu0 %2754  ;;  %v3067_v10 = vsel %vm257_vm0, %v7294_v22, %v2753_v43 }
 0x302   : > { %v3068_v22 = vsel %vm257_vm0, %v7330_v39, %v2755_v11 }
 0x304   : > { %v2945_v40 = vpop.permute.xlu1 %2944 }
 0x305   : > { %v2759_v15 = vpop.permute.xlu0 %2758  ;;  %v7730_v38 = vsel %vm923_vm5, %v3067_v10, %v2945_v40 }
 0x306   : > { %v3070_v11 = vsel %vm257_vm0, %v7377_v32, %v2759_v15 }
 0x308   : > { %v2757_v58 = vpop.permute.xlu1 %2756 }
 0x309   : > { %v2943_v53 = vpop.permute.xlu0 %2942  ;;  %v3069_v5 = vsel %vm257_vm0, %v7344_v59, %v2757_v58 }
 0x30a   : > { %v7727_v29 = vsel %vm923_vm5, %v3066_v27, %v2943_v53 }
 0x30b   : > { %5463 = vmatprep.mubr.msk.f32.mxu1 %vm975_vm4, %v7727_v29  ;;  %5539 = vmatprep.mubr.msk.f32.mxu0 %vm975_vm4, %v7727_v29 }
 0x30c   : > { %5464 = vmatmul.mubr.msk.f32.gmra.mrb[68].mxu1 %vm975_vm4, %v7730_v38  ;;  %5540 = vmatmul.mubr.msk.f32.gmra.mrb[116].mxu0 %vm975_vm4, %v7730_v38  ;;  %v2761_v24 = vpop.permute.xlu1 %2760 }
 0x30d   : > { %v2947_v57 = vpop.permute.xlu0 %2946  ;;  %v3071_v53 = vsel %vm257_vm0, %v7369_v16, %v2761_v24 }
 0x30e   : > { %v7743_v33 = vsel %vm923_vm5, %v3068_v22, %v2947_v57 }
 0x30f   : > { %5466 = vmatprep.mubr.msk.f32.mxu1 %vm975_vm4, %v7743_v33  ;;  %5542 = vmatprep.mubr.msk.f32.mxu0 %vm975_vm4, %v7743_v33 }
 0x310   : > { %v2949_v4 = vpop.permute.xlu1 %2948 }
 0x311   : > { %v7752_v43 = vsel %vm923_vm5, %v3069_v5, %v2949_v4  ;;  %v2763_v40 = vpop.permute.xlu0 %2762 }
 0x312   : > { %5467 = vmatmul.mubr.msk.f32.gmra.mrb[70].mxu1 %vm975_vm4, %v7752_v43  ;;  %5543 = vmatmul.mubr.msk.f32.gmra.mrb[118].mxu0 %vm975_vm4, %v7752_v43  ;;  %v3072_v22 = vsel %vm257_vm0, %v7407_v48, %v2763_v40 }
 0x314   : > { %v2953_v39 = vpop.permute.xlu1 %2952 }
 0x315   : > { %v2951_v27 = vpop.permute.xlu0 %2950  ;;  %v7766_v58 = vsel %vm923_vm5, %v3071_v53, %v2953_v39 }
 0x316   : > { %v7763_v59 = vsel %vm923_vm5, %v3070_v11, %v2951_v27 }
 0x317   : > { %5469 = vmatprep.mubr.msk.f32.mxu1 %vm975_vm4, %v7763_v59  ;;  %5545 = vmatprep.mubr.msk.f32.mxu0 %vm975_vm4, %v7763_v59 }
 0x318   : > { %5470 = vmatmul.mubr.msk.f32.gmra.mrb[72].mxu1 %vm975_vm4, %v7766_v58  ;;  %5546 = vmatmul.mubr.msk.f32.gmra.mrb[120].mxu0 %vm975_vm4, %v7766_v58  ;;  %v2765_v32 = vpop.permute.xlu1 %2764 }
 0x319   : > { %v2767_v16 = vpop.permute.xlu0 %2766  ;;  %v3073_v5 = vsel %vm257_vm0, %v7399_v20, %v2765_v32 }
 0x31a   : > { %v3074_v20 = vsel %vm257_vm0, %v7413_v25, %v2767_v16 }
 0x31c   : > { %v2957_v15 = vpop.permute.xlu1 %2956 }
 0x31d   : > { %v2771_v10 = vpop.permute.xlu0 %2770  ;;  %v7784_v39 = vsel %vm923_vm5, %v3073_v5, %v2957_v15 }
 0x31e   : > { %v3076_v16 = vsel %vm257_vm0, %v7429_v44, %v2771_v10 }
 0x320   : > { %v2769_v24 = vpop.permute.xlu1 %2768 }
 0x321   : > { %v2955_v57 = vpop.permute.xlu0 %2954  ;;  %v3075_v27 = vsel %vm257_vm0, %v7419_v45, %v2769_v24 }
 0x322   : > { %v7781_v4 = vsel %vm923_vm5, %v3072_v22, %v2955_v57 }
 0x323   : > { %5472 = vmatprep.mubr.msk.f32.mxu1 %vm975_vm4, %v7781_v4  ;;  %5548 = vmatprep.mubr.msk.f32.mxu0 %vm975_vm4, %v7781_v4 }
 0x324   : > { %5473 = vmatmul.mubr.msk.f32.gmra.mrb[74].mxu1 %vm975_vm4, %v7784_v39  ;;  %5549 = vmatmul.mubr.msk.f32.gmra.mrb[122].mxu0 %vm975_vm4, %v7784_v39  ;;  %v2773_v48 = vpop.permute.xlu1 %2772 }
 0x325   : > { %v2959_v40 = vpop.permute.xlu0 %2958  ;;  %v3077_v57 = vsel %vm257_vm0, %v7425_v56, %v2773_v48 }
 0x326   : > { %v7797_v11 = vsel %vm923_vm5, %v3074_v20, %v2959_v40 }
 0x327   : > { %5475 = vmatprep.mubr.msk.f32.mxu1 %vm975_vm4, %v7797_v11  ;;  %5551 = vmatprep.mubr.msk.f32.mxu0 %vm975_vm4, %v7797_v11 }
 0x328   : > { %v2961_v53 = vpop.permute.xlu1 %2960 }
 0x329   : > { %v7806_v32 = vsel %vm923_vm5, %v3075_v27, %v2961_v53 }
 0x32a   : > { %v2775_v15 = vpop.permute.xlu0 %2774  ;;  %5476 = vmatmul.mubr.msk.f32.gmra.mrb[76].mxu1 %vm975_vm4, %v7806_v32  ;;  %5552 = vmatmul.mubr.msk.f32.gmra.mrb[124].mxu0 %vm975_vm4, %v7806_v32 }
 0x32b   : > { %v3078_v20 = vsel %vm257_vm0, %v7445_v49, %v2775_v15 }
 0x32c   : > { %v2965_v25 = vpop.permute.xlu1 %2964 }
 0x32d   : > { %v7820_v24 = vsel %vm923_vm5, %v3077_v57, %v2965_v25 }
 0x32e   : > { %v2963_v22 = vpop.permute.xlu0 %2962 }
 0x32f   : > { %v7817_v45 = vsel %vm923_vm5, %v3076_v16, %v2963_v22 }
 0x330   : > { %5478 = vmatprep.mubr.msk.f32.mxu1 %vm975_vm4, %v7817_v45  ;;  %5554 = vmatprep.mubr.msk.f32.mxu0 %vm975_vm4, %v7817_v45  ;;  %v2777_v5 = vpop.permute.xlu1 %2776 }
 0x331   : > { %5479 = vmatmul.mubr.msk.f32.gmra.mrb[78].mxu1 %vm975_vm4, %v7820_v24  ;;  %5555 = vmatmul.mubr.msk.f32.gmra.mrb[126].mxu0 %vm975_vm4, %v7820_v24  ;;  %v3079_v27 = vsel %vm257_vm0, %v7437_v28, %v2777_v5 }
 0x332   : > { %v2779_v56 = vpop.permute.xlu0 %2778 }
 0x333   : > { %v3080_v28 = vsel %vm257_vm0, %v7451_v9, %v2779_v56 }
 0x334   : > { %v2969_v44 = vpop.permute.xlu1 %2968 }
 0x335   : > { %v7838_v25 = vsel %vm923_vm5, %v3079_v27, %v2969_v44 }
 0x336   : > { %v2783_v10 = vpop.permute.xlu0 %2782 }
 0x337   : > { %v3082_v56 = vsel %vm257_vm0, %v7485_v54, %v2783_v10 }
 0x338   : > { %v2781_v48 = vpop.permute.xlu1 %2780 }
 0x339   : > { %v3081_v22 = vsel %vm257_vm0, %v7457_v18, %v2781_v48 }
 0x33a   : > { %v2967_v40 = vpop.permute.xlu0 %2966 }
 0x33b   : > { %v7835_v53 = vsel %vm923_vm5, %v3078_v20, %v2967_v40 }
 0x33c   : > { %5481 = vmatprep.mubr.msk.f32.mxu1 %vm975_vm4, %v7835_v53  ;;  %5557 = vmatprep.mubr.msk.f32.mxu0 %vm975_vm4, %v7835_v53 }
 0x33d   : > { %5482 = vmatmul.mubr.msk.f32.gmra.mrb[80].mxu1 %vm975_vm4, %v7838_v25  ;;  %5558 = vmatmul.mubr.msk.f32.gmra.mrb[128].mxu0 %vm975_vm4, %v7838_v25  ;;  %v2785_v49 = vpop.permute.xlu1 %2784 }
 0x33e   : > { %v2971_v15 = vpop.permute.xlu0 %2970  ;;  %v3083_v40 = vsel %vm257_vm0, %v7479_v52, %v2785_v49 }
 0x33f   : > { %v7851_v16 = vsel %vm923_vm5, %v3080_v28, %v2971_v15 }
 0x340   : > { %5484 = vmatprep.mubr.msk.f32.mxu1 %vm975_vm4, %v7851_v16  ;;  %5560 = vmatprep.mubr.msk.f32.mxu0 %vm975_vm4, %v7851_v16 }
 0x341   : > { %v2973_v57 = vpop.permute.xlu1 %2972 }
 0x342   : > { %v7860_v5 = vsel %vm923_vm5, %v3081_v22, %v2973_v57  ;;  %v2787_v44 = vpop.permute.xlu0 %2786 }
 0x343   : > { %5485 = vmatmul.mubr.msk.f32.gmra.mrb[82].mxu1 %vm975_vm4, %v7860_v5  ;;  %5561 = vmatmul.mubr.msk.f32.gmra.mrb[130].mxu0 %vm975_vm4, %v7860_v5  ;;  %v3084_v28 = vsel %vm257_vm0, %v7510_v1, %v2787_v44 }
 0x345   : > { %v2977_v9 = vpop.permute.xlu1 %2976 }
 0x346   : > { %v2975_v20 = vpop.permute.xlu0 %2974  ;;  %v7874_v48 = vsel %vm923_vm5, %v3083_v40, %v2977_v9 }
 0x347   : > { %v7871_v18 = vsel %vm923_vm5, %v3082_v56, %v2975_v20 }
 0x348   : > { %5487 = vmatprep.mubr.msk.f32.mxu1 %vm975_vm4, %v7871_v18  ;;  %5563 = vmatprep.mubr.msk.f32.mxu0 %vm975_vm4, %v7871_v18 }
 0x349   : > { %5488 = vmatmul.mubr.msk.f32.gmra.mrb[84].mxu1 %vm975_vm4, %v7874_v48  ;;  %5564 = vmatmul.mubr.msk.f32.gmra.mrb[132].mxu0 %vm975_vm4, %v7874_v48  ;;  %v2789_v54 = vpop.permute.xlu1 %2788 }
 0x34a   : > { %v2791_v52 = vpop.permute.xlu0 %2790  ;;  %v3085_v22 = vsel %vm257_vm0, %v7494_v62, %v2789_v54 }
 0x34b   : > { %v3086_v62 = vsel %vm257_vm0, %v7540_v14, %v2791_v52 }
 0x34d   : > { %v2981_v10 = vpop.permute.xlu1 %2980 }
 0x34e   : > { %v2795_v27 = vpop.permute.xlu0 %2794  ;;  %v7892_v9 = vsel %vm923_vm5, %v3085_v22, %v2981_v10 }
 0x34f   : > { %v3088_v52 = vsel %vm257_vm0, %v7574_v51, %v2795_v27 }
 0x351   : > { %v2793_v49 = vpop.permute.xlu1 %2792 }
 0x352   : > { %v2979_v15 = vpop.permute.xlu0 %2978  ;;  %v3087_v20 = vsel %vm257_vm0, %v7546_v13, %v2793_v49 }
 0x353   : > { %v7889_v57 = vsel %vm923_vm5, %v3084_v28, %v2979_v15 }
 0x354   : > { %5490 = vmatprep.mubr.msk.f32.mxu1 %vm975_vm4, %v7889_v57  ;;  %5566 = vmatprep.mubr.msk.f32.mxu0 %vm975_vm4, %v7889_v57 }
 0x355   : > { %5491 = vmatmul.mubr.msk.f32.gmra.mrb[86].mxu1 %vm975_vm4, %v7892_v9  ;;  %5567 = vmatmul.mubr.msk.f32.gmra.mrb[134].mxu0 %vm975_vm4, %v7892_v9  ;;  %v2797_v1 = vpop.permute.xlu1 %2796 }
 0x356   : > { %v2983_v44 = vpop.permute.xlu0 %2982  ;;  %v3089_v15 = vsel %vm257_vm0, %v7570_v50, %v2797_v1 }
 0x357   : > { %v7905_v56 = vsel %vm923_vm5, %v3086_v62, %v2983_v44 }
 0x358   : > { %5493 = vmatprep.mubr.msk.f32.mxu1 %vm975_vm4, %v7905_v56  ;;  %5569 = vmatprep.mubr.msk.f32.mxu0 %vm975_vm4, %v7905_v56 }
 0x359   : > { %v2985_v40 = vpop.permute.xlu1 %2984 }
 0x35a   : > { %v7914_v54 = vsel %vm923_vm5, %v3087_v20, %v2985_v40  ;;  %v2799_v10 = vpop.permute.xlu0 %2798 }
 0x35b   : > { %5494 = vmatmul.mubr.msk.f32.gmra.mrb[88].mxu1 %vm975_vm4, %v7914_v54  ;;  %5570 = vmatmul.mubr.msk.f32.gmra.mrb[136].mxu0 %vm975_vm4, %v7914_v54  ;;  %v3090_v50 = vsel %vm257_vm0, %v7602_v60, %v2799_v10 }
 0x35d   : > { %v2989_v14 = vpop.permute.xlu1 %2988 }
 0x35e   : > { %v2987_v28 = vpop.permute.xlu0 %2986  ;;  %v7928_v49 = vsel %vm923_vm5, %v3089_v15, %v2989_v14 }
 0x35f   : > { %v7925_v13 = vsel %vm923_vm5, %v3088_v52, %v2987_v28 }
 0x360   : > { %5496 = vmatprep.mubr.msk.f32.mxu1 %vm975_vm4, %v7925_v13  ;;  %5572 = vmatprep.mubr.msk.f32.mxu0 %vm975_vm4, %v7925_v13 }
 0x361   : > { %5497 = vmatmul.mubr.msk.f32.gmra.mrb[90].mxu1 %vm975_vm4, %v7928_v49  ;;  %5573 = vmatmul.mubr.msk.f32.gmra.mrb[138].mxu0 %vm975_vm4, %v7928_v49  ;;  %v2801_v51 = vpop.permute.xlu1 %2800 }
 0x362   : > { %v3091_v27 = vsel %vm257_vm0, %v7587_v37, %v2801_v51  ;;  %v2991_v22 = vpop.permute.xlu0 %2990 }
 0x363   : > { %v7943_v1 = vsel %vm923_vm5, %v3090_v50, %v2991_v22  ;;  %v7947_v62 = vsel %vm923_vm5, %v3091_v27, %v7441_v2 }
 0x364   : > { %5499 = vmatprep.mubr.msk.f32.mxu1 %vm975_vm4, %v7943_v1  ;;  %5575 = vmatprep.mubr.msk.f32.mxu0 %vm975_vm4, %v7943_v1 }
 0x365   : > { %5500 = vmatmul.mubr.msk.f32.gmra.mrb[92].mxu1 %vm975_vm4, %v7947_v62  ;;  %5576 = vmatmul.mubr.msk.f32.gmra.mrb[140].mxu0 %vm975_vm4, %v7947_v62  ;;  %v2805_v37 = vpop.permute.xlu1 %2804 }
 0x366   : > { %v2803_v60 = vpop.permute.xlu0 %2802  ;;  %v3093_v44 = vsel %vm257_vm0, %v7636_v26, %v2805_v37 }
 0x367   : > { %v3092_v2 = vsel %vm257_vm0, %v7630_v3, %v2803_v60 }
 0x369   : > { %v2997_v20 = vpop.permute.xlu1 %2996 }
 0x36a   : > { %v2995_v40 = vpop.permute.xlu0 %2994  ;;  %v7965_v14 = vsel %vm923_vm5, %v3093_v44, %v2997_v20 }
 0x36b   : > { %v7962_v10 = vsel %vm923_vm5, %v3092_v2, %v2995_v40 }
 0x36c   : > { %5502 = vmatprep.mubr.msk.f32.mxu1 %vm975_vm4, %v7962_v10  ;;  %5578 = vmatprep.mubr.msk.f32.mxu0 %vm975_vm4, %v7962_v10 }
 0x36d   : > { %5503 = vmatmul.mubr.msk.f32.gmra.mrb[94].mxu1 %vm975_vm4, %v7965_v14  ;;  %5579 = vmatmul.mubr.msk.f32.gmra.mrb[142].mxu0 %vm975_vm4, %v7965_v14 }
 0x36e   : > { %5585 = vmatprep.mubr.msk.f32.mxu1 %vm975_vm4, %v7462_v63 }
 0x371   : > { %5586 = vmatmul.mubr.msk.f32.vlgmr.msra.gmra.mrb[96].mxu1 %vm975_vm4, %v7467_v31 }
 0x372   : > { %5588 = vmatprep.mubr.msk.f32.mxu1 %vm975_vm4, %v7499_v17 }
 0x375   : > { %5589 = vmatmul.mubr.msk.f32.gmra.mrb[98].mxu1 %vm975_vm4, %v7504_v21 }
 0x376   : > { %5591 = vmatprep.mubr.msk.f32.mxu1 %vm975_vm4, %v7521_v12 }
 0x379   : > { %5592 = vmatmul.mubr.msk.f32.gmra.mrb[100].mxu1 %vm975_vm4, %v7534_v34 }
 0x37a   : > { %5594 = vmatprep.mubr.msk.f32.mxu1 %vm975_vm4, %v7551_v19 }
 0x37d   : > { %5595 = vmatmul.mubr.msk.f32.gmra.mrb[102].mxu1 %vm975_vm4, %v7560_v55 }
 0x37e   : > { %5597 = vmatprep.mubr.msk.f32.mxu1 %vm975_vm4, %v7585_v41 }
 0x381   : > { %5598 = vmatmul.mubr.msk.f32.gmra.mrb[104].mxu1 %vm975_vm4, %v7596_v0 }
 0x382   : > { %5600 = vmatprep.mubr.msk.f32.mxu1 %vm975_vm4, %v7611_v46 }
 0x385   : > { %5601 = vmatmul.mubr.msk.f32.gmra.mrb[106].mxu1 %vm975_vm4, %v7624_v23 }
 0x386   : > { %5603 = vmatprep.mubr.msk.f32.mxu1 %vm975_vm4, %v7641_v42 }
 0x389   : > { %5604 = vmatmul.mubr.msk.f32.gmra.mrb[108].mxu1 %vm975_vm4, %v7650_v35 }
 0x38a   : > { %5606 = vmatprep.mubr.msk.f32.mxu1 %vm975_vm4, %v7667_v61 }
 0x38b   : > { %v5435_v63 = vpop.f32.mrb[48].mxu1 }
 0x38c   : > { %v4204_v31 = vrot.slane %v5435_v63, 7  ;;  %v5511_v17 = vpop.f32.mrb[96].mxu0  ;;  %v8005_v21 = vpop.f32.mrb[49].mxu1 }
 0x38d   : > { %v4203_v12 = vrot.slane %v8005_v21, 7  ;;  %v8008_v34 = vpop.f32.mrb[97].mxu0  ;;  %5607 = vmatmul.mubr.msk.f32.gmra.mrb[110].mxu1 %vm975_vm4, %v7675_v6  ;;  %v8210_v21 = vld [vmem:[%s8449_s4] ss:$0 sm:$0xff] }
 0x38e   : > { %5609 = vmatprep.mubr.msk.f32.mxu1 %vm975_vm4, %v7687_v47 }
 0x38f   : > { %v4281_v19 = vsel %vm2101_vm6, %v4203_v12, %v4204_v31 }
 0x390   : > { %v8018_v55 = vadd.f32 %v5511_v17, %v4281_v19 }
 0x391   : > { %5610 = vmatmul.mubr.msk.f32.gmra.mrb[112].mxu1 %vm975_vm4, %v7698_v7 }
 0x392   : > { %5612 = vmatprep.mubr.msk.f32.mxu1 %vm975_vm4, %v7709_v30 }
 0x395   : > { %5613 = vmatmul.mubr.msk.f32.gmra.mrb[114].mxu1 %vm975_vm4, %v7712_v36 }
 0x396   : > { %5615 = vmatprep.mubr.msk.f32.mxu1 %vm975_vm4, %v7727_v29 }
 0x397   : > { %v5438_v41 = vpop.f32.mrb[50].mxu1 }
 0x398   : > { %v4206_v0 = vrot.slane %v5438_v41, 7  ;;  %v5514_v46 = vpop.f32.mrb[98].mxu0  ;;  %v3368_v23 = vpop.f32.mrb[51].mxu1 }
 0x399   : > { %v4205_v3 = vrot.slane %v3368_v23, 7  ;;  %v3679_v26 = vpop.f32.mrb[99].mxu0  ;;  %5616 = vmatmul.mubr.msk.f32.gmra.mrb[116].mxu1 %vm975_vm4, %v7730_v38 }
 0x39a   : > { %5618 = vmatprep.mubr.msk.f32.mxu1 %vm975_vm4, %v7743_v33 }
 0x39b   : > { %v4280_v42 = vsel %vm2101_vm6, %v4205_v3, %v4206_v0 }
 0x39c   : > { %v8034_v35 = vadd.f32 %v5514_v46, %v4280_v42 }
 0x39d   : > { %5619 = vmatmul.mubr.msk.f32.gmra.mrb[118].mxu1 %vm975_vm4, %v7752_v43  ;;  %v5441_v61 = vpop.f32.mrb[52].mxu1  ;;  %v5517_v6 = vpop.f32.mrb[100].mxu0 }
 0x39e   : > { %5621 = vmatprep.mubr.msk.f32.mxu1 %vm975_vm4, %v7763_v59  ;;  %v3378_v47 = vpop.f32.mrb[53].mxu1  ;;  %v3688_v7 = vpop.f32.mrb[101].mxu0  ;;  %v4208_v59 = vrot.slane %v5441_v61, 7 }
 0x39f   : > { %v4207_v30 = vrot.slane %v3378_v47, 7 }
 0x3a1   : > { %v4279_v36 = vsel %vm2101_vm6, %v4206_v0, %v4207_v30  ;;  %5622 = vmatmul.mubr.msk.f32.gmra.mrb[120].mxu1 %vm975_vm4, %v7766_v58 }
 0x3a2   : > { %v8044_v29 = vadd.f32 %v4279_v36, %v3688_v7  ;;  %5624 = vmatprep.mubr.msk.f32.mxu1 %vm975_vm4, %v7781_v4 }
 0x3a4   : > { %v5444_v38 = vpop.f32.mrb[54].mxu1  ;;  %v5520_v33 = vpop.f32.mrb[102].mxu0 }
 0x3a5   : > { %v4210_v43 = vrot.slane %v5444_v38, 7  ;;  %v3388_v52 = vpop.f32.mrb[55].mxu1  ;;  %v3697_v28 = vpop.f32.mrb[103].mxu0  ;;  %5625 = vmatmul.mubr.msk.f32.gmra.mrb[122].mxu1 %vm975_vm4, %v7784_v39 }
 0x3a6   : > { %v4209_v15 = vrot.slane %v3388_v52, 7  ;;  %5627 = vmatprep.mubr.msk.f32.mxu1 %vm975_vm4, %v7797_v11 }
 0x3a8   : > { %v4277_v58 = vsel %vm2101_vm6, %v4209_v15, %v4210_v43  ;;  %v4278_v51 = vsel %vm2101_vm6, %v4208_v59, %v4209_v15 }
 0x3a9   : > { %v8056_v4 = vadd.f32 %v5520_v33, %v4277_v58  ;;  %v8058_v50 = vadd.f32 %v4278_v51, %v3697_v28  ;;  %5628 = vmatmul.mubr.msk.f32.gmra.mrb[124].mxu1 %vm975_vm4, %v7806_v32 }
 0x3aa   : > { %5630 = vmatprep.mubr.msk.f32.mxu1 %vm975_vm4, %v7817_v45 }
 0x3ad   : > { %5631 = vmatmul.mubr.msk.f32.gmra.mrb[126].mxu1 %vm975_vm4, %v7820_v24 }
 0x3ae   : > { %5633 = vmatprep.mubr.msk.f32.mxu1 %vm975_vm4, %v7835_v53 }
 0x3b0   : > { %v5447_v39 = vpop.f32.mrb[56].mxu1  ;;  %v5523_v11 = vpop.f32.mrb[104].mxu0 }
 0x3b1   : > { %v4212_v27 = vrot.slane %v5447_v39, 7  ;;  %v3398_v22 = vpop.f32.mrb[57].mxu1  ;;  %v3707_v37 = vpop.f32.mrb[105].mxu0  ;;  %5634 = vmatmul.mubr.msk.f32.gmra.mrb[128].mxu1 %vm975_vm4, %v7838_v25 }
 0x3b2   : > { %v4211_v60 = vrot.slane %v3398_v22, 7  ;;  %5636 = vmatprep.mubr.msk.f32.mxu1 %vm975_vm4, %v7851_v16 }
 0x3b4   : > { %v4276_v32 = vsel %vm2101_vm6, %v4211_v60, %v4212_v27 }
 0x3b5   : > { %v8074_v45 = vadd.f32 %v5523_v11, %v4276_v32  ;;  %5637 = vmatmul.mubr.msk.f32.gmra.mrb[130].mxu1 %vm975_vm4, %v7860_v5  ;;  %v5450_v24 = vpop.f32.mrb[58].mxu1  ;;  %v5526_v53 = vpop.f32.mrb[106].mxu0 }
 0x3b6   : > { %5639 = vmatprep.mubr.msk.f32.mxu1 %vm975_vm4, %v7871_v18  ;;  %v3408_v44 = vpop.f32.mrb[59].mxu1  ;;  %v3716_v20 = vpop.f32.mrb[107].mxu0  ;;  %v4214_v18 = vrot.slane %v5450_v24, 7 }
 0x3b7   : > { %v4213_v25 = vrot.slane %v3408_v44, 7 }
 0x3b9   : > { %v4275_v2 = vsel %vm2101_vm6, %v4212_v27, %v4213_v25  ;;  %5640 = vmatmul.mubr.msk.f32.gmra.mrb[132].mxu1 %vm975_vm4, %v7874_v48 }
 0x3ba   : > { %v8084_v16 = vadd.f32 %v4275_v2, %v3716_v20  ;;  %5642 = vmatprep.mubr.msk.f32.mxu1 %vm975_vm4, %v7889_v57 }
 0x3bc   : > { %v5453_v5 = vpop.f32.mrb[60].mxu1  ;;  %v5529_v40 = vpop.f32.mrb[108].mxu0 }
 0x3bd   : > { %v4216_v63 = vrot.slane %v5453_v5, 7  ;;  %v3418_v31 = vpop.f32.mrb[61].mxu1  ;;  %v3725_v17 = vpop.f32.mrb[109].mxu0  ;;  %5643 = vmatmul.mubr.msk.f32.gmra.mrb[134].mxu1 %vm975_vm4, %v7892_v9 }
 0x3be   : > { %v4215_v19 = vrot.slane %v3418_v31, 7  ;;  %5645 = vmatprep.mubr.msk.f32.mxu1 %vm975_vm4, %v7905_v56 }
 0x3c0   : > { %v4273_v48 = vsel %vm2101_vm6, %v4215_v19, %v4216_v63  ;;  %v4274_v41 = vsel %vm2101_vm6, %v4214_v18, %v4215_v19 }
 0x3c1   : > { %v8096_v57 = vadd.f32 %v5529_v40, %v4273_v48  ;;  %v8098_v0 = vadd.f32 %v4274_v41, %v3725_v17  ;;  %5646 = vmatmul.mubr.msk.f32.gmra.mrb[136].mxu1 %vm975_vm4, %v7914_v54 }
 0x3c2   : > { %5648 = vmatprep.mubr.msk.f32.mxu1 %vm975_vm4, %v7925_v13 }
 0x3c5   : > { %5649 = vmatmul.mubr.msk.f32.gmra.mrb[138].mxu1 %vm975_vm4, %v7928_v49 }
 0x3c6   : > { %5651 = vmatprep.mubr.msk.f32.mxu1 %vm975_vm4, %v7943_v1 }
 0x3c8   : > { %v5456_v9 = vpop.f32.mrb[62].mxu1  ;;  %v5532_v56 = vpop.f32.mrb[110].mxu0 }
 0x3c9   : > { %v4218_v46 = vrot.slane %v5456_v9, 7  ;;  %v3428_v23 = vpop.f32.mrb[63].mxu1  ;;  %v3735_v3 = vpop.f32.mrb[111].mxu0  ;;  %5652 = vmatmul.mubr.msk.f32.gmra.mrb[140].mxu1 %vm975_vm4, %v7947_v62 }
 0x3ca   : > { %v4217_v26 = vrot.slane %v3428_v23, 7  ;;  %5654 = vmatprep.mubr.msk.f32.mxu1 %vm975_vm4, %v7962_v10 }
 0x3cc   : > { %v4272_v54 = vsel %vm2101_vm6, %v4217_v26, %v4218_v46 }
 0x3cd   : > { %v8114_v13 = vadd.f32 %v5532_v56, %v4272_v54  ;;  %5655 = vmatmul.mubr.msk.f32.gmra.mrb[142].mxu1 %vm975_vm4, %v7965_v14  ;;  %v5459_v49 = vpop.f32.mrb[64].mxu1  ;;  %v5535_v1 = vpop.f32.mrb[112].mxu0 }
 0x3ce   : > { %v3438_v42 = vpop.f32.mrb[65].mxu1  ;;  %v3744_v61 = vpop.f32.mrb[113].mxu0  ;;  %v4220_v33 = vrot.slane %v5459_v49, 7 }
 0x3cf   : > { %v4219_v6 = vrot.slane %v3438_v42, 7 }
 0x3d1   : > { %v4271_v62 = vsel %vm2101_vm6, %v4218_v46, %v4219_v6 }
 0x3d2   : > { %v8120_v47 = vadd.f32 %v4271_v62, %v3744_v61 }
 0x3d3   : > { %v5462_v7 = vpop.f32.mrb[66].mxu1  ;;  %v5538_v10 = vpop.f32.mrb[114].mxu0 }
 0x3d4   : > { %v4222_v30 = vrot.slane %v5462_v7, 7  ;;  %v3448_v36 = vpop.f32.mrb[67].mxu1  ;;  %v3753_v38 = vpop.f32.mrb[115].mxu0 }
 0x3d5   : > { %v4221_v43 = vrot.slane %v3448_v36, 7 }
 0x3d7   : > { %v4269_v14 = vsel %vm2101_vm6, %v4221_v43, %v4222_v30  ;;  %v4270_v52 = vsel %vm2101_vm6, %v4220_v33, %v4221_v43 }
 0x3d8   : > { %v8126_v28 = vadd.f32 %v5538_v10, %v4269_v14  ;;  %v8128_v59 = vadd.f32 %v4270_v52, %v3753_v38 }
 0x3df   : > { %v5465_v15 = vpop.f32.mrb[68].mxu1  ;;  %v5541_v58 = vpop.f32.mrb[116].mxu0 }
 0x3e0   : > { %v4224_v51 = vrot.slane %v5465_v15, 7  ;;  %v3458_v39 = vpop.f32.mrb[69].mxu1  ;;  %v3763_v11 = vpop.f32.mrb[117].mxu0 }
 0x3e1   : > { %v4223_v27 = vrot.slane %v3458_v39, 7 }
 0x3e3   : > { %v4268_v22 = vsel %vm2101_vm6, %v4223_v27, %v4224_v51 }
 0x3e4   : > { %v8132_v37 = vadd.f32 %v5541_v58, %v4268_v22 }
 0x3e5   : > { %v5468_v60 = vpop.f32.mrb[70].mxu1  ;;  %v5544_v32 = vpop.f32.mrb[118].mxu0 }
 0x3e6   : > { %v3468_v24 = vpop.f32.mrb[71].mxu1  ;;  %v3772_v53 = vpop.f32.mrb[119].mxu0  ;;  %v4226_v17 = vrot.slane %v5468_v60, 7 }
 0x3e7   : > { %v4225_v44 = vrot.slane %v3468_v24, 7 }
 0x3e9   : > { %v4267_v20 = vsel %vm2101_vm6, %v4224_v51, %v4225_v44 }
 0x3ea   : > { %v8136_v25 = vadd.f32 %v4267_v20, %v3772_v53 }
 0x3eb   : > { %v5471_v2 = vpop.f32.mrb[72].mxu1  ;;  %v5547_v5 = vpop.f32.mrb[120].mxu0 }
 0x3ec   : > { %v4228_v40 = vrot.slane %v5471_v2, 7  ;;  %v3478_v63 = vpop.f32.mrb[73].mxu1  ;;  %v3781_v31 = vpop.f32.mrb[121].mxu0 }
 0x3ed   : > { %v4227_v18 = vrot.slane %v3478_v63, 7 }
 0x3ef   : > { %v4265_v19 = vsel %vm2101_vm6, %v4227_v18, %v4228_v40  ;;  %v4266_v48 = vsel %vm2101_vm6, %v4226_v17, %v4227_v18 }
 0x3f0   : > { %v8142_v41 = vadd.f32 %v5547_v5, %v4265_v19  ;;  %v8144_v9 = vadd.f32 %v4266_v48, %v3781_v31 }
 0x3f7   : > { %v5474_v56 = vpop.f32.mrb[74].mxu1  ;;  %v5550_v46 = vpop.f32.mrb[122].mxu0 }
 0x3f8   : > { %v4230_v23 = vrot.slane %v5474_v56, 7  ;;  %v3488_v3 = vpop.f32.mrb[75].mxu1  ;;  %v3791_v26 = vpop.f32.mrb[123].mxu0 }
 0x3f9   : > { %v4229_v54 = vrot.slane %v3488_v3, 7 }
 0x3fb   : > { %v4264_v49 = vsel %vm2101_vm6, %v4229_v54, %v4230_v23 }
 0x3fc   : > { %v8148_v1 = vadd.f32 %v5550_v46, %v4264_v49 }
 0x3fd   : > { %v5477_v42 = vpop.f32.mrb[76].mxu1  ;;  %v5553_v61 = vpop.f32.mrb[124].mxu0 }
 0x3fe   : > { %v3498_v6 = vpop.f32.mrb[77].mxu1  ;;  %v3800_v62 = vpop.f32.mrb[125].mxu0  ;;  %v4232_v52 = vrot.slane %v5477_v42, 7 }
 0x3ff   : > { %v4231_v7 = vrot.slane %v3498_v6, 7 }
 0x401   : > { %v4263_v10 = vsel %vm2101_vm6, %v4230_v23, %v4231_v7 }
 0x402   : > { %v8152_v30 = vadd.f32 %v4263_v10, %v3800_v62 }
 0x404   : > { %v5480_v36 = vpop.f32.mrb[78].mxu1  ;;  %v5556_v38 = vpop.f32.mrb[126].mxu0 }
 0x405   : > { %v4234_v33 = vrot.slane %v5480_v36, 7  ;;  %v3508_v43 = vpop.f32.mrb[79].mxu1  ;;  %v3809_v14 = vpop.f32.mrb[127].mxu0 }
 0x406   : > { %v4233_v15 = vrot.slane %v3508_v43, 7 }
 0x408   : > { %v4261_v58 = vsel %vm2101_vm6, %v4233_v15, %v4234_v33  ;;  %v4262_v51 = vsel %vm2101_vm6, %v4232_v52, %v4233_v15 }
 0x409   : > { %v8158_v39 = vadd.f32 %v5556_v38, %v4261_v58  ;;  %v8160_v11 = vadd.f32 %v4262_v51, %v3809_v14 }
 0x410   : > { %v5483_v27 = vpop.f32.mrb[80].mxu1  ;;  %v5559_v22 = vpop.f32.mrb[128].mxu0 }
 0x411   : > { %v4236_v60 = vrot.slane %v5483_v27, 7  ;;  %v3518_v32 = vpop.f32.mrb[81].mxu1  ;;  %v3819_v24 = vpop.f32.mrb[129].mxu0 }
 0x412   : > { %v4235_v53 = vrot.slane %v3518_v32, 7 }
 0x414   : > { %v4260_v44 = vsel %vm2101_vm6, %v4235_v53, %v4236_v60 }
 0x415   : > { %v8164_v20 = vadd.f32 %v5559_v22, %v4260_v44 }
 0x416   : > { %v5486_v2 = vpop.f32.mrb[82].mxu1  ;;  %v5562_v5 = vpop.f32.mrb[130].mxu0 }
 0x417   : > { %v3528_v40 = vpop.f32.mrb[83].mxu1  ;;  %v3828_v63 = vpop.f32.mrb[131].mxu0  ;;  %v4238_v3 = vrot.slane %v5486_v2, 7 }
 0x418   : > { %v4237_v31 = vrot.slane %v3528_v40, 7 }
 0x41a   : > { %v4259_v17 = vsel %vm2101_vm6, %v4236_v60, %v4237_v31 }
 0x41b   : > { %v8168_v18 = vadd.f32 %v4259_v17, %v3828_v63 }
 0x41c   : > { %v5489_v19 = vpop.f32.mrb[84].mxu1  ;;  %v5565_v48 = vpop.f32.mrb[132].mxu0 }
 0x41d   : > { %v4240_v56 = vrot.slane %v5489_v19, 7  ;;  %v3538_v46 = vpop.f32.mrb[85].mxu1  ;;  %v3837_v23 = vpop.f32.mrb[133].mxu0 }
 0x41e   : > { %v4239_v26 = vrot.slane %v3538_v46, 7 }
 0x420   : > { %v4257_v54 = vsel %vm2101_vm6, %v4239_v26, %v4240_v56  ;;  %v4258_v49 = vsel %vm2101_vm6, %v4238_v3, %v4239_v26 }
 0x421   : > { %v8174_v42 = vadd.f32 %v5565_v48, %v4257_v54  ;;  %v8176_v61 = vadd.f32 %v4258_v49, %v3837_v23 }
 0x428   : > { %v5492_v6 = vpop.f32.mrb[86].mxu1  ;;  %v5568_v62 = vpop.f32.mrb[134].mxu0 }
 0x429   : > { %v4242_v7 = vrot.slane %v5492_v6, 7  ;;  %v3548_v10 = vpop.f32.mrb[87].mxu1  ;;  %v3847_v36 = vpop.f32.mrb[135].mxu0 }
 0x42a   : > { %v4241_v38 = vrot.slane %v3548_v10, 7 }
 0x42c   : > { %v4256_v33 = vsel %vm2101_vm6, %v4241_v38, %v4242_v7 }
 0x42d   : > { %v8180_v43 = vadd.f32 %v5568_v62, %v4256_v33 }
 0x42e   : > { %v5495_v14 = vpop.f32.mrb[88].mxu1  ;;  %v5571_v52 = vpop.f32.mrb[136].mxu0 }
 0x42f   : > { %v3558_v15 = vpop.f32.mrb[89].mxu1  ;;  %v3856_v58 = vpop.f32.mrb[137].mxu0  ;;  %v4244_v2 = vrot.slane %v5495_v14, 7 }
 0x430   : > { %v4243_v51 = vrot.slane %v3558_v15, 7 }
 0x432   : > { %v4255_v27 = vsel %vm2101_vm6, %v4242_v7, %v4243_v51 }
 0x433   : > { %v8184_v22 = vadd.f32 %v4255_v27, %v3856_v58 }
 0x434   : > { %v5498_v60 = vpop.f32.mrb[90].mxu1  ;;  %v5574_v32 = vpop.f32.mrb[138].mxu0 }
 0x435   : > { %v4246_v24 = vrot.slane %v5498_v60, 7  ;;  %v3568_v53 = vpop.f32.mrb[91].mxu1  ;;  %v3865_v44 = vpop.f32.mrb[139].mxu0 }
 0x436   : > { %v4245_v5 = vrot.slane %v3568_v53, 7 }
 0x438   : > { %v4253_v40 = vsel %vm2101_vm6, %v4245_v5, %v4246_v24  ;;  %v4254_v63 = vsel %vm2101_vm6, %v4244_v2, %v4245_v5  ;;  %v5501_v31 = vpop.f32.mrb[92].mxu1  ;;  %v5577_v17 = vpop.f32.mrb[140].mxu0  ;;  %v5705_v5 = vld [vmem:[%s5867_s6] sm:$0xff] }
 0x439   : > { %v8190_v19 = vadd.f32 %v5574_v32, %v4253_v40  ;;  %v8192_v48 = vadd.f32 %v4254_v63, %v3865_v44  ;;  %v4248_v56 = vrot.slane %v5501_v31, 7  ;;  %v3578_v46 = vpop.f32.mrb[93].mxu1  ;;  %v3875_v23 = vpop.f32.mrb[141].mxu0 }
 0x43a   : > { %v4247_v3 = vrot.slane %v3578_v46, 7 }
 0x43c   : > { %v4252_v26 = vsel %vm2101_vm6, %v4247_v3, %v4248_v56 }
 0x43d   : > { %v8196_v54 = vadd.f32 %v5577_v17, %v4252_v26 }
 0x440   : > { %v5504_v49 = vpop.f32.mrb[94].mxu1  ;;  %v5580_v6 = vpop.f32.mrb[142].mxu0 }
 0x441   : > { %v4250_v62 = vrot.slane %v5504_v49, 7  ;;  %v3588_v7 = vpop.f32.mrb[95].mxu1  ;;  %v3884_v10 = vpop.f32.mrb[143].mxu0  ;;  %v5706_v6 = vld [vmem:[%s5867_s6 + $0x8] sm:$0xff] }
 0x442   : > { %v4249_v36 = vrot.slane %v3588_v7, 7 }
 0x443   : > { %v4282_v38 = vsel %vm2101_vm6, %v4250_v62, %v4203_v12 }
 0x444   : > { %v4283_v33 = vadd.f32 %v4282_v38, %v8008_v34  ;;  %v4251_v14 = vsel %vm2101_vm6, %v4248_v56, %v4249_v36  ;;  %v5587_v52 = vpop.f32.mrb[96].mxu1 }
 0x445   : > { %v8205_v15 = vadd.f32 %v4251_v14, %v3884_v10  ;;  %v4316_v58 = vrot.slane %v5587_v52, 1  ;;  %v3964_v51 = vpop.f32.mrb[97].mxu1 }
 0x446   : > { %v4315_v27 = vrot.slane %v3964_v51, 1  ;;  %v5707_v51 = vld [vmem:[%s5867_s6 + $0x10] sm:$0xff] }
 0x448   : > { %v4394_v12 = vsel %vm2246_vm7, %v4315_v27, %v4316_v58  ;;  %v5590_v60 = vpop.f32.mrb[98].mxu1  ;;  %v5708_v27 = vld [vmem:[%s5867_s6 + $0x18] sm:$0xff] }
 0x449   : > { %v4395_v34 = vadd.f32 %v4394_v12, %v4283_v33  ;;  %v3974_v32 = vpop.f32.mrb[99].mxu1  ;;  %v4318_v56 = vrot.slane %v5590_v60, 1 }
 0x44a   : > { %v4317_v24 = vrot.slane %v3974_v32, 1 }
 0x44b   : > { %v4433_v53 = vadd.f32 %v8210_v21, %v4395_v34 }
 0x44c   : > { %v4393_v44 = vsel %vm2246_vm7, %v4316_v58, %v4317_v24  ;;  %v5593_v2 = vpop.f32.mrb[100].mxu1 }
 0x44d   : > { %v4465_v40 = vadd.f32 %v5705_v5, %v4433_v53  ;;  %v4396_v63 = vadd.f32 %v4393_v44, %v8018_v55  ;;  %v4320_v31 = vrot.slane %v5593_v2, 1  ;;  %v3984_v17 = vpop.f32.mrb[101].mxu1  ;;  %v5709_v44 = vld [vmem:[%s5867_s6 + $0x20] sm:$0xff] }
 0x44e   : > { %v4319_v46 = vrot.slane %v3984_v17, 1 }
 0x44f   : > { %4497 = vst.msk [vmem:[%s8220_s10] sm:$0xff] %vm257_vm0, %v4465_v40  ;;  %v4434_v23 = vadd.f32 %v8210_v21, %v4396_v63 }
 0x450   : > { %v4391_v3 = vsel %vm2246_vm7, %v4319_v46, %v4320_v31  ;;  %v4392_v26 = vsel %vm2246_vm7, %v4318_v56, %v4319_v46  ;;  %v5596_v49 = vpop.f32.mrb[102].mxu1 }
 0x451   : > { %v4466_v55 = vadd.f32 %v5706_v6, %v4434_v23  ;;  %v4397_v62 = vadd.f32 %v4392_v26, %v8034_v35  ;;  %v4398_v7 = vadd.f32 %v4391_v3, %v8044_v29  ;;  %v4322_v10 = vrot.slane %v5596_v49, 1  ;;  %v3994_v36 = vpop.f32.mrb[103].mxu1  ;;  %v5710_v3 = vld [vmem:[%s5867_s6 + $0x28] sm:$0xff] }
 0x452   : > { %v4321_v38 = vrot.slane %v3994_v36, 1 }
 0x453   : > { %4498 = vst.msk [vmem:[%s8220_s10 + $0x8] sm:$0xff] %vm257_vm0, %v4466_v55  ;;  %v4435_v33 = vadd.f32 %v8210_v21, %v4397_v62  ;;  %v4436_v14 = vadd.f32 %v8210_v21, %v4398_v7 }
 0x454   : > { %v4390_v52 = vsel %vm2246_vm7, %v4321_v38, %v4322_v10  ;;  %v5599_v58 = vpop.f32.mrb[104].mxu1 }
 0x455   : > { %v4467_v35 = vadd.f32 %v5707_v51, %v4435_v33  ;;  %v4468_v29 = vadd.f32 %v5708_v27, %v4436_v14  ;;  %v4399_v12 = vadd.f32 %v4390_v52, %v8058_v50  ;;  %v4004_v60 = vpop.f32.mrb[105].mxu1  ;;  %v4324_v63 = vrot.slane %v5599_v58, 1  ;;  %v5711_v33 = vld [vmem:[%s5867_s6 + $0x30] sm:$0xff]  ;;  %v5712_v14 = vld [vmem:[%s5867_s6 + $0x38] sm:$0xff] }
 0x456   : > { %v4323_v34 = vrot.slane %v4004_v60, 1 }
 0x457   : > { %4499 = vst.msk [vmem:[%s8220_s10 + $0x10] sm:$0xff] %vm257_vm0, %v4467_v35  ;;  %4500 = vst.msk [vmem:[%s8220_s10 + $0x18] sm:$0xff] %vm257_vm0, %v4468_v29  ;;  %v4437_v32 = vadd.f32 %v8210_v21, %v4399_v12  ;;  %v5713_v12 = vld [vmem:[%s5867_s6 + $0x40] sm:$0xff] }
 0x458   : > { %v4389_v24 = vsel %vm2246_vm7, %v4322_v10, %v4323_v34  ;;  %v5602_v53 = vpop.f32.mrb[106].mxu1 }
 0x459   : > { %v4469_v2 = vadd.f32 %v5709_v44, %v4437_v32  ;;  %v4400_v5 = vadd.f32 %v4389_v24, %v8056_v4  ;;  %v4326_v40 = vrot.slane %v5602_v53, 1  ;;  %v4014_v50 = vpop.f32.mrb[107].mxu1 }
 0x45a   : > { %v4325_v31 = vrot.slane %v4014_v50, 1  ;;  %v5714_v50 = vld [vmem:[%s5867_s6 + $0x48] sm:$0xff] }
 0x45b   : > { %4501 = vst.msk [vmem:[%s8220_s10 + $0x20] sm:$0xff] %vm257_vm0, %v4469_v2  ;;  %v4438_v17 = vadd.f32 %v8210_v21, %v4400_v5 }
 0x45c   : > { %v4387_v56 = vsel %vm2246_vm7, %v4325_v31, %v4326_v40  ;;  %v4388_v46 = vsel %vm2246_vm7, %v4324_v63, %v4325_v31  ;;  %v5605_v23 = vpop.f32.mrb[108].mxu1 }
 0x45d   : > { %v4470_v4 = vadd.f32 %v5710_v3, %v4438_v17  ;;  %v4401_v26 = vadd.f32 %v4388_v46, %v8074_v45  ;;  %v4402_v49 = vadd.f32 %v4387_v56, %v8084_v16  ;;  %v4328_v6 = vrot.slane %v5605_v23, 1  ;;  %v4024_v55 = vpop.f32.mrb[109].mxu1 }
 0x45e   : > { %v4327_v62 = vrot.slane %v4024_v55, 1 }
 0x45f   : > { %4502 = vst.msk [vmem:[%s8220_s10 + $0x28] sm:$0xff] %vm257_vm0, %v4470_v4  ;;  %v4439_v7 = vadd.f32 %v8210_v21, %v4401_v26  ;;  %v4440_v10 = vadd.f32 %v8210_v21, %v4402_v49  ;;  %v5715_v49 = vld [vmem:[%s5867_s6 + $0x50] sm:$0xff] }
 0x460   : > { %v4386_v36 = vsel %vm2246_vm7, %v4327_v62, %v4328_v6  ;;  %v5608_v38 = vpop.f32.mrb[110].mxu1 }
 0x461   : > { %v4471_v45 = vadd.f32 %v5711_v33, %v4439_v7  ;;  %v4472_v16 = vadd.f32 %v5712_v14, %v4440_v10  ;;  %v4403_v52 = vadd.f32 %v4386_v36, %v8098_v0  ;;  %v4034_v58 = vpop.f32.mrb[111].mxu1  ;;  %v4330_v24 = vrot.slane %v5608_v38, 1  ;;  %v5717_v33 = vld [vmem:[%s5867_s6 + $0x60] sm:$0xff] }
 0x462   : > { %v4329_v51 = vrot.slane %v4034_v58, 1 }
 0x463   : > { %4503 = vst.msk [vmem:[%s8220_s10 + $0x30] sm:$0xff] %vm257_vm0, %v4471_v45  ;;  %4504 = vst.msk [vmem:[%s8220_s10 + $0x38] sm:$0xff] %vm257_vm0, %v4472_v16  ;;  %v4441_v35 = vadd.f32 %v8210_v21, %v4403_v52 }
 0x464   : > { %v4385_v27 = vsel %vm2246_vm7, %v4328_v6, %v4329_v51  ;;  %v5611_v29 = vpop.f32.mrb[112].mxu1  ;;  %v5716_v6 = vld [vmem:[%s5867_s6 + $0x58] sm:$0xff] }
 0x465   : > { %v4473_v60 = vadd.f32 %v5713_v12, %v4441_v35  ;;  %v4404_v34 = vadd.f32 %v4385_v27, %v8096_v57  ;;  %v4332_v32 = vrot.slane %v5611_v29, 1  ;;  %v4044_v0 = vpop.f32.mrb[113].mxu1  ;;  %v5718_v12 = vld [vmem:[%s5867_s6 + $0x68] sm:$0xff] }
 0x466   : > { %v4331_v53 = vrot.slane %v4044_v0, 1 }
 0x467   : > { %4505 = vst.msk [vmem:[%s8220_s10 + $0x40] sm:$0xff] %vm257_vm0, %v4473_v60  ;;  %v4442_v44 = vadd.f32 %v8210_v21, %v4404_v34 }
 0x468   : > { %v4383_v2 = vsel %vm2246_vm7, %v4331_v53, %v4332_v32  ;;  %v4384_v5 = vsel %vm2246_vm7, %v4330_v24, %v4331_v53  ;;  %v5614_v40 = vpop.f32.mrb[114].mxu1 }
 0x469   : > { %v4474_v57 = vadd.f32 %v5714_v50, %v4442_v44  ;;  %v4405_v63 = vadd.f32 %v4384_v5, %v8114_v13  ;;  %v4406_v31 = vadd.f32 %v4383_v2, %v8120_v47  ;;  %v4334_v17 = vrot.slane %v5614_v40, 1  ;;  %v4054_v56 = vpop.f32.mrb[115].mxu1  ;;  %v5719_v40 = vld [vmem:[%s5867_s6 + $0x70] sm:$0xff]  ;;  %v5720_v50 = vld [vmem:[%s5867_s6 + $0x78] sm:$0xff] }
 0x46a   : > { %v4333_v46 = vrot.slane %v4054_v56, 1 }
 0x46b   : > { %4506 = vst.msk [vmem:[%s8220_s10 + $0x48] sm:$0xff] %vm257_vm0, %v4474_v57  ;;  %v4443_v23 = vadd.f32 %v8210_v21, %v4405_v63  ;;  %v4444_v3 = vadd.f32 %v8210_v21, %v4406_v31 }
 0x46c   : > { %v4382_v4 = vsel %vm2246_vm7, %v4333_v46, %v4334_v17  ;;  %v5617_v26 = vpop.f32.mrb[116].mxu1 }
 0x46d   : > { %v4475_v13 = vadd.f32 %v5715_v49, %v4443_v23  ;;  %v4476_v47 = vadd.f32 %v5716_v6, %v4444_v3  ;;  %v4407_v55 = vadd.f32 %v4382_v4, %v8128_v59  ;;  %v4064_v62 = vpop.f32.mrb[117].mxu1  ;;  %v4336_v52 = vrot.slane %v5617_v26, 1  ;;  %v5721_v23 = vld [vmem:[%s5867_s6 + $0x80] sm:$0xff] }
 0x46e   : > { %v4335_v7 = vrot.slane %v4064_v62, 1 }
 0x46f   : > { %4507 = vst.msk [vmem:[%s8220_s10 + $0x50] sm:$0xff] %vm257_vm0, %v4475_v13  ;;  %4508 = vst.msk [vmem:[%s8220_s10 + $0x58] sm:$0xff] %vm257_vm0, %v4476_v47  ;;  %v4445_v10 = vadd.f32 %v8210_v21, %v4407_v55 }
 0x470   : > { %v4381_v36 = vsel %vm2246_vm7, %v4334_v17, %v4335_v7  ;;  %v5620_v38 = vpop.f32.mrb[118].mxu1  ;;  %v5722_v7 = vld [vmem:[%s5867_s6 + $0x88] sm:$0xff] }
 0x471   : > { %v4477_v45 = vadd.f32 %v5717_v33, %v4445_v10  ;;  %v4408_v14 = vadd.f32 %v4381_v36, %v8126_v28  ;;  %v4338_v16 = vrot.slane %v5620_v38, 1  ;;  %v4074_v59 = vpop.f32.mrb[119].mxu1 }
 0x472   : > { %v4337_v58 = vrot.slane %v4074_v59, 1 }
 0x473   : > { %4509 = vst.msk [vmem:[%s8220_s10 + $0x60] sm:$0xff] %vm257_vm0, %v4477_v45  ;;  %v4446_v51 = vadd.f32 %v8210_v21, %v4408_v14 }
 0x474   : > { %v4379_v35 = vsel %vm2246_vm7, %v4337_v58, %v4338_v16  ;;  %v4380_v27 = vsel %vm2246_vm7, %v4336_v52, %v4337_v58  ;;  %v5623_v29 = vpop.f32.mrb[120].mxu1  ;;  %v5723_v58 = vld [vmem:[%s5867_s6 + $0x90] sm:$0xff] }
 0x475   : > { %v4478_v28 = vadd.f32 %v5718_v12, %v4446_v51  ;;  %v4409_v60 = vadd.f32 %v4380_v27, %v8132_v37  ;;  %v4410_v34 = vadd.f32 %v4379_v35, %v8136_v25  ;;  %v4340_v32 = vrot.slane %v5623_v29, 1  ;;  %v4084_v0 = vpop.f32.mrb[121].mxu1  ;;  %v5724_v51 = vld [vmem:[%s5867_s6 + $0x98] sm:$0xff] }
 0x476   : > { %v4339_v24 = vrot.slane %v4084_v0, 1 }
 0x477   : > { %4510 = vst.msk [vmem:[%s8220_s10 + $0x68] sm:$0xff] %vm257_vm0, %v4478_v28  ;;  %v4447_v53 = vadd.f32 %v8210_v21, %v4409_v60  ;;  %v4448_v44 = vadd.f32 %v8210_v21, %v4410_v34  ;;  %v5725_v34 = vld [vmem:[%s5867_s6 + $0xa0] sm:$0xff] }
 0x478   : > { %v4378_v2 = vsel %vm2246_vm7, %v4339_v24, %v4340_v32  ;;  %v5626_v5 = vpop.f32.mrb[122].mxu1 }
 0x479   : > { %v4479_v37 = vadd.f32 %v5719_v40, %v4447_v53  ;;  %v4480_v25 = vadd.f32 %v5720_v50, %v4448_v44  ;;  %v4411_v57 = vadd.f32 %v4378_v2, %v8144_v9  ;;  %v4094_v63 = vpop.f32.mrb[123].mxu1  ;;  %v4342_v49 = vrot.slane %v5626_v5, 1  ;;  %v5726_v50 = vld [vmem:[%s5867_s6 + $0xa8] sm:$0xff] }
 0x47a   : > { %v4341_v31 = vrot.slane %v4094_v63, 1 }
 0x47b   : > { %4511 = vst.msk [vmem:[%s8220_s10 + $0x70] sm:$0xff] %vm257_vm0, %v4479_v37  ;;  %4512 = vst.msk [vmem:[%s8220_s10 + $0x78] sm:$0xff] %vm257_vm0, %v4480_v25  ;;  %v4449_v17 = vadd.f32 %v8210_v21, %v4411_v57 }
 0x47c   : > { %v4377_v56 = vsel %vm2246_vm7, %v4340_v32, %v4341_v31  ;;  %v5629_v46 = vpop.f32.mrb[124].mxu1 }
 0x47d   : > { %v4481_v3 = vadd.f32 %v5721_v23, %v4449_v17  ;;  %v4412_v4 = vadd.f32 %v4377_v56, %v8142_v41  ;;  %v4344_v26 = vrot.slane %v5629_v46, 1  ;;  %v4104_v9 = vpop.f32.mrb[125].mxu1 }
 0x47e   : > { %v4343_v13 = vrot.slane %v4104_v9, 1 }
 0x47f   : > { %4513 = vst.msk [vmem:[%s8220_s10 + $0x80] sm:$0xff] %vm257_vm0, %v4481_v3  ;;  %v4450_v6 = vadd.f32 %v8210_v21, %v4412_v4  ;;  %v5727_v4 = vld [vmem:[%s5867_s6 + $0xb0] sm:$0xff] }
 0x480   : > { %v4375_v47 = vsel %vm2246_vm7, %v4343_v13, %v4344_v26  ;;  %v4376_v55 = vsel %vm2246_vm7, %v4342_v49, %v4343_v13  ;;  %v5632_v62 = vpop.f32.mrb[126].mxu1  ;;  %v5728_v26 = vld [vmem:[%s5867_s6 + $0xb8] sm:$0xff] }
 0x481   : > { %v4482_v41 = vadd.f32 %v5722_v7, %v4450_v6  ;;  %v4413_v10 = vadd.f32 %v4376_v55, %v8148_v1  ;;  %v4414_v36 = vadd.f32 %v4375_v47, %v8152_v30  ;;  %v4346_v38 = vrot.slane %v5632_v62, 1  ;;  %v4114_v33 = vpop.f32.mrb[127].mxu1  ;;  %v5729_v62 = vld [vmem:[%s5867_s6 + $0xc0] sm:$0xff] }
 0x482   : > { %v4345_v45 = vrot.slane %v4114_v33, 1 }
 0x483   : > { %4514 = vst.msk [vmem:[%s8220_s10 + $0x88] sm:$0xff] %vm257_vm0, %v4482_v41  ;;  %v4451_v14 = vadd.f32 %v8210_v21, %v4413_v10  ;;  %v4452_v16 = vadd.f32 %v8210_v21, %v4414_v36 }
 0x484   : > { %v4374_v59 = vsel %vm2246_vm7, %v4345_v45, %v4346_v38  ;;  %v5635_v52 = vpop.f32.mrb[128].mxu1 }
 0x485   : > { %v4483_v1 = vadd.f32 %v5723_v58, %v4451_v14  ;;  %v4484_v30 = vadd.f32 %v5724_v51, %v4452_v16  ;;  %v4415_v35 = vadd.f32 %v4374_v59, %v8160_v11  ;;  %v4124_v27 = vpop.f32.mrb[129].mxu1  ;;  %v4348_v53 = vrot.slane %v5635_v52, 1  ;;  %v5730_v59 = vld [vmem:[%s5867_s6 + $0xc8] sm:$0xff] }
 0x486   : > { %v4347_v29 = vrot.slane %v4124_v27, 1 }
 0x487   : > { %4515 = vst.msk [vmem:[%s8220_s10 + $0x90] sm:$0xff] %vm257_vm0, %v4483_v1  ;;  %4516 = vst.msk [vmem:[%s8220_s10 + $0x98] sm:$0xff] %vm257_vm0, %v4484_v30  ;;  %v4453_v12 = vadd.f32 %v8210_v21, %v4415_v35 }
 0x488   : > { %v4373_v28 = vsel %vm2246_vm7, %v4346_v38, %v4347_v29  ;;  %v5638_v60 = vpop.f32.mrb[130].mxu1 }
 0x489   : > { %v4485_v32 = vadd.f32 %v5725_v34, %v4453_v12  ;;  %v4416_v0 = vadd.f32 %v4373_v28, %v8158_v39  ;;  %v4350_v24 = vrot.slane %v5638_v60, 1  ;;  %v4134_v11 = vpop.f32.mrb[131].mxu1  ;;  %v5731_v28 = vld [vmem:[%s5867_s6 + $0xd0] sm:$0xff]  ;;  %v5732_v60 = vld [vmem:[%s5867_s6 + $0xd8] sm:$0xff] }
 0x48a   : > { %v4349_v44 = vrot.slane %v4134_v11, 1 }
 0x48b   : > { %4517 = vst.msk [vmem:[%s8220_s10 + $0xa0] sm:$0xff] %vm257_vm0, %v4485_v32  ;;  %v4454_v2 = vadd.f32 %v8210_v21, %v4416_v0 }
 0x48c   : > { %v4371_v5 = vsel %vm2246_vm7, %v4349_v44, %v4350_v24  ;;  %v4372_v40 = vsel %vm2246_vm7, %v4348_v53, %v4349_v44  ;;  %v5641_v37 = vpop.f32.mrb[132].mxu1  ;;  %v5733_v44 = vld [vmem:[%s5867_s6 + $0xe0] sm:$0xff] }
 0x48d   : > { %v4486_v39 = vadd.f32 %v5726_v50, %v4454_v2  ;;  %v4417_v25 = vadd.f32 %v4372_v40, %v8164_v20  ;;  %v4418_v57 = vadd.f32 %v4371_v5, %v8168_v18  ;;  %v4352_v63 = vrot.slane %v5641_v37, 1  ;;  %v4144_v31 = vpop.f32.mrb[133].mxu1 }
 0x48e   : > { %v4351_v17 = vrot.slane %v4144_v31, 1 }
 0x48f   : > { %4518 = vst.msk [vmem:[%s8220_s10 + $0xa8] sm:$0xff] %vm257_vm0, %v4486_v39  ;;  %v4455_v56 = vadd.f32 %v8210_v21, %v4417_v25  ;;  %v4456_v46 = vadd.f32 %v8210_v21, %v4418_v57 }
 0x490   : > { %v4370_v23 = vsel %vm2246_vm7, %v4351_v17, %v4352_v63  ;;  %v5644_v3 = vpop.f32.mrb[134].mxu1 }
 0x491   : > { %v4487_v20 = vadd.f32 %v5727_v4, %v4455_v56  ;;  %v4488_v18 = vadd.f32 %v5728_v26, %v4456_v46  ;;  %v4419_v9 = vadd.f32 %v4370_v23, %v8176_v61  ;;  %v4154_v49 = vpop.f32.mrb[135].mxu1  ;;  %v4354_v36 = vrot.slane %v5644_v3, 1  ;;  %v5735_v23 = vld [vmem:[%s5867_s6 + $0xf0] sm:$0xff]  ;;  %v5736_v4 = vld [vmem:[%s5867_s6 + $0xf8] sm:$0xff] }
 0x492   : > { %v4353_v13 = vrot.slane %v4154_v49, 1 }
 0x493   : > { %4519 = vst.msk [vmem:[%s8220_s10 + $0xb0] sm:$0xff] %vm257_vm0, %v4487_v20  ;;  %4520 = vst.msk [vmem:[%s8220_s10 + $0xb8] sm:$0xff] %vm257_vm0, %v4488_v18  ;;  %v4457_v6 = vadd.f32 %v8210_v21, %v4419_v9 }
 0x494   : > { %v4369_v47 = vsel %vm2246_vm7, %v4352_v63, %v4353_v13  ;;  %v5647_v55 = vpop.f32.mrb[136].mxu1  ;;  %v5734_v63 = vld [vmem:[%s5867_s6 + $0xe8] sm:$0xff] }
 0x495   : > { %v4489_v7 = vadd.f32 %v5729_v62, %v4457_v6  ;;  %v4420_v41 = vadd.f32 %v4369_v47, %v8174_v42  ;;  %v4356_v10 = vrot.slane %v5647_v55, 1  ;;  %v4164_v61 = vpop.f32.mrb[137].mxu1 }
 0x496   : > { %v4355_v38 = vrot.slane %v4164_v61, 1 }
 0x497   : > { %4521 = vst.msk [vmem:[%s8220_s10 + $0xc0] sm:$0xff] %vm257_vm0, %v4489_v7  ;;  %v4458_v33 = vadd.f32 %v8210_v21, %v4420_v41 }
 0x498   : > { %v4367_v45 = vsel %vm2246_vm7, %v4355_v38, %v4356_v10  ;;  %v4368_v14 = vsel %vm2246_vm7, %v4354_v36, %v4355_v38  ;;  %v5650_v16 = vpop.f32.mrb[138].mxu1 }
 0x499   : > { %v4490_v42 = vadd.f32 %v5730_v59, %v4458_v33  ;;  %v4421_v52 = vadd.f32 %v4368_v14, %v8180_v43  ;;  %v4422_v58 = vadd.f32 %v4367_v45, %v8184_v22  ;;  %v4358_v1 = vrot.slane %v5650_v16, 1  ;;  %v4174_v51 = vpop.f32.mrb[139].mxu1 }
 0x49a   : > { %v4357_v30 = vrot.slane %v4174_v51, 1 }
 0x49b   : > { %4522 = vst.msk [vmem:[%s8220_s10 + $0xc8] sm:$0xff] %vm257_vm0, %v4490_v42  ;;  %v4459_v35 = vadd.f32 %v8210_v21, %v4421_v52  ;;  %v4460_v27 = vadd.f32 %v8210_v21, %v4422_v58 }
 0x49c   : > { %v4366_v29 = vsel %vm2246_vm7, %v4357_v30, %v4358_v1  ;;  %v5653_v12 = vpop.f32.mrb[140].mxu1 }
 0x49d   : > { %v4491_v43 = vadd.f32 %v5731_v28, %v4459_v35  ;;  %v4492_v22 = vadd.f32 %v5732_v60, %v4460_v27  ;;  %v4423_v34 = vadd.f32 %v4366_v29, %v8192_v48  ;;  %v4184_v32 = vpop.f32.mrb[141].mxu1  ;;  %v4360_v37 = vrot.slane %v5653_v12, 1 }
 0x49e   : > { %v4359_v0 = vrot.slane %v4184_v32, 1 }
 0x49f   : > { %4523 = vst.msk [vmem:[%s8220_s10 + $0xd0] sm:$0xff] %vm257_vm0, %v4491_v43  ;;  %4524 = vst.msk [vmem:[%s8220_s10 + $0xd8] sm:$0xff] %vm257_vm0, %v4492_v22  ;;  %v4461_v24 = vadd.f32 %v8210_v21, %v4423_v34 }
 0x4a0   : > { %v4365_v11 = vsel %vm2246_vm7, %v4358_v1, %v4359_v0  ;;  %v5656_v53 = vpop.f32.mrb[142].mxu1 }
 0x4a1   : > { %v4493_v2 = vadd.f32 %v5733_v44, %v4461_v24  ;;  %v4424_v5 = vadd.f32 %v4365_v11, %v8190_v19  ;;  %v4362_v48 = vrot.slane %v5656_v53, 1  ;;  %v4194_v40 = vpop.f32.mrb[143].mxu1 }
 0x4a2   : > { %v4361_v50 = vrot.slane %v4194_v40, 1 }
 0x4a3   : > { %4525 = vst.msk [vmem:[%s8220_s10 + $0xe0] sm:$0xff] %vm257_vm0, %v4493_v2  ;;  %v4462_v39 = vadd.f32 %v8210_v21, %v4424_v5 }
 0x4a4   : > { %v4363_v25 = vsel %vm2246_vm7, %v4361_v50, %v4362_v48  ;;  %v4364_v57 = vsel %vm2246_vm7, %v4360_v37, %v4361_v50 }
 0x4a5   : > { %v4494_v19 = vadd.f32 %v5734_v63, %v4462_v39  ;;  %v4425_v31 = vadd.f32 %v4364_v57, %v8196_v54  ;;  %v4426_v17 = vadd.f32 %v4363_v25, %v8205_v15 }
 0x4a7   : > { %4526 = vst.msk [vmem:[%s8220_s10 + $0xe8] sm:$0xff] %vm257_vm0, %v4494_v19  ;;  %v4463_v56 = vadd.f32 %v8210_v21, %v4425_v31  ;;  %v4464_v46 = vadd.f32 %v8210_v21, %v4426_v17 }
 0x4a9   : > { %v4495_v3 = vadd.f32 %v5735_v23, %v4463_v56  ;;  %v4496_v20 = vadd.f32 %v5736_v4, %v4464_v46 }
 0x4ab   : > { %4527 = vst.msk [vmem:[%s8220_s10 + $0xf0] sm:$0xff] %vm257_vm0, %v4495_v3  ;;  %4528 = vst.msk [vmem:[%s8220_s10 + $0xf8] sm:$0xff] %vm257_vm0, %v4496_v20 }
 0x4ac PF: > { %s15_s18 = sadd.s32 1, %s5743_s18  }
 0x4ad   : > { %p12_p4 = scmp.ge.s32.totalorder %s15_s18, 4  }
 0x4af   :  { %14 = sbr.rel (!%p12_p4) target bundleno = 1 (0x1), region = 80 }

</bundles_post_ra>
